<compile_context>
chip_gen: v5e
topology: v5e:2x2
jax: 0.10.0
libtpu: 0.0.40
codegen_flags: <defaults>
</compile_context>

<pallas_src>
import functools

import jax
import jax.numpy as jnp
from jax.experimental import pallas as pl
from jax.experimental.pallas import tpu as pltpu


_GRAM_KINDS = ("L2 Norm", "Cosine")
_EPS = 1e-16


def _round_up(v, m):
    return ((v + m - 1) // m) * m


def _vmem_capacity_bytes():
    try:
        return int(pltpu.get_tpu_info().vmem_capacity_bytes)
    except Exception:  # not queryable: assume the smallest (v7x: 64 MiB / TC)
        return 64 * 1024 * 1024


def _choose_tiles(n, a, bc, b_pad, tile_n=None, tile_p=None):
    """VMEM-budget-aware (row tile, partner tile) selection."""
    budget = _vmem_capacity_bytes() // 2     # headroom for double buffers / regalloc

    if tile_n is None:
        # Largest power-of-two row tile <= 256 that still leaves >= 2 row tiles
        # (v7x has 2 TensorCores; a 1-step "parallel" grid idles one of them).
        n8 = _round_up(max(n, 1), 8)
        tile_n = 8
        while tile_n < 256 and 2 * (2 * tile_n) <= n8:
            tile_n *= 2

    if tile_p is None:
        # Per partner column: ~4 live (tile_n, tile_p) f32 temporaries + the
        # double-buffered mT / pstat blocks.
        per_col = 4 * (4 * tile_n) + 2 * 4 * (bc + 8)
        fixed = 4 * (2 * tile_n * a + 2 * tile_n * b_pad
                     + tile_n * (bc + b_pad) + a * bc)
        max_p = max((budget - fixed) // per_col, 128)
        if n < 128:
            tile_p = _round_up(n, 8)                 # full (tiny) partner axis
        elif _round_up(n, 128) <= max_p:
            tile_p = _round_up(n, 128)               # whole partner axis, 1 tile
        else:
            tile_p = (max_p // 128) * 128            # budget-limited, lane-dense
    return tile_n, tile_p


# ---------------------------------------------------------------------------
# Fused kernel: projection (j==0) + pairwise distances + exp + partner-sum.
# Grid: (row tiles [parallel], partner-column tiles [arbitrary, innermost]).
# ---------------------------------------------------------------------------
def _mbd_kernel(x_ref, t_ref, mT_ref, ps_ref, o_ref, m_sc, acc_sc, *,
                B, C, kind, mean, n_valid, mask_cols, use_bf16):
    i = pl.program_id(0)
    j = pl.program_id(1)
    last_j = pl.num_programs(1) - 1
    tile_n = x_ref.shape[0]
    tile_p = mT_ref.shape[1]
    b_pad = o_ref.shape[1]

    @pl.when(j == 0)
    def _():
        xt = x_ref[...]
        tt = t_ref[...]
        if use_bf16:
            xt = xt.astype(jnp.bfloat16)
            tt = tt.astype(jnp.bfloat16)
        # Row-tile projection on the MXU, cached for all partner tiles of this row.
        m_sc[...] = jnp.dot(xt, tt, preferred_element_type=jnp.float32)
        acc_sc[...] = jnp.zeros_like(acc_sc)

    m_i = m_sc[...]                                   # (tile_n, B*C)  f32
    mT = mT_ref[...]                                  # (B*C, tile_p)  f32 (bf16 for Gram+bf16)
    ps = ps_ref[...] if kind in _GRAM_KINDS else None  # (B, tile_p) hoisted partner stats

    # Mask: padded partner columns always; the self column for the kinds whose
    # self-expnorm is exactly 1 (it then cancels the reference's "-1" exactly).
    col_g = jax.lax.broadcasted_iota(jnp.int32, (tile_n, tile_p), 1) + j * tile_p
    if kind == "Cosine":
        mask = (col_g >= n_valid) if mask_cols else None
    else:
        row_g = jax.lax.broadcasted_iota(jnp.int32, (tile_n, tile_p), 0) + i * tile_n
        mask = col_g == row_g
        if mask_cols:
            mask = jnp.logical_or(mask, col_g >= n_valid)

    cols = []
    for b in range(B):                                # B is small & static: unrolled
        mi_b = m_i[:, b * C:(b + 1) * C]              # (tile_n, C)
        mT_b = mT[b * C:(b + 1) * C, :]               # (C, tile_p)

        if kind in ("L1 Norm", "identical"):
            if kind == "identical":                   # pre-scale tiny operands, not the big tile
                mi_b = mi_b * 100.0
                mT_b = mT_b * 100.0
            acc = jnp.zeros((tile_n, tile_p), jnp.float32)
            for c in range(C):                        # lane-dense VPU accumulation
                acc = acc - jnp.abs(mi_b[:, c:c + 1] - mT_b[c:c + 1, :])
            expnorm = jnp.exp(acc)
        elif kind == "L2 Norm":
            a_op = mi_b * 2.0                         # fold the *2 into the MXU operand
            b_op = mT_b
            if use_bf16:
                a_op = a_op.astype(jnp.bfloat16)
                b_op = b_op.astype(jnp.bfloat16)
            g2 = jnp.dot(a_op, b_op, preferred_element_type=jnp.float32)  # 2<mi,mj>
            ri = jnp.sum(mi_b * mi_b, axis=1, keepdims=True)              # (tile_n, 1)
            rj = ps[b:b + 1, :]                                           # (1, tile_p)
            # exponent = -max(ri + rj - 2<mi,mj>, 0)
            expnorm = jnp.exp(jnp.minimum((g2 - ri) - rj, 0.0))
        elif kind == "Cosine":
            a_op = mi_b
            b_op = mT_b
            if use_bf16:
                a_op = a_op.astype(jnp.bfloat16)
                b_op = b_op.astype(jnp.bfloat16)
            g = jnp.dot(a_op, b_op, preferred_element_type=jnp.float32)
            ri = jnp.sum(mi_b * mi_b, axis=1, keepdims=True)
            # rsqrt factors instead of a full-tile divide (per-factor eps clamp;
            # differs from the reference only for essentially-zero projections).
            neg_inv_ni = -jax.lax.rsqrt(jnp.maximum(ri, _EPS))            # (tile_n, 1)
            inv_nj = ps[b:b + 1, :]                                       # (1, tile_p)
            expnorm = jnp.exp((g * neg_inv_ni) * inv_nj)
        else:
            raise ValueError(f"unknown Minibatch_kind: {kind}")

        if mask is not None:
            expnorm = jnp.where(mask, 0.0, expnorm)
        cols.append(jnp.sum(expnorm, axis=1, keepdims=True))              # (tile_n, 1)

    contrib = jnp.concatenate(cols, axis=1)                               # (tile_n, B)
    if b_pad > B:
        contrib = jnp.concatenate(
            [contrib, jnp.zeros((tile_n, b_pad - B), jnp.float32)], axis=1)
    acc_sc[...] = acc_sc[...] + contrib

    @pl.when(j == last_j)
    def _():
        out = acc_sc[...]
        if kind == "Cosine":
            out = out - 1.0       # reference subtracts 1; other kinds handled by the diag mask
        if mean:
            out = out / float(n_valid - 1)
        o_ref[...] = out.astype(o_ref.dtype)          # lane-dense (tile_n, 128k) store


# ---------------------------------------------------------------------------
# Wrapper
# ---------------------------------------------------------------------------
def minibatch_discrimination(x, T, *, kind="L1 Norm", mean=False,
                             precision="float32", tile_n=None, tile_p=None):
    """x: (N, in_features), T: (in_features, out_features, kernel_dims)."""
    if kind not in ("L1 Norm", "L2 Norm", "identical", "Cosine"):
        raise ValueError(f"unknown Minibatch_kind: {kind}")
    use_bf16 = precision == "bfloat16"

    N, A = x.shape
    A2, B, C = T.shape
    assert A == A2, "in_features mismatch"
    BC = B * C
    b_pad = _round_up(B, 128)

    xf = x.astype(jnp.float32)
    T_flat = T.reshape(A, BC).astype(jnp.float32)     # == torch T.view(in_features, -1)

    tn, tp = _choose_tiles(N, A, BC, b_pad, tile_n, tile_p)
    n_row_pad = _round_up(N, tn)
    n_col_pad = _round_up(N, tp)
    grid = (n_row_pad // tn, n_col_pad // tp)

    # Partner-side projection: one tiny XLA matmul + transpose (fused into the
    # surrounding graph -- no extra pallas_call).  HIGHEST precision mirrors
    # torch's f32 mm and matches the in-kernel f32 MXU projection of the row tile.
    m = jnp.dot(xf, T_flat, precision=jax.lax.Precision.HIGHEST)          # (N, BC)
    mT = jnp.pad(jnp.transpose(m), ((0, 0), (0, n_col_pad - N)))          # (BC, Ncp)

    # Hoisted partner statistics (identical for every row tile).
    rj = jnp.transpose(jnp.sum(m.reshape(N, B, C) ** 2, axis=2))          # (B, N)
    if kind == "Cosine":
        pstat = jax.lax.rsqrt(jnp.maximum(rj, _EPS))
    elif kind == "L2 Norm":
        pstat = rj
    else:
        pstat = jnp.zeros_like(rj)                                        # unused
    pstat = jnp.pad(pstat, ((0, 0), (0, n_col_pad - N)))

    if use_bf16 and kind in _GRAM_KINDS:
        mT = mT.astype(jnp.bfloat16)        # halve the dominant streamed operand

    x_pad = jnp.pad(xf, ((0, n_row_pad - N), (0, 0)))

    kernel = functools.partial(
        _mbd_kernel, B=B, C=C, kind=kind, mean=mean, n_valid=N,
        mask_cols=n_col_pad > N, use_bf16=use_bf16)

    if kind in _GRAM_KINDS:
        flops = (2 * C + 8) * B * n_row_pad * n_col_pad
    else:
        flops = 3 * C * B * n_row_pad * n_col_pad
    flops += 2 * A * BC * n_row_pad
    cost = pl.CostEstimate(
        flops=int(flops),
        transcendentals=int(B * n_row_pad * n_col_pad),
        bytes_accessed=int(4 * (n_row_pad * (A + b_pad) + A * BC)
                           + 4 * grid[0] * n_col_pad * (BC + B)),
    )
    compiler_params = pltpu.CompilerParams(
        dimension_semantics=("parallel", "arbitrary"),
        vmem_limit_bytes=int(_vmem_capacity_bytes() * 3 // 4),
    )

    def call(single_buffer_const):
        t_kwargs = dict(pipeline_mode=pl.Buffered(1)) if single_buffer_const else {}
        return pl.pallas_call(
            kernel,
            out_shape=jax.ShapeDtypeStruct((n_row_pad, b_pad), jnp.float32),
            grid=grid,
            in_specs=[
                pl.BlockSpec((tn, A), lambda i, j: (i, 0)),               # x row tile
                pl.BlockSpec((A, BC), lambda i, j: (0, 0), **t_kwargs),   # T (resident)
                pl.BlockSpec((BC, tp), lambda i, j: (0, j)),              # partner tile
                pl.BlockSpec((B, tp), lambda i, j: (0, j)),               # partner stats
            ],
            out_specs=pl.BlockSpec((tn, b_pad), lambda i, j: (i, 0)),
            scratch_shapes=[pltpu.VMEM((tn, BC), jnp.float32),            # cached m_i
                            pltpu.VMEM((tn, b_pad), jnp.float32)],        # o_b accumulator
            compiler_params=compiler_params,
            cost_estimate=cost,
        )(x_pad, T_flat, mT, pstat)

    try:
        o_pad = call(True)
    except Exception:
        # pl.Buffered(1) (single-buffering the grid-invariant T block) is a pure
        # perf knob; fall back to default double buffering if this build rejects it.
        o_pad = call(False)

    # x is concatenated back here (cheap XLA op) so the kernel never re-reads /
    # re-writes x and its output store stays unmasked / lane-dense.
    return jnp.concatenate([x, o_pad[:N, :B].astype(x.dtype)], axis=1)


# ---------------------------------------------------------------------------
# Pure-JAX transcription of the PyTorch forward, for verification.
# ---------------------------------------------------------------------------
def reference(x, T, kind="L1 Norm", mean=False):
    N, A = x.shape
    _, B, C = T.shape
    m = jnp.dot(x, T.reshape(A, B * C),
                precision=jax.lax.Precision.HIGHEST).reshape(N, B, C)
    M = m[None]            # (1, N, B, C)
    M_T = m[:, None]       # (N, 1, B, C)
    if kind == "L1 Norm":
        expnorm = jnp.exp(-jnp.abs(M - M_T).sum(3))
    elif kind == "L2 Norm":
        expnorm = jnp.exp(-((M - M_T) ** 2).sum(3))
    elif kind == "identical":
        expnorm = jnp.exp(-jnp.abs(M - M_T).sum(3) * 100.0)
    elif kind == "Cosine":
        eps = 1e-8
        dotp = (M * M_T).sum(3)
        denom = jnp.sqrt((M * M).sum(3)) * jnp.sqrt((M_T * M_T).sum(3))
        expnorm = jnp.exp(-(dotp / jnp.maximum(denom, eps)))
    else:
        raise ValueError(kind)
    o_b = expnorm.sum(0) - 1.0
    if mean:
        o_b = o_b / (N - 1)
    return jnp.concatenate([x, o_b], axis=1)


if __name__ == "__main__":
    key = jax.random.PRNGKey(0)
    kx, kt = jax.random.split(key)

    # batch=32, in_features=16, out_features=8, kernel_dims=8
    N, A, B, C = 32, 16, 8, 8
    x = jax.random.normal(kx, (N, A), dtype=jnp.float32)
    T = jax.random.normal(kt, (A, B, C), dtype=jnp.float32)   # init.normal(T, 0, 1)

    kinds = ("L1 Norm", "L2 Norm", "identical", "Cosine")
    for kind in kinds:
        for mean in (False, True):
            ref = reference(x, T, kind=kind, mean=mean)
            out = jax.block_until_ready(
                minibatch_discrimination(x, T, kind=kind, mean=mean))
            assert out.shape == (N, A + B), out.shape
            assert jnp.allclose(out, ref, atol=2e-3, rtol=2e-3), (kind, mean)
        # bf16 MXU path (bf16-native on v5e/v6e/v7x): checked at a looser tolerance.
        ref = reference(x, T, kind=kind, mean=False)
        out = jax.block_until_ready(
            minibatch_discrimination(x, T, kind=kind, mean=False,
                                     precision="bfloat16"))
        assert jnp.allclose(out, ref, atol=5e-2, rtol=5e-2), ("bf16", kind)

    # Ragged batch (not a multiple of the row tile): exercises zero-padding and
    # the partner-column validity mask.
    N2 = 30
    x2 = jax.random.normal(kx, (N2, A), dtype=jnp.float32)
    for kind in ("L1 Norm", "Cosine"):
        ref = reference(x2, T, kind=kind, mean=True)
        out = jax.block_until_ready(
            minibatch_discrimination(x2, T, kind=kind, mean=True))
        assert out.shape == (N2, A + B), out.shape
        assert jnp.allclose(out, ref, atol=2e-3, rtol=2e-3), ("ragged", kind)

    print("KERNEL_OK")
</pallas_src>

<mosaic_0001>
module attributes {stable_mosaic.version = 11 : i64} {
  func.func @_mbd_kernel(%arg0: i32, %arg1: i32, %arg2: memref<16x16xf32, #tpu.memory_space<vmem>>, %arg3: memref<16x64xf32, #tpu.memory_space<vmem>>, %arg4: memref<64x32xf32, #tpu.memory_space<vmem>>, %arg5: memref<8x32xf32, #tpu.memory_space<vmem>>, %arg6: memref<16x128xf32, #tpu.memory_space<vmem>>, %arg7: memref<16x64xf32, #tpu.memory_space<vmem>>, %arg8: memref<16x128xf32, #tpu.memory_space<vmem>>) attributes {dimension_semantics = [#tpu.dimension_semantics<parallel>, #tpu.dimension_semantics<arbitrary>], iteration_bounds = array<i64: 2, 1>, scalar_prefetch = 0 : i64, scratch_operands = 2 : i64, tpu.core_type = #tpu.core_type<tc>, window_params = [{transform_indices = @transform_0, window_bounds = array<i64: 16, 16>}, {pipeline_mode = #tpu.pipeline_mode<synchronous>, transform_indices = @transform_1, window_bounds = array<i64: 16, 64>}, {transform_indices = @transform_2, window_bounds = array<i64: 64, 32>}, {transform_indices = @transform_3, window_bounds = array<i64: 8, 32>}, {transform_indices = @transform_4, window_bounds = array<i64: 16, 128>}]} {
    %c0_i32 = arith.constant 0 : i32
    %0 = arith.cmpi eq, %arg1, %c0_i32 : i32
    %1 = arith.extui %0 : i1 to i32
    %c0_i32_0 = arith.constant 0 : i32
    %2 = arith.cmpi ne, %1, %c0_i32_0 : i32
    scf.if %2 {
      %c0_34 = arith.constant 0 : index
      %c0_35 = arith.constant 0 : index
      %535 = vector.load %arg2[%c0_34, %c0_35] : memref<16x16xf32, #tpu.memory_space<vmem>>, vector<16x16xf32>
      %c0_36 = arith.constant 0 : index
      %c0_37 = arith.constant 0 : index
      %536 = vector.load %arg3[%c0_36, %c0_37] : memref<16x64xf32, #tpu.memory_space<vmem>>, vector<16x64xf32>
      %cst_38 = arith.constant dense<0.000000e+00> : vector<16x64xf32>
      %537 = tpu.matmul %535, %536, %cst_38 {dimension_numbers = #tpu.dot_dimension_numbers<[1], [0], [0], [1], [0, 0, 1, 1], [], []>} : vector<16x16xf32>, vector<16x64xf32>, vector<16x64xf32> -> vector<16x64xf32>
      %c0_39 = arith.constant 0 : index
      %c0_40 = arith.constant 0 : index
      %538 = vector.load %arg7[%c0_39, %c0_40] : memref<16x64xf32, #tpu.memory_space<vmem>>, vector<16x64xf32>
      tpu.vector_store %arg7[%c0_39, %c0_40], %537 {strides = array<i32>} : memref<16x64xf32, #tpu.memory_space<vmem>>, vector<16x64xf32>,
      %cst_41 = arith.constant 0.000000e+00 : f32
      %539 = vector.broadcast %cst_41 : f32 to vector<16x128xf32>
      %c0_42 = arith.constant 0 : index
      %c0_43 = arith.constant 0 : index
      %540 = vector.load %arg8[%c0_42, %c0_43] : memref<16x128xf32, #tpu.memory_space<vmem>>, vector<16x128xf32>
      tpu.vector_store %arg8[%c0_42, %c0_43], %539 {strides = array<i32>} : memref<16x128xf32, #tpu.memory_space<vmem>>, vector<16x128xf32>,
    } else {
    }
    %c0 = arith.constant 0 : index
    %c0_1 = arith.constant 0 : index
    %3 = vector.load %arg7[%c0, %c0_1] : memref<16x64xf32, #tpu.memory_space<vmem>>, vector<16x64xf32>
    %c0_2 = arith.constant 0 : index
    %c0_3 = arith.constant 0 : index
    %4 = vector.load %arg4[%c0_2, %c0_3] : memref<64x32xf32, #tpu.memory_space<vmem>>, vector<64x32xf32>
    %5 = tpu.iota {dimensions = array<i32: 1>} : vector<16x32xi32>
    %c32_i32 = arith.constant 32 : i32
    %6 = arith.muli %arg1, %c32_i32 : i32
    %7 = vector.broadcast %6 : i32 to vector<16x32xi32>
    %8 = arith.addi %5, %7 : vector<16x32xi32>
    %9 = tpu.iota {dimensions = array<i32: 0>} : vector<16x32xi32>
    %c16_i32 = arith.constant 16 : i32
    %10 = arith.muli %arg0, %c16_i32 : i32
    %11 = vector.broadcast %10 : i32 to vector<16x32xi32>
    %12 = arith.addi %9, %11 : vector<16x32xi32>
    %13 = arith.cmpi eq, %8, %12 : vector<16x32xi32>
    %14 = vector.extract_strided_slice %3 {offsets = [0, 0], sizes = [16, 8], strides = [1, 1]} : vector<16x64xf32> to vector<16x8xf32>
    %15 = vector.extract_strided_slice %4 {offsets = [0, 0], sizes = [8, 32], strides = [1, 1]} : vector<64x32xf32> to vector<8x32xf32>
    %cst = arith.constant 0.000000e+00 : f32
    %16 = vector.broadcast %cst : f32 to vector<16x32xf32>
    %17 = vector.extract_strided_slice %14 {offsets = [0, 0], sizes = [16, 1], strides = [1, 1]} : vector<16x8xf32> to vector<16x1xf32>
    %18 = vector.extract_strided_slice %15 {offsets = [0, 0], sizes = [1, 32], strides = [1, 1]} : vector<8x32xf32> to vector<1x32xf32>
    %19 = vector.broadcast %17 : vector<16x1xf32> to vector<16x32xf32>
    %20 = vector.broadcast %18 : vector<1x32xf32> to vector<16x32xf32>
    %21 = arith.subf %19, %20 : vector<16x32xf32>
    %22 = math.absf %21 : vector<16x32xf32>
    %23 = arith.subf %16, %22 : vector<16x32xf32>
    %24 = vector.extract_strided_slice %14 {offsets = [0, 1], sizes = [16, 1], strides = [1, 1]} : vector<16x8xf32> to vector<16x1xf32>
    %25 = vector.extract_strided_slice %15 {offsets = [1, 0], sizes = [1, 32], strides = [1, 1]} : vector<8x32xf32> to vector<1x32xf32>
    %26 = vector.broadcast %24 : vector<16x1xf32> to vector<16x32xf32>
    %27 = vector.broadcast %25 : vector<1x32xf32> to vector<16x32xf32>
    %28 = arith.subf %26, %27 : vector<16x32xf32>
    %29 = math.absf %28 : vector<16x32xf32>
    %30 = arith.subf %23, %29 : vector<16x32xf32>
    %31 = vector.extract_strided_slice %14 {offsets = [0, 2], sizes = [16, 1], strides = [1, 1]} : vector<16x8xf32> to vector<16x1xf32>
    %32 = vector.extract_strided_slice %15 {offsets = [2, 0], sizes = [1, 32], strides = [1, 1]} : vector<8x32xf32> to vector<1x32xf32>
    %33 = vector.broadcast %31 : vector<16x1xf32> to vector<16x32xf32>
    %34 = vector.broadcast %32 : vector<1x32xf32> to vector<16x32xf32>
    %35 = arith.subf %33, %34 : vector<16x32xf32>
    %36 = math.absf %35 : vector<16x32xf32>
    %37 = arith.subf %30, %36 : vector<16x32xf32>
    %38 = vector.extract_strided_slice %14 {offsets = [0, 3], sizes = [16, 1], strides = [1, 1]} : vector<16x8xf32> to vector<16x1xf32>
    %39 = vector.extract_strided_slice %15 {offsets = [3, 0], sizes = [1, 32], strides = [1, 1]} : vector<8x32xf32> to vector<1x32xf32>
    %40 = vector.broadcast %38 : vector<16x1xf32> to vector<16x32xf32>
    %41 = vector.broadcast %39 : vector<1x32xf32> to vector<16x32xf32>
    %42 = arith.subf %40, %41 : vector<16x32xf32>
    %43 = math.absf %42 : vector<16x32xf32>
    %44 = arith.subf %37, %43 : vector<16x32xf32>
    %45 = vector.extract_strided_slice %14 {offsets = [0, 4], sizes = [16, 1], strides = [1, 1]} : vector<16x8xf32> to vector<16x1xf32>
    %46 = vector.extract_strided_slice %15 {offsets = [4, 0], sizes = [1, 32], strides = [1, 1]} : vector<8x32xf32> to vector<1x32xf32>
    %47 = vector.broadcast %45 : vector<16x1xf32> to vector<16x32xf32>
    %48 = vector.broadcast %46 : vector<1x32xf32> to vector<16x32xf32>
    %49 = arith.subf %47, %48 : vector<16x32xf32>
    %50 = math.absf %49 : vector<16x32xf32>
    %51 = arith.subf %44, %50 : vector<16x32xf32>
    %52 = vector.extract_strided_slice %14 {offsets = [0, 5], sizes = [16, 1], strides = [1, 1]} : vector<16x8xf32> to vector<16x1xf32>
    %53 = vector.extract_strided_slice %15 {offsets = [5, 0], sizes = [1, 32], strides = [1, 1]} : vector<8x32xf32> to vector<1x32xf32>
    %54 = vector.broadcast %52 : vector<16x1xf32> to vector<16x32xf32>
    %55 = vector.broadcast %53 : vector<1x32xf32> to vector<16x32xf32>
    %56 = arith.subf %54, %55 : vector<16x32xf32>
    %57 = math.absf %56 : vector<16x32xf32>
    %58 = arith.subf %51, %57 : vector<16x32xf32>
    %59 = vector.extract_strided_slice %14 {offsets = [0, 6], sizes = [16, 1], strides = [1, 1]} : vector<16x8xf32> to vector<16x1xf32>
    %60 = vector.extract_strided_slice %15 {offsets = [6, 0], sizes = [1, 32], strides = [1, 1]} : vector<8x32xf32> to vector<1x32xf32>
    %61 = vector.broadcast %59 : vector<16x1xf32> to vector<16x32xf32>
    %62 = vector.broadcast %60 : vector<1x32xf32> to vector<16x32xf32>
    %63 = arith.subf %61, %62 : vector<16x32xf32>
    %64 = math.absf %63 : vector<16x32xf32>
    %65 = arith.subf %58, %64 : vector<16x32xf32>
    %66 = vector.extract_strided_slice %14 {offsets = [0, 7], sizes = [16, 1], strides = [1, 1]} : vector<16x8xf32> to vector<16x1xf32>
    %67 = vector.extract_strided_slice %15 {offsets = [7, 0], sizes = [1, 32], strides = [1, 1]} : vector<8x32xf32> to vector<1x32xf32>
    %68 = vector.broadcast %66 : vector<16x1xf32> to vector<16x32xf32>
    %69 = vector.broadcast %67 : vector<1x32xf32> to vector<16x32xf32>
    %70 = arith.subf %68, %69 : vector<16x32xf32>
    %71 = math.absf %70 : vector<16x32xf32>
    %72 = arith.subf %65, %71 : vector<16x32xf32>
    %73 = math.exp %72 : vector<16x32xf32>
    %cst_4 = arith.constant 0.000000e+00 : f32
    %74 = vector.broadcast %cst_4 : f32 to vector<16x32xf32>
    %75 = arith.select %13, %74, %73 : vector<16x32xi1>, vector<16x32xf32>
    %cst_5 = arith.constant dense<0.000000e+00> : vector<16xf32>
    %76 = vector.multi_reduction <add>, %75, %cst_5 [1] : vector<16x32xf32> to vector<16xf32>
    %77 = vector.shape_cast %76 : vector<16xf32> to vector<16x1xf32>
    %78 = vector.extract_strided_slice %3 {offsets = [0, 8], sizes = [16, 8], strides = [1, 1]} : vector<16x64xf32> to vector<16x8xf32>
    %79 = vector.extract_strided_slice %4 {offsets = [8, 0], sizes = [8, 32], strides = [1, 1]} : vector<64x32xf32> to vector<8x32xf32>
    %cst_6 = arith.constant 0.000000e+00 : f32
    %80 = vector.broadcast %cst_6 : f32 to vector<16x32xf32>
    %81 = vector.extract_strided_slice %78 {offsets = [0, 0], sizes = [16, 1], strides = [1, 1]} : vector<16x8xf32> to vector<16x1xf32>
    %82 = vector.extract_strided_slice %79 {offsets = [0, 0], sizes = [1, 32], strides = [1, 1]} : vector<8x32xf32> to vector<1x32xf32>
    %83 = vector.broadcast %81 : vector<16x1xf32> to vector<16x32xf32>
    %84 = vector.broadcast %82 : vector<1x32xf32> to vector<16x32xf32>
    %85 = arith.subf %83, %84 : vector<16x32xf32>
    %86 = math.absf %85 : vector<16x32xf32>
    %87 = arith.subf %80, %86 : vector<16x32xf32>
    %88 = vector.extract_strided_slice %78 {offsets = [0, 1], sizes = [16, 1], strides = [1, 1]} : vector<16x8xf32> to vector<16x1xf32>
    %89 = vector.extract_strided_slice %79 {offsets = [1, 0], sizes = [1, 32], strides = [1, 1]} : vector<8x32xf32> to vector<1x32xf32>
    %90 = vector.broadcast %88 : vector<16x1xf32> to vector<16x32xf32>
    %91 = vector.broadcast %89 : vector<1x32xf32> to vector<16x32xf32>
    %92 = arith.subf %90, %91 : vector<16x32xf32>
    %93 = math.absf %92 : vector<16x32xf32>
    %94 = arith.subf %87, %93 : vector<16x32xf32>
    %95 = vector.extract_strided_slice %78 {offsets = [0, 2], sizes = [16, 1], strides = [1, 1]} : vector<16x8xf32> to vector<16x1xf32>
    %96 = vector.extract_strided_slice %79 {offsets = [2, 0], sizes = [1, 32], strides = [1, 1]} : vector<8x32xf32> to vector<1x32xf32>
    %97 = vector.broadcast %95 : vector<16x1xf32> to vector<16x32xf32>
    %98 = vector.broadcast %96 : vector<1x32xf32> to vector<16x32xf32>
    %99 = arith.subf %97, %98 : vector<16x32xf32>
    %100 = math.absf %99 : vector<16x32xf32>
    %101 = arith.subf %94, %100 : vector<16x32xf32>
    %102 = vector.extract_strided_slice %78 {offsets = [0, 3], sizes = [16, 1], strides = [1, 1]} : vector<16x8xf32> to vector<16x1xf32>
    %103 = vector.extract_strided_slice %79 {offsets = [3, 0], sizes = [1, 32], strides = [1, 1]} : vector<8x32xf32> to vector<1x32xf32>
    %104 = vector.broadcast %102 : vector<16x1xf32> to vector<16x32xf32>
    %105 = vector.broadcast %103 : vector<1x32xf32> to vector<16x32xf32>
    %106 = arith.subf %104, %105 : vector<16x32xf32>
    %107 = math.absf %106 : vector<16x32xf32>
    %108 = arith.subf %101, %107 : vector<16x32xf32>
    %109 = vector.extract_strided_slice %78 {offsets = [0, 4], sizes = [16, 1], strides = [1, 1]} : vector<16x8xf32> to vector<16x1xf32>
    %110 = vector.extract_strided_slice %79 {offsets = [4, 0], sizes = [1, 32], strides = [1, 1]} : vector<8x32xf32> to vector<1x32xf32>
    %111 = vector.broadcast %109 : vector<16x1xf32> to vector<16x32xf32>
    %112 = vector.broadcast %110 : vector<1x32xf32> to vector<16x32xf32>
    %113 = arith.subf %111, %112 : vector<16x32xf32>
    %114 = math.absf %113 : vector<16x32xf32>
    %115 = arith.subf %108, %114 : vector<16x32xf32>
    %116 = vector.extract_strided_slice %78 {offsets = [0, 5], sizes = [16, 1], strides = [1, 1]} : vector<16x8xf32> to vector<16x1xf32>
    %117 = vector.extract_strided_slice %79 {offsets = [5, 0], sizes = [1, 32], strides = [1, 1]} : vector<8x32xf32> to vector<1x32xf32>
    %118 = vector.broadcast %116 : vector<16x1xf32> to vector<16x32xf32>
    %119 = vector.broadcast %117 : vector<1x32xf32> to vector<16x32xf32>
    %120 = arith.subf %118, %119 : vector<16x32xf32>
    %121 = math.absf %120 : vector<16x32xf32>
    %122 = arith.subf %115, %121 : vector<16x32xf32>
    %123 = vector.extract_strided_slice %78 {offsets = [0, 6], sizes = [16, 1], strides = [1, 1]} : vector<16x8xf32> to vector<16x1xf32>
    %124 = vector.extract_strided_slice %79 {offsets = [6, 0], sizes = [1, 32], strides = [1, 1]} : vector<8x32xf32> to vector<1x32xf32>
    %125 = vector.broadcast %123 : vector<16x1xf32> to vector<16x32xf32>
    %126 = vector.broadcast %124 : vector<1x32xf32> to vector<16x32xf32>
    %127 = arith.subf %125, %126 : vector<16x32xf32>
    %128 = math.absf %127 : vector<16x32xf32>
    %129 = arith.subf %122, %128 : vector<16x32xf32>
    %130 = vector.extract_strided_slice %78 {offsets = [0, 7], sizes = [16, 1], strides = [1, 1]} : vector<16x8xf32> to vector<16x1xf32>
    %131 = vector.extract_strided_slice %79 {offsets = [7, 0], sizes = [1, 32], strides = [1, 1]} : vector<8x32xf32> to vector<1x32xf32>
    %132 = vector.broadcast %130 : vector<16x1xf32> to vector<16x32xf32>
    %133 = vector.broadcast %131 : vector<1x32xf32> to vector<16x32xf32>
    %134 = arith.subf %132, %133 : vector<16x32xf32>
    %135 = math.absf %134 : vector<16x32xf32>
    %136 = arith.subf %129, %135 : vector<16x32xf32>
    %137 = math.exp %136 : vector<16x32xf32>
    %cst_7 = arith.constant 0.000000e+00 : f32
    %138 = vector.broadcast %cst_7 : f32 to vector<16x32xf32>
    %139 = arith.select %13, %138, %137 : vector<16x32xi1>, vector<16x32xf32>
    %cst_8 = arith.constant dense<0.000000e+00> : vector<16xf32>
    %140 = vector.multi_reduction <add>, %139, %cst_8 [1] : vector<16x32xf32> to vector<16xf32>
    %141 = vector.shape_cast %140 : vector<16xf32> to vector<16x1xf32>
    %142 = vector.extract_strided_slice %3 {offsets = [0, 16], sizes = [16, 8], strides = [1, 1]} : vector<16x64xf32> to vector<16x8xf32>
    %143 = vector.extract_strided_slice %4 {offsets = [16, 0], sizes = [8, 32], strides = [1, 1]} : vector<64x32xf32> to vector<8x32xf32>
    %cst_9 = arith.constant 0.000000e+00 : f32
    %144 = vector.broadcast %cst_9 : f32 to vector<16x32xf32>
    %145 = vector.extract_strided_slice %142 {offsets = [0, 0], sizes = [16, 1], strides = [1, 1]} : vector<16x8xf32> to vector<16x1xf32>
    %146 = vector.extract_strided_slice %143 {offsets = [0, 0], sizes = [1, 32], strides = [1, 1]} : vector<8x32xf32> to vector<1x32xf32>
    %147 = vector.broadcast %145 : vector<16x1xf32> to vector<16x32xf32>
    %148 = vector.broadcast %146 : vector<1x32xf32> to vector<16x32xf32>
    %149 = arith.subf %147, %148 : vector<16x32xf32>
    %150 = math.absf %149 : vector<16x32xf32>
    %151 = arith.subf %144, %150 : vector<16x32xf32>
    %152 = vector.extract_strided_slice %142 {offsets = [0, 1], sizes = [16, 1], strides = [1, 1]} : vector<16x8xf32> to vector<16x1xf32>
    %153 = vector.extract_strided_slice %143 {offsets = [1, 0], sizes = [1, 32], strides = [1, 1]} : vector<8x32xf32> to vector<1x32xf32>
    %154 = vector.broadcast %152 : vector<16x1xf32> to vector<16x32xf32>
    %155 = vector.broadcast %153 : vector<1x32xf32> to vector<16x32xf32>
    %156 = arith.subf %154, %155 : vector<16x32xf32>
    %157 = math.absf %156 : vector<16x32xf32>
    %158 = arith.subf %151, %157 : vector<16x32xf32>
    %159 = vector.extract_strided_slice %142 {offsets = [0, 2], sizes = [16, 1], strides = [1, 1]} : vector<16x8xf32> to vector<16x1xf32>
    %160 = vector.extract_strided_slice %143 {offsets = [2, 0], sizes = [1, 32], strides = [1, 1]} : vector<8x32xf32> to vector<1x32xf32>
    %161 = vector.broadcast %159 : vector<16x1xf32> to vector<16x32xf32>
    %162 = vector.broadcast %160 : vector<1x32xf32> to vector<16x32xf32>
    %163 = arith.subf %161, %162 : vector<16x32xf32>
    %164 = math.absf %163 : vector<16x32xf32>
    %165 = arith.subf %158, %164 : vector<16x32xf32>
    %166 = vector.extract_strided_slice %142 {offsets = [0, 3], sizes = [16, 1], strides = [1, 1]} : vector<16x8xf32> to vector<16x1xf32>
    %167 = vector.extract_strided_slice %143 {offsets = [3, 0], sizes = [1, 32], strides = [1, 1]} : vector<8x32xf32> to vector<1x32xf32>
    %168 = vector.broadcast %166 : vector<16x1xf32> to vector<16x32xf32>
    %169 = vector.broadcast %167 : vector<1x32xf32> to vector<16x32xf32>
    %170 = arith.subf %168, %169 : vector<16x32xf32>
    %171 = math.absf %170 : vector<16x32xf32>
    %172 = arith.subf %165, %171 : vector<16x32xf32>
    %173 = vector.extract_strided_slice %142 {offsets = [0, 4], sizes = [16, 1], strides = [1, 1]} : vector<16x8xf32> to vector<16x1xf32>
    %174 = vector.extract_strided_slice %143 {offsets = [4, 0], sizes = [1, 32], strides = [1, 1]} : vector<8x32xf32> to vector<1x32xf32>
    %175 = vector.broadcast %173 : vector<16x1xf32> to vector<16x32xf32>
    %176 = vector.broadcast %174 : vector<1x32xf32> to vector<16x32xf32>
    %177 = arith.subf %175, %176 : vector<16x32xf32>
    %178 = math.absf %177 : vector<16x32xf32>
    %179 = arith.subf %172, %178 : vector<16x32xf32>
    %180 = vector.extract_strided_slice %142 {offsets = [0, 5], sizes = [16, 1], strides = [1, 1]} : vector<16x8xf32> to vector<16x1xf32>
    %181 = vector.extract_strided_slice %143 {offsets = [5, 0], sizes = [1, 32], strides = [1, 1]} : vector<8x32xf32> to vector<1x32xf32>
    %182 = vector.broadcast %180 : vector<16x1xf32> to vector<16x32xf32>
    %183 = vector.broadcast %181 : vector<1x32xf32> to vector<16x32xf32>
    %184 = arith.subf %182, %183 : vector<16x32xf32>
    %185 = math.absf %184 : vector<16x32xf32>
    %186 = arith.subf %179, %185 : vector<16x32xf32>
    %187 = vector.extract_strided_slice %142 {offsets = [0, 6], sizes = [16, 1], strides = [1, 1]} : vector<16x8xf32> to vector<16x1xf32>
    %188 = vector.extract_strided_slice %143 {offsets = [6, 0], sizes = [1, 32], strides = [1, 1]} : vector<8x32xf32> to vector<1x32xf32>
    %189 = vector.broadcast %187 : vector<16x1xf32> to vector<16x32xf32>
    %190 = vector.broadcast %188 : vector<1x32xf32> to vector<16x32xf32>
    %191 = arith.subf %189, %190 : vector<16x32xf32>
    %192 = math.absf %191 : vector<16x32xf32>
    %193 = arith.subf %186, %192 : vector<16x32xf32>
    %194 = vector.extract_strided_slice %142 {offsets = [0, 7], sizes = [16, 1], strides = [1, 1]} : vector<16x8xf32> to vector<16x1xf32>
    %195 = vector.extract_strided_slice %143 {offsets = [7, 0], sizes = [1, 32], strides = [1, 1]} : vector<8x32xf32> to vector<1x32xf32>
    %196 = vector.broadcast %194 : vector<16x1xf32> to vector<16x32xf32>
    %197 = vector.broadcast %195 : vector<1x32xf32> to vector<16x32xf32>
    %198 = arith.subf %196, %197 : vector<16x32xf32>
    %199 = math.absf %198 : vector<16x32xf32>
    %200 = arith.subf %193, %199 : vector<16x32xf32>
    %201 = math.exp %200 : vector<16x32xf32>
    %cst_10 = arith.constant 0.000000e+00 : f32
    %202 = vector.broadcast %cst_10 : f32 to vector<16x32xf32>
    %203 = arith.select %13, %202, %201 : vector<16x32xi1>, vector<16x32xf32>
    %cst_11 = arith.constant dense<0.000000e+00> : vector<16xf32>
    %204 = vector.multi_reduction <add>, %203, %cst_11 [1] : vector<16x32xf32> to vector<16xf32>
    %205 = vector.shape_cast %204 : vector<16xf32> to vector<16x1xf32>
    %206 = vector.extract_strided_slice %3 {offsets = [0, 24], sizes = [16, 8], strides = [1, 1]} : vector<16x64xf32> to vector<16x8xf32>
    %207 = vector.extract_strided_slice %4 {offsets = [24, 0], sizes = [8, 32], strides = [1, 1]} : vector<64x32xf32> to vector<8x32xf32>
    %cst_12 = arith.constant 0.000000e+00 : f32
    %208 = vector.broadcast %cst_12 : f32 to vector<16x32xf32>
    %209 = vector.extract_strided_slice %206 {offsets = [0, 0], sizes = [16, 1], strides = [1, 1]} : vector<16x8xf32> to vector<16x1xf32>
    %210 = vector.extract_strided_slice %207 {offsets = [0, 0], sizes = [1, 32], strides = [1, 1]} : vector<8x32xf32> to vector<1x32xf32>
    %211 = vector.broadcast %209 : vector<16x1xf32> to vector<16x32xf32>
    %212 = vector.broadcast %210 : vector<1x32xf32> to vector<16x32xf32>
    %213 = arith.subf %211, %212 : vector<16x32xf32>
    %214 = math.absf %213 : vector<16x32xf32>
    %215 = arith.subf %208, %214 : vector<16x32xf32>
    %216 = vector.extract_strided_slice %206 {offsets = [0, 1], sizes = [16, 1], strides = [1, 1]} : vector<16x8xf32> to vector<16x1xf32>
    %217 = vector.extract_strided_slice %207 {offsets = [1, 0], sizes = [1, 32], strides = [1, 1]} : vector<8x32xf32> to vector<1x32xf32>
    %218 = vector.broadcast %216 : vector<16x1xf32> to vector<16x32xf32>
    %219 = vector.broadcast %217 : vector<1x32xf32> to vector<16x32xf32>
    %220 = arith.subf %218, %219 : vector<16x32xf32>
    %221 = math.absf %220 : vector<16x32xf32>
    %222 = arith.subf %215, %221 : vector<16x32xf32>
    %223 = vector.extract_strided_slice %206 {offsets = [0, 2], sizes = [16, 1], strides = [1, 1]} : vector<16x8xf32> to vector<16x1xf32>
    %224 = vector.extract_strided_slice %207 {offsets = [2, 0], sizes = [1, 32], strides = [1, 1]} : vector<8x32xf32> to vector<1x32xf32>
    %225 = vector.broadcast %223 : vector<16x1xf32> to vector<16x32xf32>
    %226 = vector.broadcast %224 : vector<1x32xf32> to vector<16x32xf32>
    %227 = arith.subf %225, %226 : vector<16x32xf32>
    %228 = math.absf %227 : vector<16x32xf32>
    %229 = arith.subf %222, %228 : vector<16x32xf32>
    %230 = vector.extract_strided_slice %206 {offsets = [0, 3], sizes = [16, 1], strides = [1, 1]} : vector<16x8xf32> to vector<16x1xf32>
    %231 = vector.extract_strided_slice %207 {offsets = [3, 0], sizes = [1, 32], strides = [1, 1]} : vector<8x32xf32> to vector<1x32xf32>
    %232 = vector.broadcast %230 : vector<16x1xf32> to vector<16x32xf32>
    %233 = vector.broadcast %231 : vector<1x32xf32> to vector<16x32xf32>
    %234 = arith.subf %232, %233 : vector<16x32xf32>
    %235 = math.absf %234 : vector<16x32xf32>
    %236 = arith.subf %229, %235 : vector<16x32xf32>
    %237 = vector.extract_strided_slice %206 {offsets = [0, 4], sizes = [16, 1], strides = [1, 1]} : vector<16x8xf32> to vector<16x1xf32>
    %238 = vector.extract_strided_slice %207 {offsets = [4, 0], sizes = [1, 32], strides = [1, 1]} : vector<8x32xf32> to vector<1x32xf32>
    %239 = vector.broadcast %237 : vector<16x1xf32> to vector<16x32xf32>
    %240 = vector.broadcast %238 : vector<1x32xf32> to vector<16x32xf32>
    %241 = arith.subf %239, %240 : vector<16x32xf32>
    %242 = math.absf %241 : vector<16x32xf32>
    %243 = arith.subf %236, %242 : vector<16x32xf32>
    %244 = vector.extract_strided_slice %206 {offsets = [0, 5], sizes = [16, 1], strides = [1, 1]} : vector<16x8xf32> to vector<16x1xf32>
    %245 = vector.extract_strided_slice %207 {offsets = [5, 0], sizes = [1, 32], strides = [1, 1]} : vector<8x32xf32> to vector<1x32xf32>
    %246 = vector.broadcast %244 : vector<16x1xf32> to vector<16x32xf32>
    %247 = vector.broadcast %245 : vector<1x32xf32> to vector<16x32xf32>
    %248 = arith.subf %246, %247 : vector<16x32xf32>
    %249 = math.absf %248 : vector<16x32xf32>
    %250 = arith.subf %243, %249 : vector<16x32xf32>
    %251 = vector.extract_strided_slice %206 {offsets = [0, 6], sizes = [16, 1], strides = [1, 1]} : vector<16x8xf32> to vector<16x1xf32>
    %252 = vector.extract_strided_slice %207 {offsets = [6, 0], sizes = [1, 32], strides = [1, 1]} : vector<8x32xf32> to vector<1x32xf32>
    %253 = vector.broadcast %251 : vector<16x1xf32> to vector<16x32xf32>
    %254 = vector.broadcast %252 : vector<1x32xf32> to vector<16x32xf32>
    %255 = arith.subf %253, %254 : vector<16x32xf32>
    %256 = math.absf %255 : vector<16x32xf32>
    %257 = arith.subf %250, %256 : vector<16x32xf32>
    %258 = vector.extract_strided_slice %206 {offsets = [0, 7], sizes = [16, 1], strides = [1, 1]} : vector<16x8xf32> to vector<16x1xf32>
    %259 = vector.extract_strided_slice %207 {offsets = [7, 0], sizes = [1, 32], strides = [1, 1]} : vector<8x32xf32> to vector<1x32xf32>
    %260 = vector.broadcast %258 : vector<16x1xf32> to vector<16x32xf32>
    %261 = vector.broadcast %259 : vector<1x32xf32> to vector<16x32xf32>
    %262 = arith.subf %260, %261 : vector<16x32xf32>
    %263 = math.absf %262 : vector<16x32xf32>
    %264 = arith.subf %257, %263 : vector<16x32xf32>
    %265 = math.exp %264 : vector<16x32xf32>
    %cst_13 = arith.constant 0.000000e+00 : f32
    %266 = vector.broadcast %cst_13 : f32 to vector<16x32xf32>
    %267 = arith.select %13, %266, %265 : vector<16x32xi1>, vector<16x32xf32>
    %cst_14 = arith.constant dense<0.000000e+00> : vector<16xf32>
    %268 = vector.multi_reduction <add>, %267, %cst_14 [1] : vector<16x32xf32> to vector<16xf32>
    %269 = vector.shape_cast %268 : vector<16xf32> to vector<16x1xf32>
    %270 = vector.extract_strided_slice %3 {offsets = [0, 32], sizes = [16, 8], strides = [1, 1]} : vector<16x64xf32> to vector<16x8xf32>
    %271 = vector.extract_strided_slice %4 {offsets = [32, 0], sizes = [8, 32], strides = [1, 1]} : vector<64x32xf32> to vector<8x32xf32>
    %cst_15 = arith.constant 0.000000e+00 : f32
    %272 = vector.broadcast %cst_15 : f32 to vector<16x32xf32>
    %273 = vector.extract_strided_slice %270 {offsets = [0, 0], sizes = [16, 1], strides = [1, 1]} : vector<16x8xf32> to vector<16x1xf32>
    %274 = vector.extract_strided_slice %271 {offsets = [0, 0], sizes = [1, 32], strides = [1, 1]} : vector<8x32xf32> to vector<1x32xf32>
    %275 = vector.broadcast %273 : vector<16x1xf32> to vector<16x32xf32>
    %276 = vector.broadcast %274 : vector<1x32xf32> to vector<16x32xf32>
    %277 = arith.subf %275, %276 : vector<16x32xf32>
    %278 = math.absf %277 : vector<16x32xf32>
    %279 = arith.subf %272, %278 : vector<16x32xf32>
    %280 = vector.extract_strided_slice %270 {offsets = [0, 1], sizes = [16, 1], strides = [1, 1]} : vector<16x8xf32> to vector<16x1xf32>
    %281 = vector.extract_strided_slice %271 {offsets = [1, 0], sizes = [1, 32], strides = [1, 1]} : vector<8x32xf32> to vector<1x32xf32>
    %282 = vector.broadcast %280 : vector<16x1xf32> to vector<16x32xf32>
    %283 = vector.broadcast %281 : vector<1x32xf32> to vector<16x32xf32>
    %284 = arith.subf %282, %283 : vector<16x32xf32>
    %285 = math.absf %284 : vector<16x32xf32>
    %286 = arith.subf %279, %285 : vector<16x32xf32>
    %287 = vector.extract_strided_slice %270 {offsets = [0, 2], sizes = [16, 1], strides = [1, 1]} : vector<16x8xf32> to vector<16x1xf32>
    %288 = vector.extract_strided_slice %271 {offsets = [2, 0], sizes = [1, 32], strides = [1, 1]} : vector<8x32xf32> to vector<1x32xf32>
    %289 = vector.broadcast %287 : vector<16x1xf32> to vector<16x32xf32>
    %290 = vector.broadcast %288 : vector<1x32xf32> to vector<16x32xf32>
    %291 = arith.subf %289, %290 : vector<16x32xf32>
    %292 = math.absf %291 : vector<16x32xf32>
    %293 = arith.subf %286, %292 : vector<16x32xf32>
    %294 = vector.extract_strided_slice %270 {offsets = [0, 3], sizes = [16, 1], strides = [1, 1]} : vector<16x8xf32> to vector<16x1xf32>
    %295 = vector.extract_strided_slice %271 {offsets = [3, 0], sizes = [1, 32], strides = [1, 1]} : vector<8x32xf32> to vector<1x32xf32>
    %296 = vector.broadcast %294 : vector<16x1xf32> to vector<16x32xf32>
    %297 = vector.broadcast %295 : vector<1x32xf32> to vector<16x32xf32>
    %298 = arith.subf %296, %297 : vector<16x32xf32>
    %299 = math.absf %298 : vector<16x32xf32>
    %300 = arith.subf %293, %299 : vector<16x32xf32>
    %301 = vector.extract_strided_slice %270 {offsets = [0, 4], sizes = [16, 1], strides = [1, 1]} : vector<16x8xf32> to vector<16x1xf32>
    %302 = vector.extract_strided_slice %271 {offsets = [4, 0], sizes = [1, 32], strides = [1, 1]} : vector<8x32xf32> to vector<1x32xf32>
    %303 = vector.broadcast %301 : vector<16x1xf32> to vector<16x32xf32>
    %304 = vector.broadcast %302 : vector<1x32xf32> to vector<16x32xf32>
    %305 = arith.subf %303, %304 : vector<16x32xf32>
    %306 = math.absf %305 : vector<16x32xf32>
    %307 = arith.subf %300, %306 : vector<16x32xf32>
    %308 = vector.extract_strided_slice %270 {offsets = [0, 5], sizes = [16, 1], strides = [1, 1]} : vector<16x8xf32> to vector<16x1xf32>
    %309 = vector.extract_strided_slice %271 {offsets = [5, 0], sizes = [1, 32], strides = [1, 1]} : vector<8x32xf32> to vector<1x32xf32>
    %310 = vector.broadcast %308 : vector<16x1xf32> to vector<16x32xf32>
    %311 = vector.broadcast %309 : vector<1x32xf32> to vector<16x32xf32>
    %312 = arith.subf %310, %311 : vector<16x32xf32>
    %313 = math.absf %312 : vector<16x32xf32>
    %314 = arith.subf %307, %313 : vector<16x32xf32>
    %315 = vector.extract_strided_slice %270 {offsets = [0, 6], sizes = [16, 1], strides = [1, 1]} : vector<16x8xf32> to vector<16x1xf32>
    %316 = vector.extract_strided_slice %271 {offsets = [6, 0], sizes = [1, 32], strides = [1, 1]} : vector<8x32xf32> to vector<1x32xf32>
    %317 = vector.broadcast %315 : vector<16x1xf32> to vector<16x32xf32>
    %318 = vector.broadcast %316 : vector<1x32xf32> to vector<16x32xf32>
    %319 = arith.subf %317, %318 : vector<16x32xf32>
    %320 = math.absf %319 : vector<16x32xf32>
    %321 = arith.subf %314, %320 : vector<16x32xf32>
    %322 = vector.extract_strided_slice %270 {offsets = [0, 7], sizes = [16, 1], strides = [1, 1]} : vector<16x8xf32> to vector<16x1xf32>
    %323 = vector.extract_strided_slice %271 {offsets = [7, 0], sizes = [1, 32], strides = [1, 1]} : vector<8x32xf32> to vector<1x32xf32>
    %324 = vector.broadcast %322 : vector<16x1xf32> to vector<16x32xf32>
    %325 = vector.broadcast %323 : vector<1x32xf32> to vector<16x32xf32>
    %326 = arith.subf %324, %325 : vector<16x32xf32>
    %327 = math.absf %326 : vector<16x32xf32>
    %328 = arith.subf %321, %327 : vector<16x32xf32>
    %329 = math.exp %328 : vector<16x32xf32>
    %cst_16 = arith.constant 0.000000e+00 : f32
    %330 = vector.broadcast %cst_16 : f32 to vector<16x32xf32>
    %331 = arith.select %13, %330, %329 : vector<16x32xi1>, vector<16x32xf32>
    %cst_17 = arith.constant dense<0.000000e+00> : vector<16xf32>
    %332 = vector.multi_reduction <add>, %331, %cst_17 [1] : vector<16x32xf32> to vector<16xf32>
    %333 = vector.shape_cast %332 : vector<16xf32> to vector<16x1xf32>
    %334 = vector.extract_strided_slice %3 {offsets = [0, 40], sizes = [16, 8], strides = [1, 1]} : vector<16x64xf32> to vector<16x8xf32>
    %335 = vector.extract_strided_slice %4 {offsets = [40, 0], sizes = [8, 32], strides = [1, 1]} : vector<64x32xf32> to vector<8x32xf32>
    %cst_18 = arith.constant 0.000000e+00 : f32
    %336 = vector.broadcast %cst_18 : f32 to vector<16x32xf32>
    %337 = vector.extract_strided_slice %334 {offsets = [0, 0], sizes = [16, 1], strides = [1, 1]} : vector<16x8xf32> to vector<16x1xf32>
    %338 = vector.extract_strided_slice %335 {offsets = [0, 0], sizes = [1, 32], strides = [1, 1]} : vector<8x32xf32> to vector<1x32xf32>
    %339 = vector.broadcast %337 : vector<16x1xf32> to vector<16x32xf32>
    %340 = vector.broadcast %338 : vector<1x32xf32> to vector<16x32xf32>
    %341 = arith.subf %339, %340 : vector<16x32xf32>
    %342 = math.absf %341 : vector<16x32xf32>
    %343 = arith.subf %336, %342 : vector<16x32xf32>
    %344 = vector.extract_strided_slice %334 {offsets = [0, 1], sizes = [16, 1], strides = [1, 1]} : vector<16x8xf32> to vector<16x1xf32>
    %345 = vector.extract_strided_slice %335 {offsets = [1, 0], sizes = [1, 32], strides = [1, 1]} : vector<8x32xf32> to vector<1x32xf32>
    %346 = vector.broadcast %344 : vector<16x1xf32> to vector<16x32xf32>
    %347 = vector.broadcast %345 : vector<1x32xf32> to vector<16x32xf32>
    %348 = arith.subf %346, %347 : vector<16x32xf32>
    %349 = math.absf %348 : vector<16x32xf32>
    %350 = arith.subf %343, %349 : vector<16x32xf32>
    %351 = vector.extract_strided_slice %334 {offsets = [0, 2], sizes = [16, 1], strides = [1, 1]} : vector<16x8xf32> to vector<16x1xf32>
    %352 = vector.extract_strided_slice %335 {offsets = [2, 0], sizes = [1, 32], strides = [1, 1]} : vector<8x32xf32> to vector<1x32xf32>
    %353 = vector.broadcast %351 : vector<16x1xf32> to vector<16x32xf32>
    %354 = vector.broadcast %352 : vector<1x32xf32> to vector<16x32xf32>
    %355 = arith.subf %353, %354 : vector<16x32xf32>
    %356 = math.absf %355 : vector<16x32xf32>
    %357 = arith.subf %350, %356 : vector<16x32xf32>
    %358 = vector.extract_strided_slice %334 {offsets = [0, 3], sizes = [16, 1], strides = [1, 1]} : vector<16x8xf32> to vector<16x1xf32>
    %359 = vector.extract_strided_slice %335 {offsets = [3, 0], sizes = [1, 32], strides = [1, 1]} : vector<8x32xf32> to vector<1x32xf32>
    %360 = vector.broadcast %358 : vector<16x1xf32> to vector<16x32xf32>
    %361 = vector.broadcast %359 : vector<1x32xf32> to vector<16x32xf32>
    %362 = arith.subf %360, %361 : vector<16x32xf32>
    %363 = math.absf %362 : vector<16x32xf32>
    %364 = arith.subf %357, %363 : vector<16x32xf32>
    %365 = vector.extract_strided_slice %334 {offsets = [0, 4], sizes = [16, 1], strides = [1, 1]} : vector<16x8xf32> to vector<16x1xf32>
    %366 = vector.extract_strided_slice %335 {offsets = [4, 0], sizes = [1, 32], strides = [1, 1]} : vector<8x32xf32> to vector<1x32xf32>
    %367 = vector.broadcast %365 : vector<16x1xf32> to vector<16x32xf32>
    %368 = vector.broadcast %366 : vector<1x32xf32> to vector<16x32xf32>
    %369 = arith.subf %367, %368 : vector<16x32xf32>
    %370 = math.absf %369 : vector<16x32xf32>
    %371 = arith.subf %364, %370 : vector<16x32xf32>
    %372 = vector.extract_strided_slice %334 {offsets = [0, 5], sizes = [16, 1], strides = [1, 1]} : vector<16x8xf32> to vector<16x1xf32>
    %373 = vector.extract_strided_slice %335 {offsets = [5, 0], sizes = [1, 32], strides = [1, 1]} : vector<8x32xf32> to vector<1x32xf32>
    %374 = vector.broadcast %372 : vector<16x1xf32> to vector<16x32xf32>
    %375 = vector.broadcast %373 : vector<1x32xf32> to vector<16x32xf32>
    %376 = arith.subf %374, %375 : vector<16x32xf32>
    %377 = math.absf %376 : vector<16x32xf32>
    %378 = arith.subf %371, %377 : vector<16x32xf32>
    %379 = vector.extract_strided_slice %334 {offsets = [0, 6], sizes = [16, 1], strides = [1, 1]} : vector<16x8xf32> to vector<16x1xf32>
    %380 = vector.extract_strided_slice %335 {offsets = [6, 0], sizes = [1, 32], strides = [1, 1]} : vector<8x32xf32> to vector<1x32xf32>
    %381 = vector.broadcast %379 : vector<16x1xf32> to vector<16x32xf32>
    %382 = vector.broadcast %380 : vector<1x32xf32> to vector<16x32xf32>
    %383 = arith.subf %381, %382 : vector<16x32xf32>
    %384 = math.absf %383 : vector<16x32xf32>
    %385 = arith.subf %378, %384 : vector<16x32xf32>
    %386 = vector.extract_strided_slice %334 {offsets = [0, 7], sizes = [16, 1], strides = [1, 1]} : vector<16x8xf32> to vector<16x1xf32>
    %387 = vector.extract_strided_slice %335 {offsets = [7, 0], sizes = [1, 32], strides = [1, 1]} : vector<8x32xf32> to vector<1x32xf32>
    %388 = vector.broadcast %386 : vector<16x1xf32> to vector<16x32xf32>
    %389 = vector.broadcast %387 : vector<1x32xf32> to vector<16x32xf32>
    %390 = arith.subf %388, %389 : vector<16x32xf32>
    %391 = math.absf %390 : vector<16x32xf32>
    %392 = arith.subf %385, %391 : vector<16x32xf32>
    %393 = math.exp %392 : vector<16x32xf32>
    %cst_19 = arith.constant 0.000000e+00 : f32
    %394 = vector.broadcast %cst_19 : f32 to vector<16x32xf32>
    %395 = arith.select %13, %394, %393 : vector<16x32xi1>, vector<16x32xf32>
    %cst_20 = arith.constant dense<0.000000e+00> : vector<16xf32>
    %396 = vector.multi_reduction <add>, %395, %cst_20 [1] : vector<16x32xf32> to vector<16xf32>
    %397 = vector.shape_cast %396 : vector<16xf32> to vector<16x1xf32>
    %398 = vector.extract_strided_slice %3 {offsets = [0, 48], sizes = [16, 8], strides = [1, 1]} : vector<16x64xf32> to vector<16x8xf32>
    %399 = vector.extract_strided_slice %4 {offsets = [48, 0], sizes = [8, 32], strides = [1, 1]} : vector<64x32xf32> to vector<8x32xf32>
    %cst_21 = arith.constant 0.000000e+00 : f32
    %400 = vector.broadcast %cst_21 : f32 to vector<16x32xf32>
    %401 = vector.extract_strided_slice %398 {offsets = [0, 0], sizes = [16, 1], strides = [1, 1]} : vector<16x8xf32> to vector<16x1xf32>
    %402 = vector.extract_strided_slice %399 {offsets = [0, 0], sizes = [1, 32], strides = [1, 1]} : vector<8x32xf32> to vector<1x32xf32>
    %403 = vector.broadcast %401 : vector<16x1xf32> to vector<16x32xf32>
    %404 = vector.broadcast %402 : vector<1x32xf32> to vector<16x32xf32>
    %405 = arith.subf %403, %404 : vector<16x32xf32>
    %406 = math.absf %405 : vector<16x32xf32>
    %407 = arith.subf %400, %406 : vector<16x32xf32>
    %408 = vector.extract_strided_slice %398 {offsets = [0, 1], sizes = [16, 1], strides = [1, 1]} : vector<16x8xf32> to vector<16x1xf32>
    %409 = vector.extract_strided_slice %399 {offsets = [1, 0], sizes = [1, 32], strides = [1, 1]} : vector<8x32xf32> to vector<1x32xf32>
    %410 = vector.broadcast %408 : vector<16x1xf32> to vector<16x32xf32>
    %411 = vector.broadcast %409 : vector<1x32xf32> to vector<16x32xf32>
    %412 = arith.subf %410, %411 : vector<16x32xf32>
    %413 = math.absf %412 : vector<16x32xf32>
    %414 = arith.subf %407, %413 : vector<16x32xf32>
    %415 = vector.extract_strided_slice %398 {offsets = [0, 2], sizes = [16, 1], strides = [1, 1]} : vector<16x8xf32> to vector<16x1xf32>
    %416 = vector.extract_strided_slice %399 {offsets = [2, 0], sizes = [1, 32], strides = [1, 1]} : vector<8x32xf32> to vector<1x32xf32>
    %417 = vector.broadcast %415 : vector<16x1xf32> to vector<16x32xf32>
    %418 = vector.broadcast %416 : vector<1x32xf32> to vector<16x32xf32>
    %419 = arith.subf %417, %418 : vector<16x32xf32>
    %420 = math.absf %419 : vector<16x32xf32>
    %421 = arith.subf %414, %420 : vector<16x32xf32>
    %422 = vector.extract_strided_slice %398 {offsets = [0, 3], sizes = [16, 1], strides = [1, 1]} : vector<16x8xf32> to vector<16x1xf32>
    %423 = vector.extract_strided_slice %399 {offsets = [3, 0], sizes = [1, 32], strides = [1, 1]} : vector<8x32xf32> to vector<1x32xf32>
    %424 = vector.broadcast %422 : vector<16x1xf32> to vector<16x32xf32>
    %425 = vector.broadcast %423 : vector<1x32xf32> to vector<16x32xf32>
    %426 = arith.subf %424, %425 : vector<16x32xf32>
    %427 = math.absf %426 : vector<16x32xf32>
    %428 = arith.subf %421, %427 : vector<16x32xf32>
    %429 = vector.extract_strided_slice %398 {offsets = [0, 4], sizes = [16, 1], strides = [1, 1]} : vector<16x8xf32> to vector<16x1xf32>
    %430 = vector.extract_strided_slice %399 {offsets = [4, 0], sizes = [1, 32], strides = [1, 1]} : vector<8x32xf32> to vector<1x32xf32>
    %431 = vector.broadcast %429 : vector<16x1xf32> to vector<16x32xf32>
    %432 = vector.broadcast %430 : vector<1x32xf32> to vector<16x32xf32>
    %433 = arith.subf %431, %432 : vector<16x32xf32>
    %434 = math.absf %433 : vector<16x32xf32>
    %435 = arith.subf %428, %434 : vector<16x32xf32>
    %436 = vector.extract_strided_slice %398 {offsets = [0, 5], sizes = [16, 1], strides = [1, 1]} : vector<16x8xf32> to vector<16x1xf32>
    %437 = vector.extract_strided_slice %399 {offsets = [5, 0], sizes = [1, 32], strides = [1, 1]} : vector<8x32xf32> to vector<1x32xf32>
    %438 = vector.broadcast %436 : vector<16x1xf32> to vector<16x32xf32>
    %439 = vector.broadcast %437 : vector<1x32xf32> to vector<16x32xf32>
    %440 = arith.subf %438, %439 : vector<16x32xf32>
    %441 = math.absf %440 : vector<16x32xf32>
    %442 = arith.subf %435, %441 : vector<16x32xf32>
    %443 = vector.extract_strided_slice %398 {offsets = [0, 6], sizes = [16, 1], strides = [1, 1]} : vector<16x8xf32> to vector<16x1xf32>
    %444 = vector.extract_strided_slice %399 {offsets = [6, 0], sizes = [1, 32], strides = [1, 1]} : vector<8x32xf32> to vector<1x32xf32>
    %445 = vector.broadcast %443 : vector<16x1xf32> to vector<16x32xf32>
    %446 = vector.broadcast %444 : vector<1x32xf32> to vector<16x32xf32>
    %447 = arith.subf %445, %446 : vector<16x32xf32>
    %448 = math.absf %447 : vector<16x32xf32>
    %449 = arith.subf %442, %448 : vector<16x32xf32>
    %450 = vector.extract_strided_slice %398 {offsets = [0, 7], sizes = [16, 1], strides = [1, 1]} : vector<16x8xf32> to vector<16x1xf32>
    %451 = vector.extract_strided_slice %399 {offsets = [7, 0], sizes = [1, 32], strides = [1, 1]} : vector<8x32xf32> to vector<1x32xf32>
    %452 = vector.broadcast %450 : vector<16x1xf32> to vector<16x32xf32>
    %453 = vector.broadcast %451 : vector<1x32xf32> to vector<16x32xf32>
    %454 = arith.subf %452, %453 : vector<16x32xf32>
    %455 = math.absf %454 : vector<16x32xf32>
    %456 = arith.subf %449, %455 : vector<16x32xf32>
    %457 = math.exp %456 : vector<16x32xf32>
    %cst_22 = arith.constant 0.000000e+00 : f32
    %458 = vector.broadcast %cst_22 : f32 to vector<16x32xf32>
    %459 = arith.select %13, %458, %457 : vector<16x32xi1>, vector<16x32xf32>
    %cst_23 = arith.constant dense<0.000000e+00> : vector<16xf32>
    %460 = vector.multi_reduction <add>, %459, %cst_23 [1] : vector<16x32xf32> to vector<16xf32>
    %461 = vector.shape_cast %460 : vector<16xf32> to vector<16x1xf32>
    %462 = vector.extract_strided_slice %3 {offsets = [0, 56], sizes = [16, 8], strides = [1, 1]} : vector<16x64xf32> to vector<16x8xf32>
    %463 = vector.extract_strided_slice %4 {offsets = [56, 0], sizes = [8, 32], strides = [1, 1]} : vector<64x32xf32> to vector<8x32xf32>
    %cst_24 = arith.constant 0.000000e+00 : f32
    %464 = vector.broadcast %cst_24 : f32 to vector<16x32xf32>
    %465 = vector.extract_strided_slice %462 {offsets = [0, 0], sizes = [16, 1], strides = [1, 1]} : vector<16x8xf32> to vector<16x1xf32>
    %466 = vector.extract_strided_slice %463 {offsets = [0, 0], sizes = [1, 32], strides = [1, 1]} : vector<8x32xf32> to vector<1x32xf32>
    %467 = vector.broadcast %465 : vector<16x1xf32> to vector<16x32xf32>
    %468 = vector.broadcast %466 : vector<1x32xf32> to vector<16x32xf32>
    %469 = arith.subf %467, %468 : vector<16x32xf32>
    %470 = math.absf %469 : vector<16x32xf32>
    %471 = arith.subf %464, %470 : vector<16x32xf32>
    %472 = vector.extract_strided_slice %462 {offsets = [0, 1], sizes = [16, 1], strides = [1, 1]} : vector<16x8xf32> to vector<16x1xf32>
    %473 = vector.extract_strided_slice %463 {offsets = [1, 0], sizes = [1, 32], strides = [1, 1]} : vector<8x32xf32> to vector<1x32xf32>
    %474 = vector.broadcast %472 : vector<16x1xf32> to vector<16x32xf32>
    %475 = vector.broadcast %473 : vector<1x32xf32> to vector<16x32xf32>
    %476 = arith.subf %474, %475 : vector<16x32xf32>
    %477 = math.absf %476 : vector<16x32xf32>
    %478 = arith.subf %471, %477 : vector<16x32xf32>
    %479 = vector.extract_strided_slice %462 {offsets = [0, 2], sizes = [16, 1], strides = [1, 1]} : vector<16x8xf32> to vector<16x1xf32>
    %480 = vector.extract_strided_slice %463 {offsets = [2, 0], sizes = [1, 32], strides = [1, 1]} : vector<8x32xf32> to vector<1x32xf32>
    %481 = vector.broadcast %479 : vector<16x1xf32> to vector<16x32xf32>
    %482 = vector.broadcast %480 : vector<1x32xf32> to vector<16x32xf32>
    %483 = arith.subf %481, %482 : vector<16x32xf32>
    %484 = math.absf %483 : vector<16x32xf32>
    %485 = arith.subf %478, %484 : vector<16x32xf32>
    %486 = vector.extract_strided_slice %462 {offsets = [0, 3], sizes = [16, 1], strides = [1, 1]} : vector<16x8xf32> to vector<16x1xf32>
    %487 = vector.extract_strided_slice %463 {offsets = [3, 0], sizes = [1, 32], strides = [1, 1]} : vector<8x32xf32> to vector<1x32xf32>
    %488 = vector.broadcast %486 : vector<16x1xf32> to vector<16x32xf32>
    %489 = vector.broadcast %487 : vector<1x32xf32> to vector<16x32xf32>
    %490 = arith.subf %488, %489 : vector<16x32xf32>
    %491 = math.absf %490 : vector<16x32xf32>
    %492 = arith.subf %485, %491 : vector<16x32xf32>
    %493 = vector.extract_strided_slice %462 {offsets = [0, 4], sizes = [16, 1], strides = [1, 1]} : vector<16x8xf32> to vector<16x1xf32>
    %494 = vector.extract_strided_slice %463 {offsets = [4, 0], sizes = [1, 32], strides = [1, 1]} : vector<8x32xf32> to vector<1x32xf32>
    %495 = vector.broadcast %493 : vector<16x1xf32> to vector<16x32xf32>
    %496 = vector.broadcast %494 : vector<1x32xf32> to vector<16x32xf32>
    %497 = arith.subf %495, %496 : vector<16x32xf32>
    %498 = math.absf %497 : vector<16x32xf32>
    %499 = arith.subf %492, %498 : vector<16x32xf32>
    %500 = vector.extract_strided_slice %462 {offsets = [0, 5], sizes = [16, 1], strides = [1, 1]} : vector<16x8xf32> to vector<16x1xf32>
    %501 = vector.extract_strided_slice %463 {offsets = [5, 0], sizes = [1, 32], strides = [1, 1]} : vector<8x32xf32> to vector<1x32xf32>
    %502 = vector.broadcast %500 : vector<16x1xf32> to vector<16x32xf32>
    %503 = vector.broadcast %501 : vector<1x32xf32> to vector<16x32xf32>
    %504 = arith.subf %502, %503 : vector<16x32xf32>
    %505 = math.absf %504 : vector<16x32xf32>
    %506 = arith.subf %499, %505 : vector<16x32xf32>
    %507 = vector.extract_strided_slice %462 {offsets = [0, 6], sizes = [16, 1], strides = [1, 1]} : vector<16x8xf32> to vector<16x1xf32>
    %508 = vector.extract_strided_slice %463 {offsets = [6, 0], sizes = [1, 32], strides = [1, 1]} : vector<8x32xf32> to vector<1x32xf32>
    %509 = vector.broadcast %507 : vector<16x1xf32> to vector<16x32xf32>
    %510 = vector.broadcast %508 : vector<1x32xf32> to vector<16x32xf32>
    %511 = arith.subf %509, %510 : vector<16x32xf32>
    %512 = math.absf %511 : vector<16x32xf32>
    %513 = arith.subf %506, %512 : vector<16x32xf32>
    %514 = vector.extract_strided_slice %462 {offsets = [0, 7], sizes = [16, 1], strides = [1, 1]} : vector<16x8xf32> to vector<16x1xf32>
    %515 = vector.extract_strided_slice %463 {offsets = [7, 0], sizes = [1, 32], strides = [1, 1]} : vector<8x32xf32> to vector<1x32xf32>
    %516 = vector.broadcast %514 : vector<16x1xf32> to vector<16x32xf32>
    %517 = vector.broadcast %515 : vector<1x32xf32> to vector<16x32xf32>
    %518 = arith.subf %516, %517 : vector<16x32xf32>
    %519 = math.absf %518 : vector<16x32xf32>
    %520 = arith.subf %513, %519 : vector<16x32xf32>
    %521 = math.exp %520 : vector<16x32xf32>
    %cst_25 = arith.constant 0.000000e+00 : f32
    %522 = vector.broadcast %cst_25 : f32 to vector<16x32xf32>
    %523 = arith.select %13, %522, %521 : vector<16x32xi1>, vector<16x32xf32>
    %cst_26 = arith.constant dense<0.000000e+00> : vector<16xf32>
    %524 = vector.multi_reduction <add>, %523, %cst_26 [1] : vector<16x32xf32> to vector<16xf32>
    %525 = vector.shape_cast %524 : vector<16xf32> to vector<16x1xf32>
    %526 = tpu.concatenate %77, %141, %205, %269, %333, %397, %461, %525 in 1 : vector<16x1xf32>, vector<16x1xf32>, vector<16x1xf32>, vector<16x1xf32>, vector<16x1xf32>, vector<16x1xf32>, vector<16x1xf32>, vector<16x1xf32> -> vector<16x8xf32>
    %cst_27 = arith.constant 0.000000e+00 : f32
    %527 = vector.broadcast %cst_27 : f32 to vector<16x120xf32>
    %528 = tpu.concatenate %526, %527 in 1 : vector<16x8xf32>, vector<16x120xf32> -> vector<16x128xf32>
    %c0_28 = arith.constant 0 : index
    %c0_29 = arith.constant 0 : index
    %529 = vector.load %arg8[%c0_28, %c0_29] : memref<16x128xf32, #tpu.memory_space<vmem>>, vector<16x128xf32>
    %530 = arith.addf %529, %528 : vector<16x128xf32>
    %c0_30 = arith.constant 0 : index
    %c0_31 = arith.constant 0 : index
    %531 = vector.load %arg8[%c0_30, %c0_31] : memref<16x128xf32, #tpu.memory_space<vmem>>, vector<16x128xf32>
    tpu.vector_store %arg8[%c0_30, %c0_31], %530 {strides = array<i32>} : memref<16x128xf32, #tpu.memory_space<vmem>>, vector<16x128xf32>,
    %c0_i32_32 = arith.constant 0 : i32
    %532 = arith.cmpi eq, %arg1, %c0_i32_32 : i32
    %533 = arith.extui %532 : i1 to i32
    %c0_i32_33 = arith.constant 0 : i32
    %534 = arith.cmpi ne, %533, %c0_i32_33 : i32
    scf.if %534 {
      %c0_34 = arith.constant 0 : index
      %c0_35 = arith.constant 0 : index
      %535 = vector.load %arg8[%c0_34, %c0_35] : memref<16x128xf32, #tpu.memory_space<vmem>>, vector<16x128xf32>
      %c0_36 = arith.constant 0 : index
      %c0_37 = arith.constant 0 : index
      %536 = vector.load %arg6[%c0_36, %c0_37] : memref<16x128xf32, #tpu.memory_space<vmem>>, vector<16x128xf32>
      tpu.vector_store %arg6[%c0_36, %c0_37], %535 {strides = array<i32>} : memref<16x128xf32, #tpu.memory_space<vmem>>, vector<16x128xf32>,
    } else {
    }
    return
  }
  func.func @transform_0(%arg0: i32, %arg1: i32) -> (i32, i32) {
    %c0_i32 = arith.constant 0 : i32
    %c0_i32_0 = arith.constant 0 : i32
    return %arg0, %c0_i32 : i32, i32
  }
  func.func @transform_1(%arg0: i32, %arg1: i32) -> (i32, i32) {
    %c0_i32 = arith.constant 0 : i32
    %c0_i32_0 = arith.constant 0 : i32
    %c0_i32_1 = arith.constant 0 : i32
    return %c0_i32, %c0_i32_0 : i32, i32
  }
  func.func @transform_2(%arg0: i32, %arg1: i32) -> (i32, i32) {
    %c0_i32 = arith.constant 0 : i32
    %c0_i32_0 = arith.constant 0 : i32
    return %c0_i32, %arg1 : i32, i32
  }
  func.func @transform_3(%arg0: i32, %arg1: i32) -> (i32, i32) {
    %c0_i32 = arith.constant 0 : i32
    %c0_i32_0 = arith.constant 0 : i32
    return %c0_i32, %arg1 : i32, i32
  }
  func.func @transform_4(%arg0: i32, %arg1: i32) -> (i32, i32) {
    %c0_i32 = arith.constant 0 : i32
    %c0_i32_0 = arith.constant 0 : i32
    return %arg0, %c0_i32 : i32, i32
  }
}

module attributes {stable_mosaic.version = 11 : i64} {
  func.func @_mbd_kernel(%arg0: i32, %arg1: i32, %arg2: memref<16x16xf32, #tpu.memory_space<vmem>>, %arg3: memref<16x64xf32, #tpu.memory_space<vmem>>, %arg4: memref<64x32xf32, #tpu.memory_space<vmem>>, %arg5: memref<8x32xf32, #tpu.memory_space<vmem>>, %arg6: memref<16x128xf32, #tpu.memory_space<vmem>>, %arg7: memref<16x64xf32, #tpu.memory_space<vmem>>, %arg8: memref<16x128xf32, #tpu.memory_space<vmem>>) attributes {dimension_semantics = [#tpu.dimension_semantics<parallel>, #tpu.dimension_semantics<arbitrary>], iteration_bounds = array<i64: 2, 1>, scalar_prefetch = 0 : i64, scratch_operands = 2 : i64, tpu.core_type = #tpu.core_type<tc>, window_params = [{transform_indices = @transform_0, window_bounds = array<i64: 16, 16>}, {pipeline_mode = #tpu.pipeline_mode<synchronous>, transform_indices = @transform_1, window_bounds = array<i64: 16, 64>}, {transform_indices = @transform_2, window_bounds = array<i64: 64, 32>}, {transform_indices = @transform_3, window_bounds = array<i64: 8, 32>}, {transform_indices = @transform_4, window_bounds = array<i64: 16, 128>}]} {
    %c0_i32 = arith.constant 0 : i32
    %0 = arith.cmpi eq, %arg1, %c0_i32 : i32
    %1 = arith.extui %0 : i1 to i32
    %c0_i32_0 = arith.constant 0 : i32
    %2 = arith.cmpi ne, %1, %c0_i32_0 : i32
    scf.if %2 {
      %c0_34 = arith.constant 0 : index
      %c0_35 = arith.constant 0 : index
      %535 = vector.load %arg2[%c0_34, %c0_35] : memref<16x16xf32, #tpu.memory_space<vmem>>, vector<16x16xf32>
      %c0_36 = arith.constant 0 : index
      %c0_37 = arith.constant 0 : index
      %536 = vector.load %arg3[%c0_36, %c0_37] : memref<16x64xf32, #tpu.memory_space<vmem>>, vector<16x64xf32>
      %cst_38 = arith.constant dense<0.000000e+00> : vector<16x64xf32>
      %537 = tpu.matmul %535, %536, %cst_38 {dimension_numbers = #tpu.dot_dimension_numbers<[1], [0], [0], [1], [0, 0, 1, 1], [], []>} : vector<16x16xf32>, vector<16x64xf32>, vector<16x64xf32> -> vector<16x64xf32>
      %c0_39 = arith.constant 0 : index
      %c0_40 = arith.constant 0 : index
      %538 = vector.load %arg7[%c0_39, %c0_40] : memref<16x64xf32, #tpu.memory_space<vmem>>, vector<16x64xf32>
      tpu.vector_store %arg7[%c0_39, %c0_40], %537 {strides = array<i32>} : memref<16x64xf32, #tpu.memory_space<vmem>>, vector<16x64xf32>,
      %cst_41 = arith.constant 0.000000e+00 : f32
      %539 = vector.broadcast %cst_41 : f32 to vector<16x128xf32>
      %c0_42 = arith.constant 0 : index
      %c0_43 = arith.constant 0 : index
      %540 = vector.load %arg8[%c0_42, %c0_43] : memref<16x128xf32, #tpu.memory_space<vmem>>, vector<16x128xf32>
      tpu.vector_store %arg8[%c0_42, %c0_43], %539 {strides = array<i32>} : memref<16x128xf32, #tpu.memory_space<vmem>>, vector<16x128xf32>,
    } else {
    }
    %c0 = arith.constant 0 : index
    %c0_1 = arith.constant 0 : index
    %3 = vector.load %arg7[%c0, %c0_1] : memref<16x64xf32, #tpu.memory_space<vmem>>, vector<16x64xf32>
    %c0_2 = arith.constant 0 : index
    %c0_3 = arith.constant 0 : index
    %4 = vector.load %arg4[%c0_2, %c0_3] : memref<64x32xf32, #tpu.memory_space<vmem>>, vector<64x32xf32>
    %5 = tpu.iota {dimensions = array<i32: 1>} : vector<16x32xi32>
    %c32_i32 = arith.constant 32 : i32
    %6 = arith.muli %arg1, %c32_i32 : i32
    %7 = vector.broadcast %6 : i32 to vector<16x32xi32>
    %8 = arith.addi %5, %7 : vector<16x32xi32>
    %9 = tpu.iota {dimensions = array<i32: 0>} : vector<16x32xi32>
    %c16_i32 = arith.constant 16 : i32
    %10 = arith.muli %arg0, %c16_i32 : i32
    %11 = vector.broadcast %10 : i32 to vector<16x32xi32>
    %12 = arith.addi %9, %11 : vector<16x32xi32>
    %13 = arith.cmpi eq, %8, %12 : vector<16x32xi32>
    %14 = vector.extract_strided_slice %3 {offsets = [0, 0], sizes = [16, 8], strides = [1, 1]} : vector<16x64xf32> to vector<16x8xf32>
    %15 = vector.extract_strided_slice %4 {offsets = [0, 0], sizes = [8, 32], strides = [1, 1]} : vector<64x32xf32> to vector<8x32xf32>
    %cst = arith.constant 0.000000e+00 : f32
    %16 = vector.broadcast %cst : f32 to vector<16x32xf32>
    %17 = vector.extract_strided_slice %14 {offsets = [0, 0], sizes = [16, 1], strides = [1, 1]} : vector<16x8xf32> to vector<16x1xf32>
    %18 = vector.extract_strided_slice %15 {offsets = [0, 0], sizes = [1, 32], strides = [1, 1]} : vector<8x32xf32> to vector<1x32xf32>
    %19 = vector.broadcast %17 : vector<16x1xf32> to vector<16x32xf32>
    %20 = vector.broadcast %18 : vector<1x32xf32> to vector<16x32xf32>
    %21 = arith.subf %19, %20 : vector<16x32xf32>
    %22 = math.absf %21 : vector<16x32xf32>
    %23 = arith.subf %16, %22 : vector<16x32xf32>
    %24 = vector.extract_strided_slice %14 {offsets = [0, 1], sizes = [16, 1], strides = [1, 1]} : vector<16x8xf32> to vector<16x1xf32>
    %25 = vector.extract_strided_slice %15 {offsets = [1, 0], sizes = [1, 32], strides = [1, 1]} : vector<8x32xf32> to vector<1x32xf32>
    %26 = vector.broadcast %24 : vector<16x1xf32> to vector<16x32xf32>
    %27 = vector.broadcast %25 : vector<1x32xf32> to vector<16x32xf32>
    %28 = arith.subf %26, %27 : vector<16x32xf32>
    %29 = math.absf %28 : vector<16x32xf32>
    %30 = arith.subf %23, %29 : vector<16x32xf32>
    %31 = vector.extract_strided_slice %14 {offsets = [0, 2], sizes = [16, 1], strides = [1, 1]} : vector<16x8xf32> to vector<16x1xf32>
    %32 = vector.extract_strided_slice %15 {offsets = [2, 0], sizes = [1, 32], strides = [1, 1]} : vector<8x32xf32> to vector<1x32xf32>
    %33 = vector.broadcast %31 : vector<16x1xf32> to vector<16x32xf32>
    %34 = vector.broadcast %32 : vector<1x32xf32> to vector<16x32xf32>
    %35 = arith.subf %33, %34 : vector<16x32xf32>
    %36 = math.absf %35 : vector<16x32xf32>
    %37 = arith.subf %30, %36 : vector<16x32xf32>
    %38 = vector.extract_strided_slice %14 {offsets = [0, 3], sizes = [16, 1], strides = [1, 1]} : vector<16x8xf32> to vector<16x1xf32>
    %39 = vector.extract_strided_slice %15 {offsets = [3, 0], sizes = [1, 32], strides = [1, 1]} : vector<8x32xf32> to vector<1x32xf32>
    %40 = vector.broadcast %38 : vector<16x1xf32> to vector<16x32xf32>
    %41 = vector.broadcast %39 : vector<1x32xf32> to vector<16x32xf32>
    %42 = arith.subf %40, %41 : vector<16x32xf32>
    %43 = math.absf %42 : vector<16x32xf32>
    %44 = arith.subf %37, %43 : vector<16x32xf32>
    %45 = vector.extract_strided_slice %14 {offsets = [0, 4], sizes = [16, 1], strides = [1, 1]} : vector<16x8xf32> to vector<16x1xf32>
    %46 = vector.extract_strided_slice %15 {offsets = [4, 0], sizes = [1, 32], strides = [1, 1]} : vector<8x32xf32> to vector<1x32xf32>
    %47 = vector.broadcast %45 : vector<16x1xf32> to vector<16x32xf32>
    %48 = vector.broadcast %46 : vector<1x32xf32> to vector<16x32xf32>
    %49 = arith.subf %47, %48 : vector<16x32xf32>
    %50 = math.absf %49 : vector<16x32xf32>
    %51 = arith.subf %44, %50 : vector<16x32xf32>
    %52 = vector.extract_strided_slice %14 {offsets = [0, 5], sizes = [16, 1], strides = [1, 1]} : vector<16x8xf32> to vector<16x1xf32>
    %53 = vector.extract_strided_slice %15 {offsets = [5, 0], sizes = [1, 32], strides = [1, 1]} : vector<8x32xf32> to vector<1x32xf32>
    %54 = vector.broadcast %52 : vector<16x1xf32> to vector<16x32xf32>
    %55 = vector.broadcast %53 : vector<1x32xf32> to vector<16x32xf32>
    %56 = arith.subf %54, %55 : vector<16x32xf32>
    %57 = math.absf %56 : vector<16x32xf32>
    %58 = arith.subf %51, %57 : vector<16x32xf32>
    %59 = vector.extract_strided_slice %14 {offsets = [0, 6], sizes = [16, 1], strides = [1, 1]} : vector<16x8xf32> to vector<16x1xf32>
    %60 = vector.extract_strided_slice %15 {offsets = [6, 0], sizes = [1, 32], strides = [1, 1]} : vector<8x32xf32> to vector<1x32xf32>
    %61 = vector.broadcast %59 : vector<16x1xf32> to vector<16x32xf32>
    %62 = vector.broadcast %60 : vector<1x32xf32> to vector<16x32xf32>
    %63 = arith.subf %61, %62 : vector<16x32xf32>
    %64 = math.absf %63 : vector<16x32xf32>
    %65 = arith.subf %58, %64 : vector<16x32xf32>
    %66 = vector.extract_strided_slice %14 {offsets = [0, 7], sizes = [16, 1], strides = [1, 1]} : vector<16x8xf32> to vector<16x1xf32>
    %67 = vector.extract_strided_slice %15 {offsets = [7, 0], sizes = [1, 32], strides = [1, 1]} : vector<8x32xf32> to vector<1x32xf32>
    %68 = vector.broadcast %66 : vector<16x1xf32> to vector<16x32xf32>
    %69 = vector.broadcast %67 : vector<1x32xf32> to vector<16x32xf32>
    %70 = arith.subf %68, %69 : vector<16x32xf32>
    %71 = math.absf %70 : vector<16x32xf32>
    %72 = arith.subf %65, %71 : vector<16x32xf32>
    %73 = math.exp %72 : vector<16x32xf32>
    %cst_4 = arith.constant 0.000000e+00 : f32
    %74 = vector.broadcast %cst_4 : f32 to vector<16x32xf32>
    %75 = arith.select %13, %74, %73 : vector<16x32xi1>, vector<16x32xf32>
    %cst_5 = arith.constant dense<0.000000e+00> : vector<16xf32>
    %76 = vector.multi_reduction <add>, %75, %cst_5 [1] : vector<16x32xf32> to vector<16xf32>
    %77 = vector.shape_cast %76 : vector<16xf32> to vector<16x1xf32>
    %78 = vector.extract_strided_slice %3 {offsets = [0, 8], sizes = [16, 8], strides = [1, 1]} : vector<16x64xf32> to vector<16x8xf32>
    %79 = vector.extract_strided_slice %4 {offsets = [8, 0], sizes = [8, 32], strides = [1, 1]} : vector<64x32xf32> to vector<8x32xf32>
    %cst_6 = arith.constant 0.000000e+00 : f32
    %80 = vector.broadcast %cst_6 : f32 to vector<16x32xf32>
    %81 = vector.extract_strided_slice %78 {offsets = [0, 0], sizes = [16, 1], strides = [1, 1]} : vector<16x8xf32> to vector<16x1xf32>
    %82 = vector.extract_strided_slice %79 {offsets = [0, 0], sizes = [1, 32], strides = [1, 1]} : vector<8x32xf32> to vector<1x32xf32>
    %83 = vector.broadcast %81 : vector<16x1xf32> to vector<16x32xf32>
    %84 = vector.broadcast %82 : vector<1x32xf32> to vector<16x32xf32>
    %85 = arith.subf %83, %84 : vector<16x32xf32>
    %86 = math.absf %85 : vector<16x32xf32>
    %87 = arith.subf %80, %86 : vector<16x32xf32>
    %88 = vector.extract_strided_slice %78 {offsets = [0, 1], sizes = [16, 1], strides = [1, 1]} : vector<16x8xf32> to vector<16x1xf32>
    %89 = vector.extract_strided_slice %79 {offsets = [1, 0], sizes = [1, 32], strides = [1, 1]} : vector<8x32xf32> to vector<1x32xf32>
    %90 = vector.broadcast %88 : vector<16x1xf32> to vector<16x32xf32>
    %91 = vector.broadcast %89 : vector<1x32xf32> to vector<16x32xf32>
    %92 = arith.subf %90, %91 : vector<16x32xf32>
    %93 = math.absf %92 : vector<16x32xf32>
    %94 = arith.subf %87, %93 : vector<16x32xf32>
    %95 = vector.extract_strided_slice %78 {offsets = [0, 2], sizes = [16, 1], strides = [1, 1]} : vector<16x8xf32> to vector<16x1xf32>
    %96 = vector.extract_strided_slice %79 {offsets = [2, 0], sizes = [1, 32], strides = [1, 1]} : vector<8x32xf32> to vector<1x32xf32>
    %97 = vector.broadcast %95 : vector<16x1xf32> to vector<16x32xf32>
    %98 = vector.broadcast %96 : vector<1x32xf32> to vector<16x32xf32>
    %99 = arith.subf %97, %98 : vector<16x32xf32>
    %100 = math.absf %99 : vector<16x32xf32>
    %101 = arith.subf %94, %100 : vector<16x32xf32>
    %102 = vector.extract_strided_slice %78 {offsets = [0, 3], sizes = [16, 1], strides = [1, 1]} : vector<16x8xf32> to vector<16x1xf32>
    %103 = vector.extract_strided_slice %79 {offsets = [3, 0], sizes = [1, 32], strides = [1, 1]} : vector<8x32xf32> to vector<1x32xf32>
    %104 = vector.broadcast %102 : vector<16x1xf32> to vector<16x32xf32>
    %105 = vector.broadcast %103 : vector<1x32xf32> to vector<16x32xf32>
    %106 = arith.subf %104, %105 : vector<16x32xf32>
    %107 = math.absf %106 : vector<16x32xf32>
    %108 = arith.subf %101, %107 : vector<16x32xf32>
    %109 = vector.extract_strided_slice %78 {offsets = [0, 4], sizes = [16, 1], strides = [1, 1]} : vector<16x8xf32> to vector<16x1xf32>
    %110 = vector.extract_strided_slice %79 {offsets = [4, 0], sizes = [1, 32], strides = [1, 1]} : vector<8x32xf32> to vector<1x32xf32>
    %111 = vector.broadcast %109 : vector<16x1xf32> to vector<16x32xf32>
    %112 = vector.broadcast %110 : vector<1x32xf32> to vector<16x32xf32>
    %113 = arith.subf %111, %112 : vector<16x32xf32>
    %114 = math.absf %113 : vector<16x32xf32>
    %115 = arith.subf %108, %114 : vector<16x32xf32>
    %116 = vector.extract_strided_slice %78 {offsets = [0, 5], sizes = [16, 1], strides = [1, 1]} : vector<16x8xf32> to vector<16x1xf32>
    %117 = vector.extract_strided_slice %79 {offsets = [5, 0], sizes = [1, 32], strides = [1, 1]} : vector<8x32xf32> to vector<1x32xf32>
    %118 = vector.broadcast %116 : vector<16x1xf32> to vector<16x32xf32>
    %119 = vector.broadcast %117 : vector<1x32xf32> to vector<16x32xf32>
    %120 = arith.subf %118, %119 : vector<16x32xf32>
    %121 = math.absf %120 : vector<16x32xf32>
    %122 = arith.subf %115, %121 : vector<16x32xf32>
    %123 = vector.extract_strided_slice %78 {offsets = [0, 6], sizes = [16, 1], strides = [1, 1]} : vector<16x8xf32> to vector<16x1xf32>
    %124 = vector.extract_strided_slice %79 {offsets = [6, 0], sizes = [1, 32], strides = [1, 1]} : vector<8x32xf32> to vector<1x32xf32>
    %125 = vector.broadcast %123 : vector<16x1xf32> to vector<16x32xf32>
    %126 = vector.broadcast %124 : vector<1x32xf32> to vector<16x32xf32>
    %127 = arith.subf %125, %126 : vector<16x32xf32>
    %128 = math.absf %127 : vector<16x32xf32>
    %129 = arith.subf %122, %128 : vector<16x32xf32>
    %130 = vector.extract_strided_slice %78 {offsets = [0, 7], sizes = [16, 1], strides = [1, 1]} : vector<16x8xf32> to vector<16x1xf32>
    %131 = vector.extract_strided_slice %79 {offsets = [7, 0], sizes = [1, 32], strides = [1, 1]} : vector<8x32xf32> to vector<1x32xf32>
    %132 = vector.broadcast %130 : vector<16x1xf32> to vector<16x32xf32>
    %133 = vector.broadcast %131 : vector<1x32xf32> to vector<16x32xf32>
    %134 = arith.subf %132, %133 : vector<16x32xf32>
    %135 = math.absf %134 : vector<16x32xf32>
    %136 = arith.subf %129, %135 : vector<16x32xf32>
    %137 = math.exp %136 : vector<16x32xf32>
    %cst_7 = arith.constant 0.000000e+00 : f32
    %138 = vector.broadcast %cst_7 : f32 to vector<16x32xf32>
    %139 = arith.select %13, %138, %137 : vector<16x32xi1>, vector<16x32xf32>
    %cst_8 = arith.constant dense<0.000000e+00> : vector<16xf32>
    %140 = vector.multi_reduction <add>, %139, %cst_8 [1] : vector<16x32xf32> to vector<16xf32>
    %141 = vector.shape_cast %140 : vector<16xf32> to vector<16x1xf32>
    %142 = vector.extract_strided_slice %3 {offsets = [0, 16], sizes = [16, 8], strides = [1, 1]} : vector<16x64xf32> to vector<16x8xf32>
    %143 = vector.extract_strided_slice %4 {offsets = [16, 0], sizes = [8, 32], strides = [1, 1]} : vector<64x32xf32> to vector<8x32xf32>
    %cst_9 = arith.constant 0.000000e+00 : f32
    %144 = vector.broadcast %cst_9 : f32 to vector<16x32xf32>
    %145 = vector.extract_strided_slice %142 {offsets = [0, 0], sizes = [16, 1], strides = [1, 1]} : vector<16x8xf32> to vector<16x1xf32>
    %146 = vector.extract_strided_slice %143 {offsets = [0, 0], sizes = [1, 32], strides = [1, 1]} : vector<8x32xf32> to vector<1x32xf32>
    %147 = vector.broadcast %145 : vector<16x1xf32> to vector<16x32xf32>
    %148 = vector.broadcast %146 : vector<1x32xf32> to vector<16x32xf32>
    %149 = arith.subf %147, %148 : vector<16x32xf32>
    %150 = math.absf %149 : vector<16x32xf32>
    %151 = arith.subf %144, %150 : vector<16x32xf32>
    %152 = vector.extract_strided_slice %142 {offsets = [0, 1], sizes = [16, 1], strides = [1, 1]} : vector<16x8xf32> to vector<16x1xf32>
    %153 = vector.extract_strided_slice %143 {offsets = [1, 0], sizes = [1, 32], strides = [1, 1]} : vector<8x32xf32> to vector<1x32xf32>
    %154 = vector.broadcast %152 : vector<16x1xf32> to vector<16x32xf32>
    %155 = vector.broadcast %153 : vector<1x32xf32> to vector<16x32xf32>
    %156 = arith.subf %154, %155 : vector<16x32xf32>
    %157 = math.absf %156 : vector<16x32xf32>
    %158 = arith.subf %151, %157 : vector<16x32xf32>
    %159 = vector.extract_strided_slice %142 {offsets = [0, 2], sizes = [16, 1], strides = [1, 1]} : vector<16x8xf32> to vector<16x1xf32>
    %160 = vector.extract_strided_slice %143 {offsets = [2, 0], sizes = [1, 32], strides = [1, 1]} : vector<8x32xf32> to vector<1x32xf32>
    %161 = vector.broadcast %159 : vector<16x1xf32> to vector<16x32xf32>
    %162 = vector.broadcast %160 : vector<1x32xf32> to vector<16x32xf32>
    %163 = arith.subf %161, %162 : vector<16x32xf32>
    %164 = math.absf %163 : vector<16x32xf32>
    %165 = arith.subf %158, %164 : vector<16x32xf32>
    %166 = vector.extract_strided_slice %142 {offsets = [0, 3], sizes = [16, 1], strides = [1, 1]} : vector<16x8xf32> to vector<16x1xf32>
    %167 = vector.extract_strided_slice %143 {offsets = [3, 0], sizes = [1, 32], strides = [1, 1]} : vector<8x32xf32> to vector<1x32xf32>
    %168 = vector.broadcast %166 : vector<16x1xf32> to vector<16x32xf32>
    %169 = vector.broadcast %167 : vector<1x32xf32> to vector<16x32xf32>
    %170 = arith.subf %168, %169 : vector<16x32xf32>
    %171 = math.absf %170 : vector<16x32xf32>
    %172 = arith.subf %165, %171 : vector<16x32xf32>
    %173 = vector.extract_strided_slice %142 {offsets = [0, 4], sizes = [16, 1], strides = [1, 1]} : vector<16x8xf32> to vector<16x1xf32>
    %174 = vector.extract_strided_slice %143 {offsets = [4, 0], sizes = [1, 32], strides = [1, 1]} : vector<8x32xf32> to vector<1x32xf32>
    %175 = vector.broadcast %173 : vector<16x1xf32> to vector<16x32xf32>
    %176 = vector.broadcast %174 : vector<1x32xf32> to vector<16x32xf32>
    %177 = arith.subf %175, %176 : vector<16x32xf32>
    %178 = math.absf %177 : vector<16x32xf32>
    %179 = arith.subf %172, %178 : vector<16x32xf32>
    %180 = vector.extract_strided_slice %142 {offsets = [0, 5], sizes = [16, 1], strides = [1, 1]} : vector<16x8xf32> to vector<16x1xf32>
    %181 = vector.extract_strided_slice %143 {offsets = [5, 0], sizes = [1, 32], strides = [1, 1]} : vector<8x32xf32> to vector<1x32xf32>
    %182 = vector.broadcast %180 : vector<16x1xf32> to vector<16x32xf32>
    %183 = vector.broadcast %181 : vector<1x32xf32> to vector<16x32xf32>
    %184 = arith.subf %182, %183 : vector<16x32xf32>
    %185 = math.absf %184 : vector<16x32xf32>
    %186 = arith.subf %179, %185 : vector<16x32xf32>
    %187 = vector.extract_strided_slice %142 {offsets = [0, 6], sizes = [16, 1], strides = [1, 1]} : vector<16x8xf32> to vector<16x1xf32>
    %188 = vector.extract_strided_slice %143 {offsets = [6, 0], sizes = [1, 32], strides = [1, 1]} : vector<8x32xf32> to vector<1x32xf32>
    %189 = vector.broadcast %187 : vector<16x1xf32> to vector<16x32xf32>
    %190 = vector.broadcast %188 : vector<1x32xf32> to vector<16x32xf32>
    %191 = arith.subf %189, %190 : vector<16x32xf32>
    %192 = math.absf %191 : vector<16x32xf32>
    %193 = arith.subf %186, %192 : vector<16x32xf32>
    %194 = vector.extract_strided_slice %142 {offsets = [0, 7], sizes = [16, 1], strides = [1, 1]} : vector<16x8xf32> to vector<16x1xf32>
    %195 = vector.extract_strided_slice %143 {offsets = [7, 0], sizes = [1, 32], strides = [1, 1]} : vector<8x32xf32> to vector<1x32xf32>
    %196 = vector.broadcast %194 : vector<16x1xf32> to vector<16x32xf32>
    %197 = vector.broadcast %195 : vector<1x32xf32> to vector<16x32xf32>
    %198 = arith.subf %196, %197 : vector<16x32xf32>
    %199 = math.absf %198 : vector<16x32xf32>
    %200 = arith.subf %193, %199 : vector<16x32xf32>
    %201 = math.exp %200 : vector<16x32xf32>
    %cst_10 = arith.constant 0.000000e+00 : f32
    %202 = vector.broadcast %cst_10 : f32 to vector<16x32xf32>
    %203 = arith.select %13, %202, %201 : vector<16x32xi1>, vector<16x32xf32>
    %cst_11 = arith.constant dense<0.000000e+00> : vector<16xf32>
    %204 = vector.multi_reduction <add>, %203, %cst_11 [1] : vector<16x32xf32> to vector<16xf32>
    %205 = vector.shape_cast %204 : vector<16xf32> to vector<16x1xf32>
    %206 = vector.extract_strided_slice %3 {offsets = [0, 24], sizes = [16, 8], strides = [1, 1]} : vector<16x64xf32> to vector<16x8xf32>
    %207 = vector.extract_strided_slice %4 {offsets = [24, 0], sizes = [8, 32], strides = [1, 1]} : vector<64x32xf32> to vector<8x32xf32>
    %cst_12 = arith.constant 0.000000e+00 : f32
    %208 = vector.broadcast %cst_12 : f32 to vector<16x32xf32>
    %209 = vector.extract_strided_slice %206 {offsets = [0, 0], sizes = [16, 1], strides = [1, 1]} : vector<16x8xf32> to vector<16x1xf32>
    %210 = vector.extract_strided_slice %207 {offsets = [0, 0], sizes = [1, 32], strides = [1, 1]} : vector<8x32xf32> to vector<1x32xf32>
    %211 = vector.broadcast %209 : vector<16x1xf32> to vector<16x32xf32>
    %212 = vector.broadcast %210 : vector<1x32xf32> to vector<16x32xf32>
    %213 = arith.subf %211, %212 : vector<16x32xf32>
    %214 = math.absf %213 : vector<16x32xf32>
    %215 = arith.subf %208, %214 : vector<16x32xf32>
    %216 = vector.extract_strided_slice %206 {offsets = [0, 1], sizes = [16, 1], strides = [1, 1]} : vector<16x8xf32> to vector<16x1xf32>
    %217 = vector.extract_strided_slice %207 {offsets = [1, 0], sizes = [1, 32], strides = [1, 1]} : vector<8x32xf32> to vector<1x32xf32>
    %218 = vector.broadcast %216 : vector<16x1xf32> to vector<16x32xf32>
    %219 = vector.broadcast %217 : vector<1x32xf32> to vector<16x32xf32>
    %220 = arith.subf %218, %219 : vector<16x32xf32>
    %221 = math.absf %220 : vector<16x32xf32>
    %222 = arith.subf %215, %221 : vector<16x32xf32>
    %223 = vector.extract_strided_slice %206 {offsets = [0, 2], sizes = [16, 1], strides = [1, 1]} : vector<16x8xf32> to vector<16x1xf32>
    %224 = vector.extract_strided_slice %207 {offsets = [2, 0], sizes = [1, 32], strides = [1, 1]} : vector<8x32xf32> to vector<1x32xf32>
    %225 = vector.broadcast %223 : vector<16x1xf32> to vector<16x32xf32>
    %226 = vector.broadcast %224 : vector<1x32xf32> to vector<16x32xf32>
    %227 = arith.subf %225, %226 : vector<16x32xf32>
    %228 = math.absf %227 : vector<16x32xf32>
    %229 = arith.subf %222, %228 : vector<16x32xf32>
    %230 = vector.extract_strided_slice %206 {offsets = [0, 3], sizes = [16, 1], strides = [1, 1]} : vector<16x8xf32> to vector<16x1xf32>
    %231 = vector.extract_strided_slice %207 {offsets = [3, 0], sizes = [1, 32], strides = [1, 1]} : vector<8x32xf32> to vector<1x32xf32>
    %232 = vector.broadcast %230 : vector<16x1xf32> to vector<16x32xf32>
    %233 = vector.broadcast %231 : vector<1x32xf32> to vector<16x32xf32>
    %234 = arith.subf %232, %233 : vector<16x32xf32>
    %235 = math.absf %234 : vector<16x32xf32>
    %236 = arith.subf %229, %235 : vector<16x32xf32>
    %237 = vector.extract_strided_slice %206 {offsets = [0, 4], sizes = [16, 1], strides = [1, 1]} : vector<16x8xf32> to vector<16x1xf32>
    %238 = vector.extract_strided_slice %207 {offsets = [4, 0], sizes = [1, 32], strides = [1, 1]} : vector<8x32xf32> to vector<1x32xf32>
    %239 = vector.broadcast %237 : vector<16x1xf32> to vector<16x32xf32>
    %240 = vector.broadcast %238 : vector<1x32xf32> to vector<16x32xf32>
    %241 = arith.subf %239, %240 : vector<16x32xf32>
    %242 = math.absf %241 : vector<16x32xf32>
    %243 = arith.subf %236, %242 : vector<16x32xf32>
    %244 = vector.extract_strided_slice %206 {offsets = [0, 5], sizes = [16, 1], strides = [1, 1]} : vector<16x8xf32> to vector<16x1xf32>
    %245 = vector.extract_strided_slice %207 {offsets = [5, 0], sizes = [1, 32], strides = [1, 1]} : vector<8x32xf32> to vector<1x32xf32>
    %246 = vector.broadcast %244 : vector<16x1xf32> to vector<16x32xf32>
    %247 = vector.broadcast %245 : vector<1x32xf32> to vector<16x32xf32>
    %248 = arith.subf %246, %247 : vector<16x32xf32>
    %249 = math.absf %248 : vector<16x32xf32>
    %250 = arith.subf %243, %249 : vector<16x32xf32>
    %251 = vector.extract_strided_slice %206 {offsets = [0, 6], sizes = [16, 1], strides = [1, 1]} : vector<16x8xf32> to vector<16x1xf32>
    %252 = vector.extract_strided_slice %207 {offsets = [6, 0], sizes = [1, 32], strides = [1, 1]} : vector<8x32xf32> to vector<1x32xf32>
    %253 = vector.broadcast %251 : vector<16x1xf32> to vector<16x32xf32>
    %254 = vector.broadcast %252 : vector<1x32xf32> to vector<16x32xf32>
    %255 = arith.subf %253, %254 : vector<16x32xf32>
    %256 = math.absf %255 : vector<16x32xf32>
    %257 = arith.subf %250, %256 : vector<16x32xf32>
    %258 = vector.extract_strided_slice %206 {offsets = [0, 7], sizes = [16, 1], strides = [1, 1]} : vector<16x8xf32> to vector<16x1xf32>
    %259 = vector.extract_strided_slice %207 {offsets = [7, 0], sizes = [1, 32], strides = [1, 1]} : vector<8x32xf32> to vector<1x32xf32>
    %260 = vector.broadcast %258 : vector<16x1xf32> to vector<16x32xf32>
    %261 = vector.broadcast %259 : vector<1x32xf32> to vector<16x32xf32>
    %262 = arith.subf %260, %261 : vector<16x32xf32>
    %263 = math.absf %262 : vector<16x32xf32>
    %264 = arith.subf %257, %263 : vector<16x32xf32>
    %265 = math.exp %264 : vector<16x32xf32>
    %cst_13 = arith.constant 0.000000e+00 : f32
    %266 = vector.broadcast %cst_13 : f32 to vector<16x32xf32>
    %267 = arith.select %13, %266, %265 : vector<16x32xi1>, vector<16x32xf32>
    %cst_14 = arith.constant dense<0.000000e+00> : vector<16xf32>
    %268 = vector.multi_reduction <add>, %267, %cst_14 [1] : vector<16x32xf32> to vector<16xf32>
    %269 = vector.shape_cast %268 : vector<16xf32> to vector<16x1xf32>
    %270 = vector.extract_strided_slice %3 {offsets = [0, 32], sizes = [16, 8], strides = [1, 1]} : vector<16x64xf32> to vector<16x8xf32>
    %271 = vector.extract_strided_slice %4 {offsets = [32, 0], sizes = [8, 32], strides = [1, 1]} : vector<64x32xf32> to vector<8x32xf32>
    %cst_15 = arith.constant 0.000000e+00 : f32
    %272 = vector.broadcast %cst_15 : f32 to vector<16x32xf32>
    %273 = vector.extract_strided_slice %270 {offsets = [0, 0], sizes = [16, 1], strides = [1, 1]} : vector<16x8xf32> to vector<16x1xf32>
    %274 = vector.extract_strided_slice %271 {offsets = [0, 0], sizes = [1, 32], strides = [1, 1]} : vector<8x32xf32> to vector<1x32xf32>
    %275 = vector.broadcast %273 : vector<16x1xf32> to vector<16x32xf32>
    %276 = vector.broadcast %274 : vector<1x32xf32> to vector<16x32xf32>
    %277 = arith.subf %275, %276 : vector<16x32xf32>
    %278 = math.absf %277 : vector<16x32xf32>
    %279 = arith.subf %272, %278 : vector<16x32xf32>
    %280 = vector.extract_strided_slice %270 {offsets = [0, 1], sizes = [16, 1], strides = [1, 1]} : vector<16x8xf32> to vector<16x1xf32>
    %281 = vector.extract_strided_slice %271 {offsets = [1, 0], sizes = [1, 32], strides = [1, 1]} : vector<8x32xf32> to vector<1x32xf32>
    %282 = vector.broadcast %280 : vector<16x1xf32> to vector<16x32xf32>
    %283 = vector.broadcast %281 : vector<1x32xf32> to vector<16x32xf32>
    %284 = arith.subf %282, %283 : vector<16x32xf32>
    %285 = math.absf %284 : vector<16x32xf32>
    %286 = arith.subf %279, %285 : vector<16x32xf32>
    %287 = vector.extract_strided_slice %270 {offsets = [0, 2], sizes = [16, 1], strides = [1, 1]} : vector<16x8xf32> to vector<16x1xf32>
    %288 = vector.extract_strided_slice %271 {offsets = [2, 0], sizes = [1, 32], strides = [1, 1]} : vector<8x32xf32> to vector<1x32xf32>
    %289 = vector.broadcast %287 : vector<16x1xf32> to vector<16x32xf32>
    %290 = vector.broadcast %288 : vector<1x32xf32> to vector<16x32xf32>
    %291 = arith.subf %289, %290 : vector<16x32xf32>
    %292 = math.absf %291 : vector<16x32xf32>
    %293 = arith.subf %286, %292 : vector<16x32xf32>
    %294 = vector.extract_strided_slice %270 {offsets = [0, 3], sizes = [16, 1], strides = [1, 1]} : vector<16x8xf32> to vector<16x1xf32>
    %295 = vector.extract_strided_slice %271 {offsets = [3, 0], sizes = [1, 32], strides = [1, 1]} : vector<8x32xf32> to vector<1x32xf32>
    %296 = vector.broadcast %294 : vector<16x1xf32> to vector<16x32xf32>
    %297 = vector.broadcast %295 : vector<1x32xf32> to vector<16x32xf32>
    %298 = arith.subf %296, %297 : vector<16x32xf32>
    %299 = math.absf %298 : vector<16x32xf32>
    %300 = arith.subf %293, %299 : vector<16x32xf32>
    %301 = vector.extract_strided_slice %270 {offsets = [0, 4], sizes = [16, 1], strides = [1, 1]} : vector<16x8xf32> to vector<16x1xf32>
    %302 = vector.extract_strided_slice %271 {offsets = [4, 0], sizes = [1, 32], strides = [1, 1]} : vector<8x32xf32> to vector<1x32xf32>
    %303 = vector.broadcast %301 : vector<16x1xf32> to vector<16x32xf32>
    %304 = vector.broadcast %302 : vector<1x32xf32> to vector<16x32xf32>
    %305 = arith.subf %303, %304 : vector<16x32xf32>
    %306 = math.absf %305 : vector<16x32xf32>
    %307 = arith.subf %300, %306 : vector<16x32xf32>
    %308 = vector.extract_strided_slice %270 {offsets = [0, 5], sizes = [16, 1], strides = [1, 1]} : vector<16x8xf32> to vector<16x1xf32>
    %309 = vector.extract_strided_slice %271 {offsets = [5, 0], sizes = [1, 32], strides = [1, 1]} : vector<8x32xf32> to vector<1x32xf32>
    %310 = vector.broadcast %308 : vector<16x1xf32> to vector<16x32xf32>
    %311 = vector.broadcast %309 : vector<1x32xf32> to vector<16x32xf32>
    %312 = arith.subf %310, %311 : vector<16x32xf32>
    %313 = math.absf %312 : vector<16x32xf32>
    %314 = arith.subf %307, %313 : vector<16x32xf32>
    %315 = vector.extract_strided_slice %270 {offsets = [0, 6], sizes = [16, 1], strides = [1, 1]} : vector<16x8xf32> to vector<16x1xf32>
    %316 = vector.extract_strided_slice %271 {offsets = [6, 0], sizes = [1, 32], strides = [1, 1]} : vector<8x32xf32> to vector<1x32xf32>
    %317 = vector.broadcast %315 : vector<16x1xf32> to vector<16x32xf32>
    %318 = vector.broadcast %316 : vector<1x32xf32> to vector<16x32xf32>
    %319 = arith.subf %317, %318 : vector<16x32xf32>
    %320 = math.absf %319 : vector<16x32xf32>
    %321 = arith.subf %314, %320 : vector<16x32xf32>
    %322 = vector.extract_strided_slice %270 {offsets = [0, 7], sizes = [16, 1], strides = [1, 1]} : vector<16x8xf32> to vector<16x1xf32>
    %323 = vector.extract_strided_slice %271 {offsets = [7, 0], sizes = [1, 32], strides = [1, 1]} : vector<8x32xf32> to vector<1x32xf32>
    %324 = vector.broadcast %322 : vector<16x1xf32> to vector<16x32xf32>
    %325 = vector.broadcast %323 : vector<1x32xf32> to vector<16x32xf32>
    %326 = arith.subf %324, %325 : vector<16x32xf32>
    %327 = math.absf %326 : vector<16x32xf32>
    %328 = arith.subf %321, %327 : vector<16x32xf32>
    %329 = math.exp %328 : vector<16x32xf32>
    %cst_16 = arith.constant 0.000000e+00 : f32
    %330 = vector.broadcast %cst_16 : f32 to vector<16x32xf32>
    %331 = arith.select %13, %330, %329 : vector<16x32xi1>, vector<16x32xf32>
    %cst_17 = arith.constant dense<0.000000e+00> : vector<16xf32>
    %332 = vector.multi_reduction <add>, %331, %cst_17 [1] : vector<16x32xf32> to vector<16xf32>
    %333 = vector.shape_cast %332 : vector<16xf32> to vector<16x1xf32>
    %334 = vector.extract_strided_slice %3 {offsets = [0, 40], sizes = [16, 8], strides = [1, 1]} : vector<16x64xf32> to vector<16x8xf32>
    %335 = vector.extract_strided_slice %4 {offsets = [40, 0], sizes = [8, 32], strides = [1, 1]} : vector<64x32xf32> to vector<8x32xf32>
    %cst_18 = arith.constant 0.000000e+00 : f32
    %336 = vector.broadcast %cst_18 : f32 to vector<16x32xf32>
    %337 = vector.extract_strided_slice %334 {offsets = [0, 0], sizes = [16, 1], strides = [1, 1]} : vector<16x8xf32> to vector<16x1xf32>
    %338 = vector.extract_strided_slice %335 {offsets = [0, 0], sizes = [1, 32], strides = [1, 1]} : vector<8x32xf32> to vector<1x32xf32>
    %339 = vector.broadcast %337 : vector<16x1xf32> to vector<16x32xf32>
    %340 = vector.broadcast %338 : vector<1x32xf32> to vector<16x32xf32>
    %341 = arith.subf %339, %340 : vector<16x32xf32>
    %342 = math.absf %341 : vector<16x32xf32>
    %343 = arith.subf %336, %342 : vector<16x32xf32>
    %344 = vector.extract_strided_slice %334 {offsets = [0, 1], sizes = [16, 1], strides = [1, 1]} : vector<16x8xf32> to vector<16x1xf32>
    %345 = vector.extract_strided_slice %335 {offsets = [1, 0], sizes = [1, 32], strides = [1, 1]} : vector<8x32xf32> to vector<1x32xf32>
    %346 = vector.broadcast %344 : vector<16x1xf32> to vector<16x32xf32>
    %347 = vector.broadcast %345 : vector<1x32xf32> to vector<16x32xf32>
    %348 = arith.subf %346, %347 : vector<16x32xf32>
    %349 = math.absf %348 : vector<16x32xf32>
    %350 = arith.subf %343, %349 : vector<16x32xf32>
    %351 = vector.extract_strided_slice %334 {offsets = [0, 2], sizes = [16, 1], strides = [1, 1]} : vector<16x8xf32> to vector<16x1xf32>
    %352 = vector.extract_strided_slice %335 {offsets = [2, 0], sizes = [1, 32], strides = [1, 1]} : vector<8x32xf32> to vector<1x32xf32>
    %353 = vector.broadcast %351 : vector<16x1xf32> to vector<16x32xf32>
    %354 = vector.broadcast %352 : vector<1x32xf32> to vector<16x32xf32>
    %355 = arith.subf %353, %354 : vector<16x32xf32>
    %356 = math.absf %355 : vector<16x32xf32>
    %357 = arith.subf %350, %356 : vector<16x32xf32>
    %358 = vector.extract_strided_slice %334 {offsets = [0, 3], sizes = [16, 1], strides = [1, 1]} : vector<16x8xf32> to vector<16x1xf32>
    %359 = vector.extract_strided_slice %335 {offsets = [3, 0], sizes = [1, 32], strides = [1, 1]} : vector<8x32xf32> to vector<1x32xf32>
    %360 = vector.broadcast %358 : vector<16x1xf32> to vector<16x32xf32>
    %361 = vector.broadcast %359 : vector<1x32xf32> to vector<16x32xf32>
    %362 = arith.subf %360, %361 : vector<16x32xf32>
    %363 = math.absf %362 : vector<16x32xf32>
    %364 = arith.subf %357, %363 : vector<16x32xf32>
    %365 = vector.extract_strided_slice %334 {offsets = [0, 4], sizes = [16, 1], strides = [1, 1]} : vector<16x8xf32> to vector<16x1xf32>
    %366 = vector.extract_strided_slice %335 {offsets = [4, 0], sizes = [1, 32], strides = [1, 1]} : vector<8x32xf32> to vector<1x32xf32>
    %367 = vector.broadcast %365 : vector<16x1xf32> to vector<16x32xf32>
    %368 = vector.broadcast %366 : vector<1x32xf32> to vector<16x32xf32>
    %369 = arith.subf %367, %368 : vector<16x32xf32>
    %370 = math.absf %369 : vector<16x32xf32>
    %371 = arith.subf %364, %370 : vector<16x32xf32>
    %372 = vector.extract_strided_slice %334 {offsets = [0, 5], sizes = [16, 1], strides = [1, 1]} : vector<16x8xf32> to vector<16x1xf32>
    %373 = vector.extract_strided_slice %335 {offsets = [5, 0], sizes = [1, 32], strides = [1, 1]} : vector<8x32xf32> to vector<1x32xf32>
    %374 = vector.broadcast %372 : vector<16x1xf32> to vector<16x32xf32>
    %375 = vector.broadcast %373 : vector<1x32xf32> to vector<16x32xf32>
    %376 = arith.subf %374, %375 : vector<16x32xf32>
    %377 = math.absf %376 : vector<16x32xf32>
    %378 = arith.subf %371, %377 : vector<16x32xf32>
    %379 = vector.extract_strided_slice %334 {offsets = [0, 6], sizes = [16, 1], strides = [1, 1]} : vector<16x8xf32> to vector<16x1xf32>
    %380 = vector.extract_strided_slice %335 {offsets = [6, 0], sizes = [1, 32], strides = [1, 1]} : vector<8x32xf32> to vector<1x32xf32>
    %381 = vector.broadcast %379 : vector<16x1xf32> to vector<16x32xf32>
    %382 = vector.broadcast %380 : vector<1x32xf32> to vector<16x32xf32>
    %383 = arith.subf %381, %382 : vector<16x32xf32>
    %384 = math.absf %383 : vector<16x32xf32>
    %385 = arith.subf %378, %384 : vector<16x32xf32>
    %386 = vector.extract_strided_slice %334 {offsets = [0, 7], sizes = [16, 1], strides = [1, 1]} : vector<16x8xf32> to vector<16x1xf32>
    %387 = vector.extract_strided_slice %335 {offsets = [7, 0], sizes = [1, 32], strides = [1, 1]} : vector<8x32xf32> to vector<1x32xf32>
    %388 = vector.broadcast %386 : vector<16x1xf32> to vector<16x32xf32>
    %389 = vector.broadcast %387 : vector<1x32xf32> to vector<16x32xf32>
    %390 = arith.subf %388, %389 : vector<16x32xf32>
    %391 = math.absf %390 : vector<16x32xf32>
    %392 = arith.subf %385, %391 : vector<16x32xf32>
    %393 = math.exp %392 : vector<16x32xf32>
    %cst_19 = arith.constant 0.000000e+00 : f32
    %394 = vector.broadcast %cst_19 : f32 to vector<16x32xf32>
    %395 = arith.select %13, %394, %393 : vector<16x32xi1>, vector<16x32xf32>
    %cst_20 = arith.constant dense<0.000000e+00> : vector<16xf32>
    %396 = vector.multi_reduction <add>, %395, %cst_20 [1] : vector<16x32xf32> to vector<16xf32>
    %397 = vector.shape_cast %396 : vector<16xf32> to vector<16x1xf32>
    %398 = vector.extract_strided_slice %3 {offsets = [0, 48], sizes = [16, 8], strides = [1, 1]} : vector<16x64xf32> to vector<16x8xf32>
    %399 = vector.extract_strided_slice %4 {offsets = [48, 0], sizes = [8, 32], strides = [1, 1]} : vector<64x32xf32> to vector<8x32xf32>
    %cst_21 = arith.constant 0.000000e+00 : f32
    %400 = vector.broadcast %cst_21 : f32 to vector<16x32xf32>
    %401 = vector.extract_strided_slice %398 {offsets = [0, 0], sizes = [16, 1], strides = [1, 1]} : vector<16x8xf32> to vector<16x1xf32>
    %402 = vector.extract_strided_slice %399 {offsets = [0, 0], sizes = [1, 32], strides = [1, 1]} : vector<8x32xf32> to vector<1x32xf32>
    %403 = vector.broadcast %401 : vector<16x1xf32> to vector<16x32xf32>
    %404 = vector.broadcast %402 : vector<1x32xf32> to vector<16x32xf32>
    %405 = arith.subf %403, %404 : vector<16x32xf32>
    %406 = math.absf %405 : vector<16x32xf32>
    %407 = arith.subf %400, %406 : vector<16x32xf32>
    %408 = vector.extract_strided_slice %398 {offsets = [0, 1], sizes = [16, 1], strides = [1, 1]} : vector<16x8xf32> to vector<16x1xf32>
    %409 = vector.extract_strided_slice %399 {offsets = [1, 0], sizes = [1, 32], strides = [1, 1]} : vector<8x32xf32> to vector<1x32xf32>
    %410 = vector.broadcast %408 : vector<16x1xf32> to vector<16x32xf32>
    %411 = vector.broadcast %409 : vector<1x32xf32> to vector<16x32xf32>
    %412 = arith.subf %410, %411 : vector<16x32xf32>
    %413 = math.absf %412 : vector<16x32xf32>
    %414 = arith.subf %407, %413 : vector<16x32xf32>
    %415 = vector.extract_strided_slice %398 {offsets = [0, 2], sizes = [16, 1], strides = [1, 1]} : vector<16x8xf32> to vector<16x1xf32>
    %416 = vector.extract_strided_slice %399 {offsets = [2, 0], sizes = [1, 32], strides = [1, 1]} : vector<8x32xf32> to vector<1x32xf32>
    %417 = vector.broadcast %415 : vector<16x1xf32> to vector<16x32xf32>
    %418 = vector.broadcast %416 : vector<1x32xf32> to vector<16x32xf32>
    %419 = arith.subf %417, %418 : vector<16x32xf32>
    %420 = math.absf %419 : vector<16x32xf32>
    %421 = arith.subf %414, %420 : vector<16x32xf32>
    %422 = vector.extract_strided_slice %398 {offsets = [0, 3], sizes = [16, 1], strides = [1, 1]} : vector<16x8xf32> to vector<16x1xf32>
    %423 = vector.extract_strided_slice %399 {offsets = [3, 0], sizes = [1, 32], strides = [1, 1]} : vector<8x32xf32> to vector<1x32xf32>
    %424 = vector.broadcast %422 : vector<16x1xf32> to vector<16x32xf32>
    %425 = vector.broadcast %423 : vector<1x32xf32> to vector<16x32xf32>
    %426 = arith.subf %424, %425 : vector<16x32xf32>
    %427 = math.absf %426 : vector<16x32xf32>
    %428 = arith.subf %421, %427 : vector<16x32xf32>
    %429 = vector.extract_strided_slice %398 {offsets = [0, 4], sizes = [16, 1], strides = [1, 1]} : vector<16x8xf32> to vector<16x1xf32>
    %430 = vector.extract_strided_slice %399 {offsets = [4, 0], sizes = [1, 32], strides = [1, 1]} : vector<8x32xf32> to vector<1x32xf32>
    %431 = vector.broadcast %429 : vector<16x1xf32> to vector<16x32xf32>
    %432 = vector.broadcast %430 : vector<1x32xf32> to vector<16x32xf32>
    %433 = arith.subf %431, %432 : vector<16x32xf32>
    %434 = math.absf %433 : vector<16x32xf32>
    %435 = arith.subf %428, %434 : vector<16x32xf32>
    %436 = vector.extract_strided_slice %398 {offsets = [0, 5], sizes = [16, 1], strides = [1, 1]} : vector<16x8xf32> to vector<16x1xf32>
    %437 = vector.extract_strided_slice %399 {offsets = [5, 0], sizes = [1, 32], strides = [1, 1]} : vector<8x32xf32> to vector<1x32xf32>
    %438 = vector.broadcast %436 : vector<16x1xf32> to vector<16x32xf32>
    %439 = vector.broadcast %437 : vector<1x32xf32> to vector<16x32xf32>
    %440 = arith.subf %438, %439 : vector<16x32xf32>
    %441 = math.absf %440 : vector<16x32xf32>
    %442 = arith.subf %435, %441 : vector<16x32xf32>
    %443 = vector.extract_strided_slice %398 {offsets = [0, 6], sizes = [16, 1], strides = [1, 1]} : vector<16x8xf32> to vector<16x1xf32>
    %444 = vector.extract_strided_slice %399 {offsets = [6, 0], sizes = [1, 32], strides = [1, 1]} : vector<8x32xf32> to vector<1x32xf32>
    %445 = vector.broadcast %443 : vector<16x1xf32> to vector<16x32xf32>
    %446 = vector.broadcast %444 : vector<1x32xf32> to vector<16x32xf32>
    %447 = arith.subf %445, %446 : vector<16x32xf32>
    %448 = math.absf %447 : vector<16x32xf32>
    %449 = arith.subf %442, %448 : vector<16x32xf32>
    %450 = vector.extract_strided_slice %398 {offsets = [0, 7], sizes = [16, 1], strides = [1, 1]} : vector<16x8xf32> to vector<16x1xf32>
    %451 = vector.extract_strided_slice %399 {offsets = [7, 0], sizes = [1, 32], strides = [1, 1]} : vector<8x32xf32> to vector<1x32xf32>
    %452 = vector.broadcast %450 : vector<16x1xf32> to vector<16x32xf32>
    %453 = vector.broadcast %451 : vector<1x32xf32> to vector<16x32xf32>
    %454 = arith.subf %452, %453 : vector<16x32xf32>
    %455 = math.absf %454 : vector<16x32xf32>
    %456 = arith.subf %449, %455 : vector<16x32xf32>
    %457 = math.exp %456 : vector<16x32xf32>
    %cst_22 = arith.constant 0.000000e+00 : f32
    %458 = vector.broadcast %cst_22 : f32 to vector<16x32xf32>
    %459 = arith.select %13, %458, %457 : vector<16x32xi1>, vector<16x32xf32>
    %cst_23 = arith.constant dense<0.000000e+00> : vector<16xf32>
    %460 = vector.multi_reduction <add>, %459, %cst_23 [1] : vector<16x32xf32> to vector<16xf32>
    %461 = vector.shape_cast %460 : vector<16xf32> to vector<16x1xf32>
    %462 = vector.extract_strided_slice %3 {offsets = [0, 56], sizes = [16, 8], strides = [1, 1]} : vector<16x64xf32> to vector<16x8xf32>
    %463 = vector.extract_strided_slice %4 {offsets = [56, 0], sizes = [8, 32], strides = [1, 1]} : vector<64x32xf32> to vector<8x32xf32>
    %cst_24 = arith.constant 0.000000e+00 : f32
    %464 = vector.broadcast %cst_24 : f32 to vector<16x32xf32>
    %465 = vector.extract_strided_slice %462 {offsets = [0, 0], sizes = [16, 1], strides = [1, 1]} : vector<16x8xf32> to vector<16x1xf32>
    %466 = vector.extract_strided_slice %463 {offsets = [0, 0], sizes = [1, 32], strides = [1, 1]} : vector<8x32xf32> to vector<1x32xf32>
    %467 = vector.broadcast %465 : vector<16x1xf32> to vector<16x32xf32>
    %468 = vector.broadcast %466 : vector<1x32xf32> to vector<16x32xf32>
    %469 = arith.subf %467, %468 : vector<16x32xf32>
    %470 = math.absf %469 : vector<16x32xf32>
    %471 = arith.subf %464, %470 : vector<16x32xf32>
    %472 = vector.extract_strided_slice %462 {offsets = [0, 1], sizes = [16, 1], strides = [1, 1]} : vector<16x8xf32> to vector<16x1xf32>
    %473 = vector.extract_strided_slice %463 {offsets = [1, 0], sizes = [1, 32], strides = [1, 1]} : vector<8x32xf32> to vector<1x32xf32>
    %474 = vector.broadcast %472 : vector<16x1xf32> to vector<16x32xf32>
    %475 = vector.broadcast %473 : vector<1x32xf32> to vector<16x32xf32>
    %476 = arith.subf %474, %475 : vector<16x32xf32>
    %477 = math.absf %476 : vector<16x32xf32>
    %478 = arith.subf %471, %477 : vector<16x32xf32>
    %479 = vector.extract_strided_slice %462 {offsets = [0, 2], sizes = [16, 1], strides = [1, 1]} : vector<16x8xf32> to vector<16x1xf32>
    %480 = vector.extract_strided_slice %463 {offsets = [2, 0], sizes = [1, 32], strides = [1, 1]} : vector<8x32xf32> to vector<1x32xf32>
    %481 = vector.broadcast %479 : vector<16x1xf32> to vector<16x32xf32>
    %482 = vector.broadcast %480 : vector<1x32xf32> to vector<16x32xf32>
    %483 = arith.subf %481, %482 : vector<16x32xf32>
    %484 = math.absf %483 : vector<16x32xf32>
    %485 = arith.subf %478, %484 : vector<16x32xf32>
    %486 = vector.extract_strided_slice %462 {offsets = [0, 3], sizes = [16, 1], strides = [1, 1]} : vector<16x8xf32> to vector<16x1xf32>
    %487 = vector.extract_strided_slice %463 {offsets = [3, 0], sizes = [1, 32], strides = [1, 1]} : vector<8x32xf32> to vector<1x32xf32>
    %488 = vector.broadcast %486 : vector<16x1xf32> to vector<16x32xf32>
    %489 = vector.broadcast %487 : vector<1x32xf32> to vector<16x32xf32>
    %490 = arith.subf %488, %489 : vector<16x32xf32>
    %491 = math.absf %490 : vector<16x32xf32>
    %492 = arith.subf %485, %491 : vector<16x32xf32>
    %493 = vector.extract_strided_slice %462 {offsets = [0, 4], sizes = [16, 1], strides = [1, 1]} : vector<16x8xf32> to vector<16x1xf32>
    %494 = vector.extract_strided_slice %463 {offsets = [4, 0], sizes = [1, 32], strides = [1, 1]} : vector<8x32xf32> to vector<1x32xf32>
    %495 = vector.broadcast %493 : vector<16x1xf32> to vector<16x32xf32>
    %496 = vector.broadcast %494 : vector<1x32xf32> to vector<16x32xf32>
    %497 = arith.subf %495, %496 : vector<16x32xf32>
    %498 = math.absf %497 : vector<16x32xf32>
    %499 = arith.subf %492, %498 : vector<16x32xf32>
    %500 = vector.extract_strided_slice %462 {offsets = [0, 5], sizes = [16, 1], strides = [1, 1]} : vector<16x8xf32> to vector<16x1xf32>
    %501 = vector.extract_strided_slice %463 {offsets = [5, 0], sizes = [1, 32], strides = [1, 1]} : vector<8x32xf32> to vector<1x32xf32>
    %502 = vector.broadcast %500 : vector<16x1xf32> to vector<16x32xf32>
    %503 = vector.broadcast %501 : vector<1x32xf32> to vector<16x32xf32>
    %504 = arith.subf %502, %503 : vector<16x32xf32>
    %505 = math.absf %504 : vector<16x32xf32>
    %506 = arith.subf %499, %505 : vector<16x32xf32>
    %507 = vector.extract_strided_slice %462 {offsets = [0, 6], sizes = [16, 1], strides = [1, 1]} : vector<16x8xf32> to vector<16x1xf32>
    %508 = vector.extract_strided_slice %463 {offsets = [6, 0], sizes = [1, 32], strides = [1, 1]} : vector<8x32xf32> to vector<1x32xf32>
    %509 = vector.broadcast %507 : vector<16x1xf32> to vector<16x32xf32>
    %510 = vector.broadcast %508 : vector<1x32xf32> to vector<16x32xf32>
    %511 = arith.subf %509, %510 : vector<16x32xf32>
    %512 = math.absf %511 : vector<16x32xf32>
    %513 = arith.subf %506, %512 : vector<16x32xf32>
    %514 = vector.extract_strided_slice %462 {offsets = [0, 7], sizes = [16, 1], strides = [1, 1]} : vector<16x8xf32> to vector<16x1xf32>
    %515 = vector.extract_strided_slice %463 {offsets = [7, 0], sizes = [1, 32], strides = [1, 1]} : vector<8x32xf32> to vector<1x32xf32>
    %516 = vector.broadcast %514 : vector<16x1xf32> to vector<16x32xf32>
    %517 = vector.broadcast %515 : vector<1x32xf32> to vector<16x32xf32>
    %518 = arith.subf %516, %517 : vector<16x32xf32>
    %519 = math.absf %518 : vector<16x32xf32>
    %520 = arith.subf %513, %519 : vector<16x32xf32>
    %521 = math.exp %520 : vector<16x32xf32>
    %cst_25 = arith.constant 0.000000e+00 : f32
    %522 = vector.broadcast %cst_25 : f32 to vector<16x32xf32>
    %523 = arith.select %13, %522, %521 : vector<16x32xi1>, vector<16x32xf32>
    %cst_26 = arith.constant dense<0.000000e+00> : vector<16xf32>
    %524 = vector.multi_reduction <add>, %523, %cst_26 [1] : vector<16x32xf32> to vector<16xf32>
    %525 = vector.shape_cast %524 : vector<16xf32> to vector<16x1xf32>
    %526 = tpu.concatenate %77, %141, %205, %269, %333, %397, %461, %525 in 1 : vector<16x1xf32>, vector<16x1xf32>, vector<16x1xf32>, vector<16x1xf32>, vector<16x1xf32>, vector<16x1xf32>, vector<16x1xf32>, vector<16x1xf32> -> vector<16x8xf32>
    %cst_27 = arith.constant 0.000000e+00 : f32
    %527 = vector.broadcast %cst_27 : f32 to vector<16x120xf32>
    %528 = tpu.concatenate %526, %527 in 1 : vector<16x8xf32>, vector<16x120xf32> -> vector<16x128xf32>
    %c0_28 = arith.constant 0 : index
    %c0_29 = arith.constant 0 : index
    %529 = vector.load %arg8[%c0_28, %c0_29] : memref<16x128xf32, #tpu.memory_space<vmem>>, vector<16x128xf32>
    %530 = arith.addf %529, %528 : vector<16x128xf32>
    %c0_30 = arith.constant 0 : index
    %c0_31 = arith.constant 0 : index
    %531 = vector.load %arg8[%c0_30, %c0_31] : memref<16x128xf32, #tpu.memory_space<vmem>>, vector<16x128xf32>
    tpu.vector_store %arg8[%c0_30, %c0_31], %530 {strides = array<i32>} : memref<16x128xf32, #tpu.memory_space<vmem>>, vector<16x128xf32>,
    %c0_i32_32 = arith.constant 0 : i32
    %532 = arith.cmpi eq, %arg1, %c0_i32_32 : i32
    %533 = arith.extui %532 : i1 to i32
    %c0_i32_33 = arith.constant 0 : i32
    %534 = arith.cmpi ne, %533, %c0_i32_33 : i32
    scf.if %534 {
      %c0_34 = arith.constant 0 : index
      %c0_35 = arith.constant 0 : index
      %535 = vector.load %arg8[%c0_34, %c0_35] : memref<16x128xf32, #tpu.memory_space<vmem>>, vector<16x128xf32>
      %c0_36 = arith.constant 0 : index
      %c0_37 = arith.constant 0 : index
      %536 = vector.load %arg6[%c0_36, %c0_37] : memref<16x128xf32, #tpu.memory_space<vmem>>, vector<16x128xf32>
      tpu.vector_store %arg6[%c0_36, %c0_37], %535 {strides = array<i32>} : memref<16x128xf32, #tpu.memory_space<vmem>>, vector<16x128xf32>,
    } else {
    }
    return
  }
  func.func @transform_0(%arg0: i32, %arg1: i32) -> (i32, i32) {
    %c0_i32 = arith.constant 0 : i32
    %c0_i32_0 = arith.constant 0 : i32
    return %arg0, %c0_i32 : i32, i32
  }
  func.func @transform_1(%arg0: i32, %arg1: i32) -> (i32, i32) {
    %c0_i32 = arith.constant 0 : i32
    %c0_i32_0 = arith.constant 0 : i32
    %c0_i32_1 = arith.constant 0 : i32
    return %c0_i32, %c0_i32_0 : i32, i32
  }
  func.func @transform_2(%arg0: i32, %arg1: i32) -> (i32, i32) {
    %c0_i32 = arith.constant 0 : i32
    %c0_i32_0 = arith.constant 0 : i32
    return %c0_i32, %arg1 : i32, i32
  }
  func.func @transform_3(%arg0: i32, %arg1: i32) -> (i32, i32) {
    %c0_i32 = arith.constant 0 : i32
    %c0_i32_0 = arith.constant 0 : i32
    return %c0_i32, %arg1 : i32, i32
  }
  func.func @transform_4(%arg0: i32, %arg1: i32) -> (i32, i32) {
    %c0_i32 = arith.constant 0 : i32
    %c0_i32_0 = arith.constant 0 : i32
    return %arg0, %c0_i32 : i32, i32
  }
}

</mosaic_0001>

<bundles_post_ra>
// kernel: tpu_custom_call.1
= control target key start
LH: loop header
LB: loop body
LE: loop exit
PB: predicated region body
PF: predicated region fallthrough
CT: control target
= control target key end

     0   :  { %9 = vsyncpa [#allocation5], 0  ;;  %s2471_s0 = inlined_call_operand.vmem [shape: f32[32,16], index: 0, kind: input, shape index: {}]   ;;  %s2472_s1 = inlined_call_operand.vmem [shape: f32[16,64], index: 1, kind: input, shape index: {}]   ;;  %s2473_s2 = inlined_call_operand.vmem [shape: f32[64,32], index: 2, kind: input, shape index: {}]   ;;  %s2474_s3 = inlined_call_operand.vmem [shape: f32[8,32], index: 3, kind: input, shape index: {}]   ;;  %s2475_s4 = inlined_call_operand.hbm [shape: f32[32,128], index: 4, kind: output, shape index: {}]  }
   0x1   :  { %11 = vsyncpa [#allocation5 + $0x1], 0  ;;  %s1983_s15 = smov 0   ;;  %s1985_s16 = smov 0  }
   0x2   :  { %s1987_s17 = smov 0   ;;  %s1989_s18 = smov 0  }
   0x3   :  { %s1991_s19 = smov 0   ;;  %s1993_s20 = smov 0  }
   0x4 LB: > { %s1524_s3 = sadd.s32 4294967295, %s1890_s20   ;;  %s1525_s21 = sadd.s32 4294967294, %s1890_s20   ;;  %s1890_s20 = sphi %s1993_s20, %s17_s20   ;;  %s1886_s19 = sphi %s1991_s19, %s2486_s19   ;;  %s1882_s18 = sphi %s1989_s18, %s2485_s18   ;;  %s1878_s17 = sphi %s1987_s17, %s2484_s17   ;;  %s1874_s16 = sphi %s1985_s16, %s2483_s16   ;;  %s1870_s15 = sphi %s1983_s15, %s2482_s15  }
   0x5   : > { %s29_s22 = sadd.s32 1, %s1886_s19  ;;  %s135_s23 = sadd.s32 1, %s1878_s17 }
   0x6   : > { %p31_p0 = scmp.ge.s32.totalorder %s29_s22, 2  ;;  %p145_p1 = scmp.ne.s32.totalorder %s1878_s17, %s1874_s16 }
   0x7   : > { %p146_p2 = scmp.eq.s32.totalorder %s1524_s3, 1  ;;  %p151_p3 = scmp.ne.s32.totalorder %s1874_s16, %s1870_s15 }
   0x8   : > { %s2488_s22 = smov (%p31_p0, %s29_s22), 0  ;;  %p152_p5 = scmp.eq.s32.totalorder %s1525_s21, 1 }
   0x9   : > { %p2023_p4 = por %p146_p2, %p145_p1  ;;  %s132_s25 = ssub.s32 %s1886_s19, %s2488_s22 }
   0xa   : > { %p1530_p6 = scmp.ge.s32.totalorder %s1890_s20, 1  ;;  %p133_p7 = scmp.eq.s32.totalorder %s132_s25, 0 }
   0xb   : > { %p2030_p8 = por %p152_p5, %p151_p3  ;;  %p196_p9 = scmp.lt.s32.totalorder %s1890_s20, 3 }
   0xc   : > { %s2036_s27 = scalar_select %p133_p7, %s1878_s17, %s135_s23  }
   0xd   : > { %p197_p10 = pnand %p1530_p6, %p196_p9 }
   0xe   : > { %s1532_s6 = sshll.u32 (!%p197_p10), %s1882_s18, 1  ;;  %s1536_s13 = sshll.u32 (!%p197_p10), %s1882_s18, 4 }
   0xf   : > { %200 = sbr.rel (%p197_p10) target bundleno = 1469 (0x5bd), region = 36  ;;  %p231_p11 = scmp.lt.s32.totalorder (!%p197_p10), %s1532_s6, 3 }
  0x10   : > { %s227_s11 = sand.u32 (!%p197_p10), 1, %s1874_s16   ;;  %s1420_s21 = scalar_lea.hbm (!%p197_p10), %s2475_s4, %s1536_s13 }
  0x11   : > { %s1531_s12 = sshll.u32 (!%p197_p10), %s227_s11, 4  ;;  %s1423_s28 = sshll.u32 (!%p197_p10), %s1420_s21, 4  ;;  %s1424_s28 = int_to_ptr.hbm [resolvable:$true] %s1423_s28 }
  0x12   : > { %s229_s23 = scalar_lea.vmem (!%p197_p10), [#allocation4], %s1531_s12  ;;  %s1409_s18 = scalar_lea.sflag (!%p197_p10), [#allocation5], %s227_s11 }
  0x13   : > { %s1421_s25 = sshll.u32 (!%p197_p10), %s229_s23, 4  ;;  %s1826_s29 = sshra.s32 (!%p197_p10), %s1424_s28, 4  ;;  %s1422_s25 = int_to_ptr.vmem [resolvable:$true] %s1421_s25  ;;  %s1827_s29 = int_to_ptr.hbm [resolvable:$true] %s1826_s29 }
  0x14   : > { %v252_v0 = vld [vmem:[%s2472_s1 + $0x8] sm:$0xff]  ;;  %v251_v1 = vld [vmem:[%s2472_s1] sm:$0xff]  ;;  %s2490_s6 = smov (!%p231_p11, %s1532_s6), 3  ;;  %vm253_vm0 = vcmask 130048   ;;  %v1892_v4 = vmov 2   ;;  %v1893_v5 = vmov 1   ;;  %p1833_p1 = scmp.lt.s32.totalorder %s1827_s29, %s2475_s4 }
  0x15   : > { %274 = vmatpush.msra.mxu0 %v252_v0  ;;  %1543 = vmatpush.msra.mxu1 %v252_v0  ;;  %s1533_s7 = sshll.u32 %s2490_s6, 3  ;;  %v1894_v6 = vmov 0   ;;  %vm283_vm1 = vcmask 523264   ;;  %v1895_v11 = vmov 4   ;;  %v1896_v12 = vmov 3   ;;  %v2109_v40 = vld [vmem:[%s2473_s2] sm:$0xff] }
  0x16   : > { %s234_s10 = scalar_lea.vmem %s2471_s0, %s1533_s7  ;;  %1668 = vset.pattern.permute.xlu2 %v1892_v4  ;;  %1667 = vset.pattern.permute.xlu1 %v1893_v5  ;;  %v1897_v13 = vmov 5   ;;  %v1898_v14 = vmov 6   ;;  %v1899_v15 = vmov 11   ;;  %v1900_v16 = vmov 7   ;;  %s1828_s30 = scalar_lea.hbm %s1827_s29, 16 }
  0x17   : > { %275 = vmatpush.msra.mxu0 %v251_v1  ;;  %1544 = vmatpush.msra.mxu1 %v251_v1  ;;  %v249_v2 = vld [vmem:[%s234_s10] sm:$0xff]  ;;  %v250_v3 = vld [vmem:[%s234_s10 + $0x8] sm:$0xff]  ;;  %v1901_v17 = vmov 15   ;;  %v1902_v18 = vmov 8   ;;  %v1903_v19 = vmov 16   ;;  %v1904_v20 = vmov 13   ;;  %p1829_p12 = scmp.ne.s32.totalorder %s1827_s29, %s1828_s30 }
  0x18   : > { %1534 = vmatmul.msk.f32.vlgmr.msra.gmra.mxu0 %vm253_vm0, %v249_v2  ;;  %1535 = vmatmul.msk.f32.vlgmr.msra.gmra.mxu1 %vm253_vm0, %v250_v3  ;;  %v1905_v21 = vmov 9   ;;  %v1906_v22 = vmov 17   ;;  %v1907_v23 = vmov 14   ;;  %v1908_v24 = vmov 18   ;;  %s1832_s6 = scalar_lea.hbm %s2475_s4, 32 }
  0x19   : > { %1666 = vset.pattern.permute.xlu0 %v1894_v6  ;;  %v1909_v25 = vmov 10   ;;  %v1910_v26 = vmov 20   ;;  %v1911_v28 = vmov 19   ;;  %v1912_v30 = vmov 22   ;;  %p1830_p13 = pnand %p1829_p12, %p2023_p4  ;;  %p1834_p2 = scmp.lt.s32.totalorder %s1832_s6, %s1828_s30 }
  0x1a   : > { %v1913_v31 = vmov 12   ;;  %v1914_v33 = vmov 24   ;;  %v1915_v34 = vmov 21   ;;  %v1916_v38 = vmov 23  }
  0x1b   : > { %v322_v42 = vperm.slane %v2109_v40, 0  ;;  %v1917_v43 = vmov 25   ;;  %v337_v46 = vperm.slane %v2109_v40, 1  ;;  %v367_v49 = vperm.slane %v2109_v40, 3  ;;  %p1831_p0 = pneg %p1830_p13  ;;  %p1835_p3 = por %p1834_p2, %p1833_p1 }
  0x1c   : > { %v352_v52 = vperm.slane %v2109_v40, 2  ;;  %v382_v62 = vperm.slane %v2109_v40, 4  ;;  %v412_v63 = vperm.slane %v2109_v40, 6  ;;  %v397_v2 = vperm.slane %v2109_v40, 5 }
  0x1d   : > { %v427_v5 = vperm.slane %v2109_v40, 7  ;;  %vm440_vm3 = vcmask 261120   ;;  %vm1371_vm5 = vcmask 7168   ;;  %vm1374_vm6 = vcmask 15360   ;;  %p1836_p5 = pnand %p1835_p3, %p1831_p0 }
  0x1e   : > { %vm1377_vm7 = vcmask 23552   ;;  %vm1380_vm8 = vcmask 31744   ;;  %vm1383_vm9 = vcmask 39936   ;;  %vm1386_vm10 = vcmask 48128  }
  0x1f   : > { %vm1389_vm11 = vcmask 56320   ;;  %vm1392_vm12 = vcmask 64512  }
  0x95   : > { %v277_v7 = vpop.f32.mrf.mxu0  ;;  %v280_v8 = vpop.f32.mrf.mxu1 }
  0x96   : > { %284 = vst.msk [vmem:[#allocation2] sm:$0xff] %vm283_vm1, %v277_v7 }
  0x97   : > { %285 = vst.msk [vmem:[#allocation2 + $0x8] sm:$0xff] %vm283_vm1, %v280_v8 }
  0x9d   : > { %v2048_v9 = vld [vmem:[#allocation2] sm:$0xff] }
  0x9e   : > { %345 = vperm.xlu2 %1668, %v2048_v9   ;;  %330 = vperm.xlu1 %1667, %v2048_v9   ;;  %v2053_v10 = vld [vmem:[#allocation2 + $0x8] sm:$0xff] }
  0x9f   : > { %314 = vperm.xlu0 %1666, %v2048_v9  }
  0xa6   : > { %349 = vperm.xlu2 %1668, %v2053_v10   ;;  %334 = vperm.xlu1 %1667, %v2053_v10  }
  0xa7   : > { %319 = vperm.xlu0 %1666, %v2053_v10  }
  0xae   : > { %1671 = vset.pattern.permute.xlu2 %v1895_v11  ;;  %1670 = vset.pattern.permute.xlu1 %v1896_v12 }
  0xaf   : > { %1669 = vset.pattern.permute.xlu0 %v1896_v12  ;;  %375 = vperm.xlu2 %1671, %v2048_v9  }
  0xb0   : > { %364 = vperm.xlu1 %1670, %v2053_v10   ;;  %360 = vperm.xlu0 %1669, %v2048_v9  }
  0xb7   : > { %1673 = vset.pattern.permute.xlu2 %v1897_v13 }
  0xb8   : > { %1672 = vset.pattern.permute.xlu1 %v1895_v11  ;;  %1674 = vset.pattern.permute.xlu0 %v1897_v13 }
  0xb9   : > { %390 = vperm.xlu2 %1673, %v2048_v9   ;;  %379 = vperm.xlu1 %1672, %v2053_v10  }
  0xba   : > { %394 = vperm.xlu0 %1674, %v2053_v10  }
  0xc1   : > { %1676 = vset.pattern.permute.xlu2 %v1898_v14  ;;  %1675 = vset.pattern.permute.xlu1 %v1898_v14 }
  0xc2   : > { %1682 = vset.pattern.permute.xlu0 %v1899_v15  ;;  %409 = vperm.xlu2 %1676, %v2053_v10  }
  0xc3   : > { %405 = vperm.xlu1 %1675, %v2048_v9   ;;  %493 = vperm.xlu0 %1682, %v2048_v9  }
  0xca   : > { %1678 = vset.pattern.permute.xlu2 %v1900_v16 }
  0xcb   : > { %1677 = vset.pattern.permute.xlu1 %v1900_v16  ;;  %1690 = vset.pattern.permute.xlu0 %v1901_v17 }
  0xcc   : > { %424 = vperm.xlu2 %1678, %v2053_v10   ;;  %420 = vperm.xlu1 %1677, %v2048_v9  }
  0xcd   : > { %557 = vperm.xlu0 %1690, %v2053_v10  }
  0xd4   : > { %1679 = vset.pattern.permute.xlu2 %v1902_v18  ;;  %1683 = vset.pattern.permute.xlu1 %v1899_v15  ;;  %v298_v15 = vlaneseq }
  0xd5   : > { %1691 = vset.pattern.permute.xlu0 %v1903_v19  ;;  %448 = vperm.xlu2 %1679, %v2048_v9  }
  0xd6   : > { %497 = vperm.xlu1 %1683, %v2053_v10   ;;  %580 = vperm.xlu0 %1691, %v2048_v9  }
  0xdd   : > { %452 = vperm.xlu2 %1679, %v2053_v10  }
  0xde   : > { %1686 = vset.pattern.permute.xlu1 %v1904_v20  ;;  %584 = vperm.xlu0 %1691, %v2053_v10  }
  0xdf   : > { %527 = vperm.xlu1 %1686, %v2053_v10  }
  0xe5   : > { %1680 = vset.pattern.permute.xlu2 %v1905_v21 }
  0xe6   : > { %1692 = vset.pattern.permute.xlu0 %v1906_v22  ;;  %463 = vperm.xlu2 %1680, %v2048_v9  }
  0xe7   : > { %1688 = vset.pattern.permute.xlu1 %v1907_v23  ;;  %595 = vperm.xlu0 %1692, %v2048_v9  }
  0xe8   : > { %542 = vperm.xlu1 %1688, %v2053_v10  }
  0xee   : > { %467 = vperm.xlu2 %1680, %v2053_v10  }
  0xef   : > { %1695 = vset.pattern.permute.xlu0 %v1908_v24 }
  0xf0   : > { %1693 = vset.pattern.permute.xlu1 %v1906_v22  ;;  %614 = vperm.xlu0 %1695, %v2053_v10  }
  0xf1   : > { %599 = vperm.xlu1 %1693, %v2053_v10  }
  0xf6   : > { %1681 = vset.pattern.permute.xlu2 %v1909_v25 }
  0xf7   : > { %478 = vperm.xlu2 %1681, %v2048_v9  }
  0xf8   : > { %1698 = vset.pattern.permute.xlu0 %v1910_v26  ;;  %v2085_v27 = vpop.permute.xlu2 %345 }
  0xf9   : > { %1696 = vset.pattern.permute.xlu1 %v1911_v28  ;;  %640 = vperm.xlu0 %1698, %v2048_v9   ;;  %v353_v16 = vsub.f32 %v2085_v27, %v352_v52 }
  0xfa   : > { %625 = vperm.xlu1 %1696, %v2048_v9  }
  0xff   : > { %482 = vperm.xlu2 %1681, %v2053_v10  }
 0x100   : > { %v350_v29 = vpop.permute.xlu2 %349 }
 0x101   : > { %1703 = vset.pattern.permute.xlu0 %v1912_v30  ;;  %v354_v55 = vsub.f32 %v350_v29, %v352_v52  ;;  %v304_v29 = vshrl.u32 %v298_v15, 7 }
 0x102   : > { %1699 = vset.pattern.permute.xlu1 %v1910_v26  ;;  %674 = vperm.xlu0 %1703, %v2053_v10  }
 0x103   : > { %644 = vperm.xlu1 %1699, %v2053_v10   ;;  %v356_v61 = vand.u32 2147483647, %v354_v55 }
 0x107   : > { %1684 = vset.pattern.permute.xlu2 %v1913_v31  ;;  %v355_v31 = vand.u32 2147483647, %v353_v16 }
 0x108   : > { %508 = vperm.xlu2 %1684, %v2048_v9  }
 0x109   : > { %v2095_v32 = vpop.permute.xlu2 %375 }
 0x10a   : > { %1706 = vset.pattern.permute.xlu0 %v1914_v33  ;;  %v383_v27 = vsub.f32 %v2095_v32, %v382_v62 }
 0x10b   : > { %1701 = vset.pattern.permute.xlu1 %v1915_v34  ;;  %712 = vperm.xlu0 %1706, %v2048_v9  }
 0x10c   : > { %659 = vperm.xlu1 %1701, %v2053_v10  }
 0x110   : > { %512 = vperm.xlu2 %1684, %v2053_v10   ;;  %v331_v35 = vpop.permute.xlu1 %330 }
 0x111   : > { %v315_v36 = vpop.permute.xlu0 %314  ;;  %v338_v1 = vsub.f32 %v331_v35, %v337_v46 }
 0x112   : > { %v323_v54 = vsub.f32 %v315_v36, %v322_v42 }
 0x113   : > { %716 = vperm.xlu0 %1706, %v2053_v10   ;;  %v2102_v37 = vpop.permute.xlu2 %390 }
 0x114   : > { %1704 = vset.pattern.permute.xlu1 %v1916_v38  ;;  %v325_v60 = vand.u32 2147483647, %v323_v54 }
 0x115   : > { %685 = vperm.xlu1 %1704, %v2048_v9  }
 0x116   : > { %v327_v8 = vsub.f32 0.0, %v325_v60 }
 0x118   : > { %1685 = vset.pattern.permute.xlu2 %v1904_v20  ;;  %v335_v39 = vpop.permute.xlu1 %334 }
 0x119   : > { %523 = vperm.xlu2 %1685, %v2048_v9   ;;  %v320_v41 = vpop.permute.xlu0 %319  ;;  %v339_v48 = vsub.f32 %v335_v39, %v337_v46 }
 0x11a   : > { %v324_v44 = vsub.f32 %v320_v41, %v322_v42  ;;  %v305_v42 = vadd.s32 8, %v304_v29 }
 0x11b   : > { %1707 = vset.pattern.permute.xlu0 %v1917_v43  ;;  %v341_v56 = vand.u32 2147483647, %v339_v48  ;;  %v398_v48 = vsub.f32 %v2102_v37, %v397_v2 }
 0x11c   : > { %727 = vperm.xlu0 %1707, %v2048_v9   ;;  %v410_v45 = vpop.permute.xlu2 %409  ;;  %v326_v47 = vand.u32 2147483647, %v324_v44 }
 0x11d   : > { %1708 = vset.pattern.permute.xlu1 %v1917_v43  ;;  %v414_v12 = vsub.f32 %v410_v45, %v412_v63  ;;  %v307_v45 = vstv %s1536_s13  ;;  %v400_v32 = vand.u32 2147483647, %v398_v48 }
 0x11e   : > { %v328_v53 = vsub.f32 0.0, %v326_v47  ;;  %v385_v47 = vand.u32 2147483647, %v383_v27 }
 0x11f   : > { %v416_v25 = vand.u32 2147483647, %v414_v12 }
 0x120   : > { %v343_v59 = vsub.f32 %v328_v53, %v341_v56 }
 0x121   : > { %1687 = vset.pattern.permute.xlu2 %v1907_v23 }
 0x122   : > { %538 = vperm.xlu2 %1687, %v2048_v9   ;;  %v365_v50 = vpop.permute.xlu1 %364  ;;  %v361_v51 = vpop.permute.xlu0 %360  ;;  %v358_v4 = vsub.f32 %v343_v59, %v356_v61 }
 0x123   : > { %v369_v57 = vsub.f32 %v365_v50, %v367_v49  ;;  %v368_v18 = vsub.f32 %v361_v51, %v367_v49  ;;  %v299_v49 = vand.u32 127, %v298_v15  ;;  %v309_v50 = vadd.s32 %v307_v45, %v305_v42 }
 0x125   : > { %v371_v0 = vand.u32 2147483647, %v369_v57  ;;  %v370_v33 = vand.u32 2147483647, %v368_v18  ;;  %vm2136_vm2 = vcmp.eq.s32.totalorder %v299_v49, %v309_v50 }
 0x126   : > { %v425_v58 = vpop.permute.xlu2 %424 }
 0x127   : > { %v373_v13 = vsub.f32 %v358_v4, %v371_v0  ;;  %v429_v20 = vsub.f32 %v425_v58, %v427_v5  ;;  %v308_v0 = vadd.s32 %v307_v45, %v304_v29 }
 0x129   : > { %v431_v35 = vand.u32 2147483647, %v429_v20  ;;  %vm2147_vm4 = vcmp.eq.s32.totalorder %v299_v49, %v308_v0 }
 0x12a   : > { %1689 = vset.pattern.permute.xlu2 %v1901_v17  ;;  %v340_v17 = vand.u32 2147483647, %v338_v1 }
 0x12b   : > { %553 = vperm.xlu2 %1689, %v2048_v9   ;;  %v380_v3 = vpop.permute.xlu1 %379 }
 0x12c   : > { %v384_v6 = vsub.f32 %v380_v3, %v382_v62  ;;  %v395_v7 = vpop.permute.xlu0 %394  ;;  %v342_v23 = vsub.f32 %v327_v8, %v340_v17  ;;  %v1918_v62 = vmov 26  }
 0x12d   : > { %v399_v11 = vsub.f32 %v395_v7, %v397_v2  ;;  %1709 = vset.pattern.permute.xlu0 %v1918_v62  ;;  %v2160_v7 = vld [vmem:[%s2473_s2 + $0x8] sm:$0xff] }
 0x12e   : > { %v386_v14 = vand.u32 2147483647, %v384_v6  ;;  %v357_v39 = vsub.f32 %v342_v23, %v355_v31  ;;  %v455_v8 = vperm.slane %v2160_v7, 0  ;;  %v470_v12 = vperm.slane %v2160_v7, 1 }
 0x12f   : > { %v2125_v19 = vpop.permute.xlu2 %448  ;;  %v401_v22 = vand.u32 2147483647, %v399_v11  ;;  %v530_v29 = vperm.slane %v2160_v7, 5 }
 0x130   : > { %v388_v21 = vsub.f32 %v373_v13, %v386_v14  ;;  %v372_v43 = vsub.f32 %v357_v39, %v370_v33  ;;  %v485_v14 = vperm.slane %v2160_v7, 2  ;;  %v545_v33 = vperm.slane %v2160_v7, 6 }
 0x131   : > { %v560_v39 = vperm.slane %v2160_v7, 7 }
 0x132   : > { %v403_v26 = vsub.f32 %v388_v21, %v401_v22  ;;  %v387_v51 = vsub.f32 %v372_v43, %v385_v47  ;;  %v500_v21 = vperm.slane %v2160_v7, 3 }
 0x133   : > { %1694 = vset.pattern.permute.xlu2 %v1908_v24 }
 0x134   : > { %v418_v36 = vsub.f32 %v403_v26, %v416_v25  ;;  %610 = vperm.xlu2 %1694, %v2048_v9   ;;  %v402_v55 = vsub.f32 %v387_v51, %v400_v32  ;;  %v456_v32 = vsub.f32 %v2125_v19, %v455_v8 }
 0x135   : > { %v406_v40 = vpop.permute.xlu1 %405  ;;  %v494_v17 = vpop.permute.xlu0 %493 }
 0x136   : > { %v433_v41 = vsub.f32 %v418_v36, %v431_v35  ;;  %v413_v24 = vsub.f32 %v406_v40, %v412_v63  ;;  %v515_v35 = vperm.slane %v2160_v7, 4  ;;  %v501_v19 = vsub.f32 %v494_v17, %v500_v21 }
 0x137   : > { %v453_v44 = vpop.permute.xlu2 %452 }
 0x138   : > { %v436_v46 = vmul.f32 1.442695, %v433_v41  ;;  %v415_v52 = vand.u32 2147483647, %v413_v24  ;;  %v457_v11 = vsub.f32 %v453_v44, %v455_v8  ;;  %v1919_v44 = vmov 27  }
 0x13a   : > { %1778 = vpow2.f32 %v436_v46  ;;  %v417_v58 = vsub.f32 %v402_v55, %v415_v52  ;;  %v459_v16 = vand.u32 2147483647, %v457_v11 }
 0x13c   : > { %1697 = vset.pattern.permute.xlu2 %v1911_v28  ;;  %v461_v22 = vsub.f32 0.0, %v459_v16 }
 0x13d   : > { %629 = vperm.xlu2 %1697, %v2053_v10  }
 0x13e   : > { %v421_v53 = vpop.permute.xlu1 %420 }
 0x13f   : > { %v428_v56 = vsub.f32 %v421_v53, %v427_v5  ;;  %v558_v43 = vpop.permute.xlu0 %557 }
 0x140   : > { %v1779_v37 = vpop.eup %1778  ;;  %v2140_v57 = vpop.permute.xlu2 %463  ;;  %v562_v48 = vsub.f32 %v558_v43, %v560_v39 }
 0x141   : > { %v430_v59 = vand.u32 2147483647, %v428_v56  ;;  %v439_v28 = vsel %vm2136_vm2, 0.0, %v1779_v37  ;;  %v471_v56 = vsub.f32 %v2140_v57, %v470_v12  ;;  %v1920_v37 = vmov 29  }
 0x142   : > { %v444_v60 = vsel %vm440_vm3, %v439_v28, 0.0  ;;  %v564_v52 = vand.u32 2147483647, %v562_v48 }
 0x143   : > { %v432_v61 = vsub.f32 %v417_v58, %v430_v59  ;;  %445 = vadd.xlane.f32.xlu1 %v444_v60  ;;  %v458_v59 = vand.u32 2147483647, %v456_v32 }
 0x145   : > { %v434_v63 = vmul.f32 1.442695, %v432_v61  ;;  %1700 = vset.pattern.permute.xlu2 %v1915_v34  ;;  %v473_v61 = vand.u32 2147483647, %v471_v56 }
 0x146   : > { %655 = vperm.xlu2 %1700, %v2048_v9  }
 0x147   : > { %1780 = vpow2.f32 %v434_v63  ;;  %v460_v63 = vsub.f32 0.0, %v458_v59 }
 0x148   : > { %v468_v1 = vpop.permute.xlu2 %467  ;;  %v498_v6 = vpop.permute.xlu1 %497 }
 0x149   : > { %v472_v13 = vsub.f32 %v468_v1, %v470_v12  ;;  %v502_v25 = vsub.f32 %v498_v6, %v500_v21  ;;  %v475_v1 = vsub.f32 %v460_v63, %v473_v61  ;;  %v1921_v6 = vmov 31  }
 0x14b   : > { %v474_v20 = vand.u32 2147483647, %v472_v13  ;;  %v504_v40 = vand.u32 2147483647, %v502_v25 }
 0x14d   : > { %v1781_v3 = vpop.eup %1780  ;;  %v476_v26 = vsub.f32 %v461_v22, %v474_v20  ;;  %v1922_v22 = vmov 32  }
 0x14e   : > { %1702 = vset.pattern.permute.xlu2 %v1912_v30  ;;  %v438_v4 = vsel %vm2147_vm4, 0.0, %v1781_v3 }
 0x14f   : > { %670 = vperm.xlu2 %1702, %v2048_v9   ;;  %v441_v5 = vsel %vm440_vm3, %v438_v4, 0.0 }
 0x150   : > { %442 = vadd.xlane.f32.xlu0 %v441_v5 }
 0x151   : > { %v479_v34 = vpop.permute.xlu2 %478  ;;  %v528_v15 = vpop.permute.xlu1 %527 }
 0x152   : > { %v532_v41 = vsub.f32 %v528_v15, %v530_v29  ;;  %v486_v28 = vsub.f32 %v479_v34, %v485_v14  ;;  %v503_v34 = vand.u32 2147483647, %v501_v19 }
 0x154   : > { %v534_v24 = vand.u32 2147483647, %v532_v41  ;;  %v488_v0 = vand.u32 2147483647, %v486_v28 }
 0x156   : > { %v490_v5 = vsub.f32 %v475_v1, %v488_v0 }
 0x157   : > { %1705 = vset.pattern.permute.xlu2 %v1916_v38 }
 0x158   : > { %689 = vperm.xlu2 %1705, %v2053_v10  }
 0x159   : > { %v483_v30 = vpop.permute.xlu2 %482 }
 0x15a   : > { %v487_v38 = vsub.f32 %v483_v30, %v485_v14  ;;  %v543_v36 = vpop.permute.xlu1 %542  ;;  %v505_v14 = vsub.f32 %v490_v5, %v503_v34  ;;  %v1924_v5 = vmov 34  }
 0x15b   : > { %v547_v45 = vsub.f32 %v543_v36, %v545_v33  ;;  %v2187_v36 = vld [vmem:[%s2473_s2 + $0x10] sm:$0xff] }
 0x15c   : > { %v489_v23 = vand.u32 2147483647, %v487_v38  ;;  %v602_v41 = vperm.slane %v2187_v36, 1 }
 0x15d   : > { %v549_v50 = vand.u32 2147483647, %v547_v45 }
 0x15e   : > { %v491_v31 = vsub.f32 %v476_v26, %v489_v23 }
 0x160   : > { %1710 = vset.pattern.permute.xlu2 %v1918_v62  ;;  %v506_v46 = vsub.f32 %v491_v31, %v504_v40  ;;  %v581_v62 = vpop.permute.xlu0 %580 }
 0x162   : > { %v509_v18 = vpop.permute.xlu2 %508 }
 0x163   : > { %v516_v3 = vsub.f32 %v509_v18, %v515_v35  ;;  %v600_v30 = vpop.permute.xlu1 %599 }
 0x164   : > { %742 = vperm.xlu0 %1709, %v2048_v9  }
 0x165   : > { %v518_v8 = vand.u32 2147483647, %v516_v3 }
 0x167   : > { %v520_v38 = vsub.f32 %v505_v14, %v518_v8  ;;  %v692_v14 = vperm.slane %v2187_v36, 7 }
 0x168   : > { %v585_v16 = vpop.permute.xlu0 %584 }
 0x16a   : > { %v513_v27 = vpop.permute.xlu2 %512 }
 0x16b   : > { %v517_v42 = vsub.f32 %v513_v27, %v515_v35  ;;  %v587_v27 = vperm.slane %v2187_v36, 0 }
 0x16c   : > { %1711 = vset.pattern.permute.xlu0 %v1919_v44  ;;  %v626_v26 = vpop.permute.xlu1 %625 }
 0x16d   : > { %v519_v47 = vand.u32 2147483647, %v517_v42  ;;  %757 = vperm.xlu0 %1711, %v2048_v9   ;;  %v588_v43 = vsub.f32 %v581_v62, %v587_v27  ;;  %v647_v62 = vperm.slane %v2187_v36, 4 }
 0x16f   : > { %v521_v49 = vsub.f32 %v506_v46, %v519_v47 }
 0x171   : > { %v536_v51 = vsub.f32 %v521_v49, %v534_v24  ;;  %v617_v24 = vperm.slane %v2187_v36, 2  ;;  %v1923_v49 = vmov 33  }
 0x173   : > { %v551_v53 = vsub.f32 %v536_v51, %v549_v50  ;;  %v524_v55 = vpop.permute.xlu2 %523  ;;  %v589_v50 = vsub.f32 %v585_v16, %v587_v27  ;;  %v590_v51 = vand.u32 2147483647, %v588_v43 }
 0x174   : > { %v531_v57 = vsub.f32 %v524_v55, %v530_v29  ;;  %v632_v55 = vperm.slane %v2187_v36, 3 }
 0x175   : > { %1715 = vset.pattern.permute.xlu0 %v1920_v37  ;;  %v566_v58 = vsub.f32 %v551_v53, %v564_v52  ;;  %v604_v52 = vsub.f32 %v600_v30, %v602_v41  ;;  %v591_v56 = vand.u32 2147483647, %v589_v50  ;;  %v592_v59 = vsub.f32 0.0, %v590_v51 }
 0x176   : > { %787 = vperm.xlu0 %1715, %v2048_v9   ;;  %v533_v15 = vand.u32 2147483647, %v531_v57  ;;  %v633_v63 = vsub.f32 %v626_v26, %v632_v55  ;;  %v662_v57 = vperm.slane %v2187_v36, 5 }
 0x177   : > { %v569_v60 = vmul.f32 1.442695, %v566_v58  ;;  %v593_v19 = vsub.f32 0.0, %v591_v56 }
 0x178   : > { %v535_v20 = vsub.f32 %v520_v38, %v533_v15  ;;  %v635_v8 = vand.u32 2147483647, %v633_v63  ;;  %v1927_v63 = vmov 28  }
 0x179   : > { %1782 = vpow2.f32 %v569_v60  ;;  %v606_v60 = vand.u32 2147483647, %v604_v52 }
 0x17b   : > { %v608_v30 = vsub.f32 %v593_v19, %v606_v60  ;;  %v1928_v19 = vmov 30  }
 0x17c   : > { %v539_v4 = vpop.permute.xlu2 %538 }
 0x17d   : > { %v546_v11 = vsub.f32 %v539_v4, %v545_v33  ;;  %v596_v33 = vpop.permute.xlu0 %595 }
 0x17e   : > { %1720 = vset.pattern.permute.xlu0 %v1921_v6  ;;  %v603_v48 = vsub.f32 %v596_v33, %v602_v41 }
 0x17f   : > { %v1783_v7 = vpop.eup %1782  ;;  %821 = vperm.xlu0 %1720, %v2053_v10   ;;  %v548_v17 = vand.u32 2147483647, %v546_v11 }
 0x180   : > { %v572_v12 = vsel %vm2136_vm2, 0.0, %v1783_v7  ;;  %v605_v53 = vand.u32 2147483647, %v603_v48 }
 0x181   : > { %v576_v13 = vsel %vm440_vm3, %v572_v12, 0.0  ;;  %v550_v23 = vsub.f32 %v535_v20, %v548_v17  ;;  %v677_v20 = vperm.slane %v2187_v36, 6 }
 0x182   : > { %577 = vadd.xlane.f32.xlu2 %v576_v13  ;;  %v607_v61 = vsub.f32 %v592_v59, %v605_v53 }
 0x185   : > { %v554_v18 = vpop.permute.xlu2 %553  ;;  %v615_v46 = vpop.permute.xlu0 %614 }
 0x186   : > { %v561_v21 = vsub.f32 %v554_v18, %v560_v39  ;;  %v645_v39 = vpop.permute.xlu1 %644  ;;  %v619_v1 = vsub.f32 %v615_v46, %v617_v24 }
 0x187   : > { %1721 = vset.pattern.permute.xlu0 %v1922_v22  ;;  %v649_v16 = vsub.f32 %v645_v39, %v647_v62 }
 0x188   : > { %v563_v25 = vand.u32 2147483647, %v561_v21  ;;  %844 = vperm.xlu0 %1721, %v2048_v9   ;;  %v621_v12 = vand.u32 2147483647, %v619_v1 }
 0x189   : > { %v651_v33 = vand.u32 2147483647, %v649_v16 }
 0x18a   : > { %v565_v29 = vsub.f32 %v550_v23, %v563_v25  ;;  %v623_v17 = vsub.f32 %v608_v30, %v621_v12 }
 0x18c   : > { %v567_v31 = vmul.f32 1.442695, %v565_v29 }
 0x18d   : > { %v641_v3 = vpop.permute.xlu0 %640 }
 0x18e   : > { %1784 = vpow2.f32 %v567_v31  ;;  %v611_v35 = vpop.permute.xlu2 %610  ;;  %v660_v58 = vpop.permute.xlu1 %659  ;;  %v648_v34 = vsub.f32 %v641_v3, %v647_v62  ;;  %v1925_v31 = vmov 35  }
 0x18f   : > { %v618_v32 = vsub.f32 %v611_v35, %v617_v24  ;;  %v664_v35 = vsub.f32 %v660_v58, %v662_v57 }
 0x190   : > { %848 = vperm.xlu0 %1721, %v2053_v10   ;;  %v650_v18 = vand.u32 2147483647, %v648_v34 }
 0x191   : > { %v620_v28 = vand.u32 2147483647, %v618_v32  ;;  %v1926_v32 = vmov 38  }
 0x193   : > { %v622_v7 = vsub.f32 %v607_v61, %v620_v28 }
 0x194   : > { %v1785_v40 = vpop.eup %1784 }
 0x195   : > { %v571_v42 = vsel %vm2147_vm4, 0.0, %v1785_v40  ;;  %v637_v15 = vsub.f32 %v622_v7, %v635_v8  ;;  %v675_v27 = vpop.permute.xlu0 %674 }
 0x196   : > { %v573_v45 = vsel %vm440_vm3, %v571_v42, 0.0  ;;  %v686_v38 = vpop.permute.xlu1 %685  ;;  %v679_v36 = vsub.f32 %v675_v27, %v677_v20 }
 0x197   : > { %v630_v47 = vpop.permute.xlu2 %629  ;;  %574 = vadd.xlane.f32.xlu1 %v573_v45  ;;  %v693_v25 = vsub.f32 %v686_v38, %v692_v14  ;;  %v652_v26 = vsub.f32 %v637_v15, %v650_v18  ;;  %v666_v45 = vand.u32 2147483647, %v664_v35 }
 0x198   : > { %1722 = vset.pattern.permute.xlu0 %v1923_v49  ;;  %v634_v4 = vsub.f32 %v630_v47, %v632_v55  ;;  %v681_v50 = vand.u32 2147483647, %v679_v36 }
 0x199   : > { %859 = vperm.xlu0 %1722, %v2048_v9   ;;  %v695_v42 = vand.u32 2147483647, %v693_v25 }
 0x19a   : > { %v636_v13 = vand.u32 2147483647, %v634_v4 }
 0x19c   : > { %v638_v22 = vsub.f32 %v623_v17, %v636_v13 }
 0x19e   : > { %v653_v41 = vsub.f32 %v638_v22, %v651_v33 }
 0x1a0   : > { %v656_v0 = vpop.permute.xlu2 %655  ;;  %v668_v47 = vsub.f32 %v653_v41, %v666_v45 }
 0x1a1   : > { %1725 = vset.pattern.permute.xlu0 %v1924_v5  ;;  %v663_v11 = vsub.f32 %v656_v0, %v662_v57  ;;  %v713_v0 = vpop.permute.xlu0 %712 }
 0x1a2   : > { %878 = vperm.xlu0 %1725, %v2053_v10   ;;  %v683_v52 = vsub.f32 %v668_v47, %v681_v50 }
 0x1a3   : > { %v665_v21 = vand.u32 2147483647, %v663_v11 }
 0x1a5   : > { %v667_v39 = vsub.f32 %v652_v26, %v665_v21 }
 0x1a9   : > { %v671_v23 = vpop.permute.xlu2 %670 }
 0x1aa   : > { %v678_v29 = vsub.f32 %v671_v23, %v677_v20  ;;  %1727 = vset.pattern.permute.xlu0 %v1925_v31 }
 0x1ab   : > { %893 = vperm.xlu0 %1727, %v2053_v10  }
 0x1ac   : > { %v680_v40 = vand.u32 2147483647, %v678_v29 }
 0x1ae   : > { %v682_v43 = vsub.f32 %v667_v39, %v680_v40 }
 0x1b0   : > { %v697_v46 = vsub.f32 %v682_v43, %v695_v42 }
 0x1b2   : > { %v699_v48 = vmul.f32 1.442695, %v697_v46  ;;  %v690_v24 = vpop.permute.xlu2 %689 }
 0x1b3   : > { %v694_v51 = vsub.f32 %v690_v24, %v692_v14  ;;  %1732 = vset.pattern.permute.xlu0 %v1926_v32 }
 0x1b4   : > { %1786 = vpow2.f32 %v699_v48  ;;  %934 = vperm.xlu0 %1732, %v2048_v9  }
 0x1b5   : > { %v696_v53 = vand.u32 2147483647, %v694_v51 }
 0x1b6   : > { %v446_v3 = vpop.xlane.xlu1 %445 }
 0x1b7   : > { %v698_v55 = vsub.f32 %v683_v52, %v696_v53 }
 0x1b9   : > { %v701_v56 = vmul.f32 1.442695, %v698_v55 }
 0x1ba   : > { %v1787_v58 = vpop.eup %1786 }
 0x1bb   : > { %1788 = vpow2.f32 %v701_v56  ;;  %v703_v59 = vsel %vm2147_vm4, 0.0, %v1787_v58 }
 0x1bc   : > { %v705_v28 = vsel %vm440_vm3, %v703_v59, 0.0 }
 0x1bd   : > { %706 = vadd.xlane.f32.xlu1 %v705_v28 }
 0x1c1   : > { %v1789_v60 = vpop.eup %1788 }
 0x1c2   : > { %v704_v61 = vsel %vm2136_vm2, 0.0, %v1789_v60 }
 0x1c3   : > { %v708_v62 = vsel %vm440_vm3, %v704_v61, 0.0 }
 0x1c4   : > { %709 = vadd.xlane.f32.xlu2 %v708_v62 }
 0x1d6   : > { %731 = vperm.xlu1 %1708, %v2053_v10  }
 0x1dc   : > { %746 = vperm.xlu2 %1710, %v2053_v10  }
 0x1de   : > { %1712 = vset.pattern.permute.xlu1 %v1919_v44  ;;  %v717_v44 = vpop.permute.xlu0 %716 }
 0x1df   : > { %761 = vperm.xlu1 %1712, %v2053_v10  }
 0x1e4   : > { %1713 = vset.pattern.permute.xlu2 %v1927_v63 }
 0x1e5   : > { %772 = vperm.xlu2 %1713, %v2048_v9  }
 0x1e6   : > { %v728_v1 = vpop.permute.xlu0 %727 }
 0x1e7   : > { %1714 = vset.pattern.permute.xlu1 %v1927_v63 }
 0x1e8   : > { %776 = vperm.xlu1 %1714, %v2053_v10  }
 0x1ed   : > { %1716 = vset.pattern.permute.xlu2 %v1920_v37 }
 0x1ee   : > { %791 = vperm.xlu2 %1716, %v2053_v10   ;;  %v443_v37 = vpop.xlane.xlu0 %442 }
 0x1f0   : > { %1717 = vset.pattern.permute.xlu1 %v1928_v19 }
 0x1f1   : > { %802 = vperm.xlu1 %1717, %v2048_v9  }
 0x1f5   : > { %v578_v7 = vpop.xlane.xlu2 %577 }
 0x1f6   : > { %1718 = vset.pattern.permute.xlu2 %v1928_v19 }
 0x1f7   : > { %806 = vperm.xlu2 %1718, %v2053_v10   ;;  %v1373_v10 = vsel %vm1371_vm5, %v446_v3, %v578_v7 }
 0x1f9   : > { %1719 = vset.pattern.permute.xlu1 %v1921_v6 }
 0x1fa   : > { %817 = vperm.xlu1 %1719, %v2048_v9   ;;  %v743_v9 = vpop.permute.xlu0 %742 }
 0x1ff   : > { %1723 = vset.pattern.permute.xlu2 %v1923_v49 }
 0x202   : > { %1724 = vset.pattern.permute.xlu1 %v1924_v5  ;;  %v2236_v5 = vld [vmem:[%s2473_s2 + $0x18] sm:$0xff]  ;;  %v758_v12 = vpop.permute.xlu0 %757 }
 0x203   : > { %v719_v14 = vperm.slane %v2236_v5, 0  ;;  %v734_v16 = vperm.slane %v2236_v5, 1  ;;  %v749_v22 = vperm.slane %v2236_v5, 2  ;;  %v764_v23 = vperm.slane %v2236_v5, 3 }
 0x204   : > { %v794_v39 = vperm.slane %v2236_v5, 5  ;;  %v779_v41 = vperm.slane %v2236_v5, 4  ;;  %v809_v43 = vperm.slane %v2236_v5, 6  ;;  %v824_v47 = vperm.slane %v2236_v5, 7 }
 0x205   : > { %v721_v15 = vsub.f32 %v717_v44, %v719_v14  ;;  %v720_v27 = vsub.f32 %v713_v0, %v719_v14  ;;  %v735_v36 = vsub.f32 %v728_v1, %v734_v16  ;;  %v750_v53 = vsub.f32 %v743_v9, %v749_v22 }
 0x206   : > { %v765_v28 = vsub.f32 %v758_v12, %v764_v23 }
 0x207   : > { %v723_v18 = vand.u32 2147483647, %v721_v15  ;;  %v722_v51 = vand.u32 2147483647, %v720_v27  ;;  %v737_v59 = vand.u32 2147483647, %v735_v36 }
 0x208   : > { %v752_v0 = vand.u32 2147483647, %v750_v53  ;;  %v1929_v27 = vmov 36   ;;  %v1935_v36 = vmov 41   ;;  %v2283_v53 = vld [vmem:[%s2473_s2 + $0x20] sm:$0xff] }
 0x209   : > { %v725_v26 = vsub.f32 0.0, %v723_v18  ;;  %v724_v63 = vsub.f32 0.0, %v722_v51 }
 0x20a   : > { %v575_v4 = vpop.xlane.xlu1 %574  ;;  %v788_v21 = vpop.permute.xlu0 %787 }
 0x20b   : > { %v1372_v57 = vsel %vm1371_vm5, %v443_v37, %v575_v4  ;;  %v739_v3 = vsub.f32 %v724_v63, %v737_v59  ;;  %v767_v37 = vand.u32 2147483647, %v765_v28 }
 0x212   : > { %v822_v52 = vpop.permute.xlu0 %821 }
 0x213   : > { %v826_v60 = vsub.f32 %v822_v52, %v824_v47 }
 0x215   : > { %v828_v4 = vand.u32 2147483647, %v826_v60 }
 0x230   : > { %v707_v30 = vpop.xlane.xlu1 %706 }
 0x231   : > { %v2229_v34 = vsel %vm1374_vm6, %v1372_v57, %v707_v30  ;;  %v754_v30 = vsub.f32 %v739_v3, %v752_v0  ;;  %v896_v0 = vperm.slane %v2283_v53, 3 }
 0x233   : > { %v769_v9 = vsub.f32 %v754_v30, %v767_v37  ;;  %v911_v37 = vperm.slane %v2283_v53, 4 }
 0x237   : > { %v710_v8 = vpop.xlane.xlu2 %709 }
 0x238   : > { %v2231_v6 = vsel %vm1374_vm6, %v1373_v10, %v710_v8 }
 0x23f   : > { %v747_v11 = vpop.permute.xlu2 %746 }
 0x240   : > { %v751_v29 = vsub.f32 %v747_v11, %v749_v22  ;;  %v795_v11 = vsub.f32 %v788_v21, %v794_v39 }
 0x242   : > { %v753_v40 = vand.u32 2147483647, %v751_v29  ;;  %v797_v14 = vand.u32 2147483647, %v795_v11 }
 0x247   : > { %v773_v49 = vpop.permute.xlu2 %772 }
 0x248   : > { %v732_v13 = vpop.permute.xlu1 %731  ;;  %v780_v19 = vsub.f32 %v773_v49, %v779_v41 }
 0x249   : > { %v736_v38 = vsub.f32 %v732_v13, %v734_v16 }
 0x24a   : > { %v782_v10 = vand.u32 2147483647, %v780_v19 }
 0x24b   : > { %v738_v25 = vand.u32 2147483647, %v736_v38 }
 0x24c   : > { %v784_v13 = vsub.f32 %v769_v9, %v782_v10 }
 0x24d   : > { %v740_v35 = vsub.f32 %v725_v26, %v738_v25 }
 0x24e   : > { %v799_v49 = vsub.f32 %v784_v13, %v797_v14  ;;  %v1937_v13 = vmov 45   ;;  %v941_v14 = vperm.slane %v2283_v53, 6 }
 0x24f   : > { %v792_v17 = vpop.permute.xlu2 %791  ;;  %v755_v24 = vsub.f32 %v740_v35, %v753_v40  ;;  %v2252_v35 = vld [vmem:[#allocation2] sm:$0xff]  ;;  %v1930_v40 = vmov 37  }
 0x250   : > { %v796_v48 = vsub.f32 %v792_v17, %v794_v39  ;;  %v2255_v39 = vld [vmem:[#allocation2 + $0x8] sm:$0xff] }
 0x251   : > { %v762_v20 = vpop.permute.xlu1 %761 }
 0x252   : > { %v766_v33 = vsub.f32 %v762_v20, %v764_v23  ;;  %v798_v61 = vand.u32 2147483647, %v796_v48 }
 0x254   : > { %v768_v42 = vand.u32 2147483647, %v766_v33 }
 0x256   : > { %v770_v55 = vsub.f32 %v755_v24, %v768_v42  ;;  %v1933_v42 = vmov 40  }
 0x257   : > { %v807_v45 = vpop.permute.xlu2 %806 }
 0x258   : > { %v811_v56 = vsub.f32 %v807_v45, %v809_v43 }
 0x25a   : > { %v777_v46 = vpop.permute.xlu1 %776  ;;  %v813_v44 = vand.u32 2147483647, %v811_v56  ;;  %v851_v56 = vperm.slane %v2283_v53, 0 }
 0x25b   : > { %v781_v50 = vsub.f32 %v777_v46, %v779_v41  ;;  %v1931_v41 = vmov 39  }
 0x25d   : > { %v783_v58 = vand.u32 2147483647, %v781_v50 }
 0x25f   : > { %v785_v62 = vsub.f32 %v770_v55, %v783_v58  ;;  %v1936_v55 = vmov 44   ;;  %v866_v58 = vperm.slane %v2283_v53, 1 }
 0x261   : > { %v800_v1 = vsub.f32 %v785_v62, %v798_v61  ;;  %v881_v61 = vperm.slane %v2283_v53, 2 }
 0x263   : > { %v815_v57 = vsub.f32 %v800_v1, %v813_v44  ;;  %v803_v7 = vpop.permute.xlu1 %802 }
 0x264   : > { %v810_v5 = vsub.f32 %v803_v7, %v809_v43  ;;  %v1934_v43 = vmov 43  }
 0x265   : > { %v830_v8 = vsub.f32 %v815_v57, %v828_v4  ;;  %1741 = vset.pattern.permute.xlu0 %v1934_v43 }
 0x266   : > { %v812_v15 = vand.u32 2147483647, %v810_v5 }
 0x267   : > { %v833_v12 = vmul.f32 1.442695, %v830_v8 }
 0x268   : > { %v814_v18 = vsub.f32 %v799_v49, %v812_v15 }
 0x269   : > { %1790 = vpow2.f32 %v833_v12  ;;  %v926_v12 = vperm.slane %v2283_v53, 5 }
 0x26c   : > { %v818_v16 = vpop.permute.xlu1 %817 }
 0x26d   : > { %v825_v38 = vsub.f32 %v818_v16, %v824_v47 }
 0x26f   : > { %v1791_v17 = vpop.eup %1790  ;;  %v827_v20 = vand.u32 2147483647, %v825_v38 }
 0x270   : > { %v836_v22 = vsel %vm2136_vm2, 0.0, %v1791_v17 }
 0x271   : > { %v829_v23 = vsub.f32 %v814_v18, %v827_v20  ;;  %v840_v25 = vsel %vm440_vm3, %v836_v22, 0.0 }
 0x272   : > { %841 = vadd.xlane.f32.xlu1 %v840_v25 }
 0x273   : > { %v831_v21 = vmul.f32 1.442695, %v829_v23 }
 0x275   : > { %1792 = vpow2.f32 %v831_v21 }
 0x27b   : > { %v1793_v26 = vpop.eup %1792 }
 0x27c   : > { %v835_v29 = vsel %vm2147_vm4, 0.0, %v1793_v26 }
 0x27d   : > { %v837_v33 = vsel %vm440_vm3, %v835_v29, 0.0  ;;  %v956_v29 = vperm.slane %v2283_v53, 7 }
 0x27e   : > { %838 = vadd.xlane.f32.xlu2 %v837_v33 }
 0x28b   : > { %874 = vperm.xlu1 %1724, %v2252_v35  }
 0x293   : > { %1729 = vset.pattern.permute.xlu1 %v1929_v27 }
 0x294   : > { %908 = vperm.xlu1 %1729, %v2255_v39  }
 0x296   : > { %863 = vperm.xlu2 %1723, %v2255_v39  }
 0x29c   : > { %1731 = vset.pattern.permute.xlu1 %v1930_v40 }
 0x29d   : > { %923 = vperm.xlu1 %1731, %v2255_v39  }
 0x29e   : > { %1726 = vset.pattern.permute.xlu2 %v1925_v31  ;;  %v1932_v31 = vmov 42  }
 0x29f   : > { %889 = vperm.xlu2 %1726, %v2252_v35  }
 0x2a5   : > { %1734 = vset.pattern.permute.xlu1 %v1931_v41 }
 0x2a6   : > { %949 = vperm.xlu1 %1734, %v2252_v35  }
 0x2a7   : > { %1728 = vset.pattern.permute.xlu2 %v1929_v27 }
 0x2a8   : > { %904 = vperm.xlu2 %1728, %v2252_v35  }
 0x2ae   : > { %1739 = vset.pattern.permute.xlu1 %v1932_v31 }
 0x2b0   : > { %1730 = vset.pattern.permute.xlu2 %v1930_v40 }
 0x2b1   : > { %919 = vperm.xlu2 %1730, %v2252_v35  }
 0x2b9   : > { %1733 = vset.pattern.permute.xlu2 %v1926_v32  ;;  %v845_v32 = vpop.permute.xlu0 %844 }
 0x2ba   : > { %938 = vperm.xlu2 %1733, %v2255_v39   ;;  %v852_v59 = vsub.f32 %v845_v32, %v851_v56  ;;  %v1938_v32 = vmov 46  }
 0x2bc   : > { %v854_v63 = vand.u32 2147483647, %v852_v59 }
 0x2be   : > { %v856_v57 = vsub.f32 0.0, %v854_v63  ;;  %v1939_v63 = vmov 47  }
 0x2c1   : > { %v849_v47 = vpop.permute.xlu0 %848 }
 0x2c2   : > { %1735 = vset.pattern.permute.xlu2 %v1931_v41  ;;  %v853_v4 = vsub.f32 %v849_v47, %v851_v56 }
 0x2c3   : > { %953 = vperm.xlu2 %1735, %v2255_v39  }
 0x2c4   : > { %v855_v5 = vand.u32 2147483647, %v853_v4 }
 0x2c6   : > { %v857_v22 = vsub.f32 0.0, %v855_v5 }
 0x2c9   : > { %v860_v50 = vpop.permute.xlu0 %859 }
 0x2ca   : > { %v867_v60 = vsub.f32 %v860_v50, %v866_v58 }
 0x2cb   : > { %1736 = vset.pattern.permute.xlu2 %v1933_v42 }
 0x2cc   : > { %976 = vperm.xlu2 %1736, %v2252_v35   ;;  %v869_v1 = vand.u32 2147483647, %v867_v60 }
 0x2ce   : > { %v871_v8 = vsub.f32 %v856_v57, %v869_v1 }
 0x2d4   : > { %980 = vperm.xlu2 %1736, %v2255_v39  }
 0x2dc   : > { %1737 = vset.pattern.permute.xlu2 %v1935_v36 }
 0x2dd   : > { %991 = vperm.xlu2 %1737, %v2252_v35  }
 0x2e5   : > { %995 = vperm.xlu2 %1737, %v2255_v39   ;;  %v842_v45 = vpop.xlane.xlu1 %841 }
 0x2e6   : > { %v2273_v46 = vsel %vm1377_vm7, %v2231_v6, %v842_v45  ;;  %v879_v6 = vpop.permute.xlu0 %878 }
 0x2e7   : > { %v883_v23 = vsub.f32 %v879_v6, %v881_v61 }
 0x2e9   : > { %v885_v40 = vand.u32 2147483647, %v883_v23  ;;  %v1943_v23 = vmov 51  }
 0x2ed   : > { %1738 = vset.pattern.permute.xlu2 %v1932_v31 }
 0x2ee   : > { %1006 = vperm.xlu2 %1738, %v2252_v35   ;;  %v894_v62 = vpop.permute.xlu0 %893 }
 0x2ef   : > { %v898_v41 = vsub.f32 %v894_v62, %v896_v0 }
 0x2f1   : > { %v839_v48 = vpop.xlane.xlu2 %838 }
 0x2f2   : > { %v2277_v24 = vsel %vm1377_vm7, %v2229_v34, %v839_v48 }
 0x2f6   : > { %1740 = vset.pattern.permute.xlu2 %v1934_v43  ;;  %v935_v38 = vpop.permute.xlu0 %934 }
 0x2f7   : > { %1021 = vperm.xlu2 %1740, %v2252_v35   ;;  %v942_v21 = vsub.f32 %v935_v38, %v941_v14 }
 0x2f9   : > { %v864_v51 = vpop.permute.xlu2 %863  ;;  %v944_v43 = vand.u32 2147483647, %v942_v21 }
 0x2fa   : > { %v868_v10 = vsub.f32 %v864_v51, %v866_v58 }
 0x2fc   : > { %v870_v17 = vand.u32 2147483647, %v868_v10 }
 0x2fd   : > { %v875_v52 = vpop.permute.xlu1 %874 }
 0x2fe   : > { %v882_v19 = vsub.f32 %v875_v52, %v881_v61  ;;  %v872_v33 = vsub.f32 %v857_v22, %v870_v17  ;;  %v900_v52 = vand.u32 2147483647, %v898_v41  ;;  %v1942_v22 = vmov 50  }
 0x2ff   : > { %1742 = vset.pattern.permute.xlu2 %v1936_v55 }
 0x300   : > { %1036 = vperm.xlu2 %1742, %v2252_v35   ;;  %v884_v7 = vand.u32 2147483647, %v882_v19  ;;  %v887_v47 = vsub.f32 %v872_v33, %v885_v40 }
 0x301   : > { %v890_v34 = vpop.permute.xlu2 %889 }
 0x302   : > { %v897_v3 = vsub.f32 %v890_v34, %v896_v0  ;;  %v886_v15 = vsub.f32 %v871_v8, %v884_v7  ;;  %v902_v56 = vsub.f32 %v887_v47, %v900_v52  ;;  %v1940_v7 = vmov 48  }
 0x304   : > { %v899_v9 = vand.u32 2147483647, %v897_v3 }
 0x306   : > { %v909_v28 = vpop.permute.xlu1 %908  ;;  %v901_v20 = vsub.f32 %v886_v15, %v899_v9 }
 0x307   : > { %v913_v31 = vsub.f32 %v909_v28, %v911_v37 }
 0x308   : > { %1040 = vperm.xlu2 %1742, %v2255_v39  }
 0x309   : > { %v905_v44 = vpop.permute.xlu2 %904  ;;  %v915_v53 = vand.u32 2147483647, %v913_v31 }
 0x30a   : > { %v912_v30 = vsub.f32 %v905_v44, %v911_v37 }
 0x30b   : > { %v917_v59 = vsub.f32 %v902_v56, %v915_v53 }
 0x30c   : > { %v914_v16 = vand.u32 2147483647, %v912_v30  ;;  %v2307_v30 = vld [vmem:[%s2473_s2 + $0x28] sm:$0xff] }
 0x30d   : > { %v983_v8 = vperm.slane %v2307_v30, 0  ;;  %v1058_v56 = vperm.slane %v2307_v30, 5 }
 0x30e   : > { %v916_v26 = vsub.f32 %v901_v20, %v914_v16 }
 0x30f   : > { %v924_v11 = vpop.permute.xlu1 %923 }
 0x310   : > { %1744 = vset.pattern.permute.xlu2 %v1937_v13  ;;  %v928_v48 = vsub.f32 %v924_v11, %v926_v12 }
 0x311   : > { %1055 = vperm.xlu2 %1744, %v2255_v39   ;;  %v920_v49 = vpop.permute.xlu2 %919 }
 0x312   : > { %v927_v18 = vsub.f32 %v920_v49, %v926_v12  ;;  %v930_v34 = vand.u32 2147483647, %v928_v48 }
 0x314   : > { %v929_v25 = vand.u32 2147483647, %v927_v18  ;;  %v932_v61 = vsub.f32 %v917_v59, %v930_v34  ;;  %v1941_v18 = vmov 49  }
 0x316   : > { %v931_v27 = vsub.f32 %v916_v26, %v929_v25  ;;  %v1944_v25 = vmov 52   ;;  %v1946_v26 = vmov 54  }
 0x318   : > { %v950_v42 = vpop.permute.xlu1 %949  ;;  %v946_v50 = vsub.f32 %v931_v27, %v944_v43 }
 0x319   : > { %v957_v36 = vsub.f32 %v950_v42, %v956_v29  ;;  %1746 = vset.pattern.permute.xlu2 %v1938_v32  ;;  %v939_v45 = vpop.permute.xlu2 %938 }
 0x31a   : > { %1070 = vperm.xlu2 %1746, %v2255_v39   ;;  %v943_v6 = vsub.f32 %v939_v45, %v941_v14  ;;  %v998_v14 = vperm.slane %v2307_v30, 1 }
 0x31b   : > { %v959_v51 = vand.u32 2147483647, %v957_v36 }
 0x31c   : > { %v945_v28 = vand.u32 2147483647, %v943_v6  ;;  %v1028_v6 = vperm.slane %v2307_v30, 3 }
 0x31d   : > { %v961_v55 = vsub.f32 %v946_v50, %v959_v51  ;;  %v1013_v50 = vperm.slane %v2307_v30, 2 }
 0x31e   : > { %v947_v0 = vsub.f32 %v932_v61, %v945_v28  ;;  %v1073_v28 = vperm.slane %v2307_v30, 6 }
 0x31f   : > { %v963_v58 = vmul.f32 1.442695, %v961_v55 }
 0x321   : > { %1794 = vpow2.f32 %v963_v58  ;;  %v954_v60 = vpop.permute.xlu2 %953 }
 0x322   : > { %v958_v62 = vsub.f32 %v954_v60, %v956_v29  ;;  %1748 = vset.pattern.permute.xlu2 %v1939_v63 }
 0x323   : > { %1085 = vperm.xlu2 %1748, %v2255_v39  }
 0x324   : > { %v960_v19 = vand.u32 2147483647, %v958_v62  ;;  %v1088_v62 = vperm.slane %v2307_v30, 7 }
 0x326   : > { %v962_v44 = vsub.f32 %v947_v0, %v960_v19 }
 0x327   : > { %v1795_v1 = vpop.eup %1794 }
 0x328   : > { %v965_v3 = vmul.f32 1.442695, %v962_v44  ;;  %v967_v37 = vsel %vm2147_vm4, 0.0, %v1795_v1 }
 0x329   : > { %v977_v4 = vpop.permute.xlu2 %976  ;;  %v969_v57 = vsel %vm440_vm3, %v967_v37, 0.0 }
 0x32a   : > { %1796 = vpow2.f32 %v965_v3  ;;  %970 = vadd.xlane.f32.xlu1 %v969_v57  ;;  %v984_v12 = vsub.f32 %v977_v4, %v983_v8 }
 0x32b   : > { %1749 = vset.pattern.permute.xlu2 %v1940_v7 }
 0x32c   : > { %1108 = vperm.xlu2 %1749, %v2252_v35   ;;  %v986_v15 = vand.u32 2147483647, %v984_v12 }
 0x32e   : > { %v988_v38 = vsub.f32 0.0, %v986_v15 }
 0x330   : > { %v1797_v10 = vpop.eup %1796 }
 0x331   : > { %v981_v9 = vpop.permute.xlu2 %980  ;;  %v968_v11 = vsel %vm2136_vm2, 0.0, %v1797_v10 }
 0x332   : > { %v972_v5 = vsel %vm440_vm3, %v968_v11, 0.0 }
 0x333   : > { %973 = vadd.xlane.f32.xlu0 %v972_v5 }
 0x334   : > { %1112 = vperm.xlu2 %1749, %v2255_v39  }
 0x339   : > { %v992_v16 = vpop.permute.xlu2 %991 }
 0x33a   : > { %v999_v49 = vsub.f32 %v992_v16, %v998_v14 }
 0x33c   : > { %v1001_v17 = vand.u32 2147483647, %v999_v49  ;;  %1750 = vset.pattern.permute.xlu2 %v1941_v18 }
 0x33d   : > { %1123 = vperm.xlu2 %1750, %v2252_v35  }
 0x33e   : > { %v2316_v20 = vsub.f32 %v988_v38, %v1001_v17 }
 0x341   : > { %v996_v21 = vpop.permute.xlu2 %995 }
 0x342   : > { %v1000_v45 = vsub.f32 %v996_v21, %v998_v14 }
 0x343   : > { %1010 = vperm.xlu1 %1739, %v2255_v39  }
 0x344   : > { %v1002_v52 = vand.u32 2147483647, %v1000_v45 }
 0x345   : > { %1127 = vperm.xlu2 %1750, %v2255_v39  }
 0x347   : > { %1025 = vperm.xlu0 %1741, %v2255_v39  }
 0x349   : > { %v1007_v29 = vpop.permute.xlu2 %1006 }
 0x34b   : > { %1743 = vset.pattern.permute.xlu1 %v1937_v13  ;;  %v1945_v13 = vmov 53  }
 0x34c   : > { %1051 = vperm.xlu1 %1743, %v2252_v35  }
 0x34d   : > { %1751 = vset.pattern.permute.xlu2 %v1942_v22 }
 0x34e   : > { %1138 = vperm.xlu2 %1751, %v2252_v35  }
 0x34f   : > { %1752 = vset.pattern.permute.xlu0 %v1942_v22 }
 0x351   : > { %v1022_v33 = vpop.permute.xlu2 %1021 }
 0x352   : > { %v1029_v12 = vsub.f32 %v1022_v33, %v1028_v6 }
 0x354   : > { %1745 = vset.pattern.permute.xlu1 %v1938_v32  ;;  %v985_v32 = vsub.f32 %v981_v9, %v983_v8  ;;  %v1014_v9 = vsub.f32 %v1007_v29, %v1013_v50  ;;  %v1031_v38 = vand.u32 2147483647, %v1029_v12 }
 0x355   : > { %1066 = vperm.xlu1 %1745, %v2252_v35  }
 0x356   : > { %1754 = vset.pattern.permute.xlu2 %v1943_v23  ;;  %v987_v48 = vand.u32 2147483647, %v985_v32  ;;  %v1016_v15 = vand.u32 2147483647, %v1014_v9 }
 0x357   : > { %1157 = vperm.xlu2 %1754, %v2255_v39  }
 0x358   : > { %v989_v55 = vsub.f32 0.0, %v987_v48  ;;  %v1018_v18 = vsub.f32 %v2316_v20, %v1016_v15 }
 0x35a   : > { %v1037_v27 = vpop.permute.xlu2 %1036  ;;  %v1004_v58 = vsub.f32 %v989_v55, %v1002_v52  ;;  %v1949_v55 = vmov 56  }
 0x35d   : > { %1747 = vset.pattern.permute.xlu1 %v1939_v63 }
 0x35e   : > { %1081 = vperm.xlu1 %1747, %v2252_v35  }
 0x35f   : > { %1755 = vset.pattern.permute.xlu2 %v1944_v25  ;;  %v1033_v25 = vsub.f32 %v1018_v18, %v1031_v38 }
 0x360   : > { %1168 = vperm.xlu2 %1755, %v2252_v35  }
 0x362   : > { %v1041_v31 = vpop.permute.xlu2 %1040 }
 0x366   : > { %1753 = vset.pattern.permute.xlu1 %v1943_v23 }
 0x368   : > { %1172 = vperm.xlu2 %1755, %v2255_v39  }
 0x36b   : > { %v1056_v36 = vpop.permute.xlu2 %1055 }
 0x36c   : > { %v1060_v61 = vsub.f32 %v1056_v36, %v1058_v56 }
 0x36e   : > { %v1062_v4 = vand.u32 2147483647, %v1060_v61 }
 0x370   : > { %1757 = vset.pattern.permute.xlu2 %v1945_v13 }
 0x371   : > { %1187 = vperm.xlu2 %1757, %v2255_v39  }
 0x374   : > { %v1071_v47 = vpop.permute.xlu2 %1070 }
 0x375   : > { %v1075_v1 = vsub.f32 %v1071_v47, %v1073_v28 }
 0x377   : > { %v1077_v10 = vand.u32 2147483647, %v1075_v1 }
 0x379   : > { %1759 = vset.pattern.permute.xlu2 %v1946_v26 }
 0x37a   : > { %1202 = vperm.xlu2 %1759, %v2255_v39  }
 0x37d   : > { %v1086_v19 = vpop.permute.xlu2 %1085 }
 0x37e   : > { %v1090_v57 = vsub.f32 %v1086_v19, %v1088_v62  ;;  %v2378_v19 = vld [vmem:[%s2473_s2 + $0x30] sm:$0xff] }
 0x37f   : > { %v1130_v1 = vperm.slane %v2378_v19, 1  ;;  %v1160_v9 = vperm.slane %v2378_v19, 3 }
 0x380   : > { %v1092_v11 = vand.u32 2147483647, %v1090_v57 }
 0x39d   : > { %v971_v40 = vpop.xlane.xlu1 %970 }
 0x39e   : > { %v2335_v41 = vsel %vm1380_vm8, %v2277_v24, %v971_v40  ;;  %v1043_v24 = vperm.slane %v2307_v30, 4 }
 0x3a0   : > { %v1045_v59 = vsub.f32 %v1041_v31, %v1043_v24  ;;  %v1044_v16 = vsub.f32 %v1037_v27, %v1043_v24  ;;  %v1109_v24 = vpop.permute.xlu2 %1108 }
 0x3a2   : > { %v1047_v44 = vand.u32 2147483647, %v1045_v59  ;;  %v1046_v22 = vand.u32 2147483647, %v1044_v16 }
 0x3a4   : > { %v1048_v40 = vsub.f32 %v1033_v25, %v1046_v22  ;;  %v1190_v22 = vperm.slane %v2378_v19, 5 }
 0x3a6   : > { %v974_v42 = vpop.xlane.xlu0 %973 }
 0x3a7   : > { %v2338_v43 = vsel %vm1380_vm8, %v2273_v46, %v974_v42 }
 0x3b5   : > { %v1011_v51 = vpop.permute.xlu1 %1010 }
 0x3b6   : > { %v1015_v53 = vsub.f32 %v1011_v51, %v1013_v50 }
 0x3b8   : > { %v1017_v34 = vand.u32 2147483647, %v1015_v53  ;;  %v1947_v53 = vmov 57  }
 0x3b9   : > { %v1026_v46 = vpop.permute.xlu0 %1025  ;;  %1764 = vset.pattern.permute.xlu2 %v1947_v53 }
 0x3ba   : > { %v1030_v60 = vsub.f32 %v1026_v46, %v1028_v6  ;;  %v1019_v63 = vsub.f32 %v1004_v58, %v1017_v34  ;;  %v1948_v6 = vmov 55   ;;  %v1952_v46 = vmov 62  }
 0x3bc   : > { %v1032_v0 = vand.u32 2147483647, %v1030_v60 }
 0x3be   : > { %v1034_v3 = vsub.f32 %v1019_v63, %v1032_v0  ;;  %v1052_v37 = vpop.permute.xlu1 %1051 }
 0x3bf   : > { %v1059_v17 = vsub.f32 %v1052_v37, %v1058_v56  ;;  %v1951_v56 = vmov 59  }
 0x3c0   : > { %v1049_v7 = vsub.f32 %v1034_v3, %v1047_v44  ;;  %v1115_v44 = vperm.slane %v2378_v19, 0 }
 0x3c1   : > { %v1061_v21 = vand.u32 2147483647, %v1059_v17 }
 0x3c2   : > { %v1064_v8 = vsub.f32 %v1049_v7, %v1062_v4  ;;  %v1116_v37 = vsub.f32 %v1109_v24, %v1115_v44 }
 0x3c3   : > { %v1063_v36 = vsub.f32 %v1048_v40, %v1061_v21 }
 0x3c4   : > { %v1079_v5 = vsub.f32 %v1064_v8, %v1077_v10  ;;  %v1118_v8 = vand.u32 2147483647, %v1116_v37 }
 0x3c6   : > { %v1094_v14 = vsub.f32 %v1079_v5, %v1092_v11  ;;  %v1120_v15 = vsub.f32 0.0, %v1118_v8 }
 0x3c7   : > { %v1067_v30 = vpop.permute.xlu1 %1066 }
 0x3c8   : > { %v1097_v49 = vmul.f32 1.442695, %v1094_v14  ;;  %v1074_v23 = vsub.f32 %v1067_v30, %v1073_v28  ;;  %v1175_v30 = vperm.slane %v2378_v19, 4 }
 0x3ca   : > { %1798 = vpow2.f32 %v1097_v49  ;;  %v1076_v31 = vand.u32 2147483647, %v1074_v23 }
 0x3cc   : > { %v1078_v45 = vsub.f32 %v1063_v36, %v1076_v31 }
 0x3d0   : > { %v1799_v29 = vpop.eup %1798  ;;  %v1082_v42 = vpop.permute.xlu1 %1081 }
 0x3d1   : > { %v1089_v33 = vsub.f32 %v1082_v42, %v1088_v62  ;;  %v1100_v27 = vsel %vm2136_vm2, 0.0, %v1799_v29 }
 0x3d2   : > { %v1104_v32 = vsel %vm440_vm3, %v1100_v27, 0.0 }
 0x3d3   : > { %v1091_v47 = vand.u32 2147483647, %v1089_v33  ;;  %1105 = vadd.xlane.f32.xlu1 %v1104_v32 }
 0x3d5   : > { %v1093_v48 = vsub.f32 %v1078_v45, %v1091_v47 }
 0x3d7   : > { %v1095_v20 = vmul.f32 1.442695, %v1093_v48  ;;  %v1220_v48 = vperm.slane %v2378_v19, 7 }
 0x3d9   : > { %1800 = vpow2.f32 %v1095_v20 }
 0x3df   : > { %v1801_v50 = vpop.eup %1800 }
 0x3e0   : > { %v1099_v51 = vsel %vm2147_vm4, 0.0, %v1801_v50  ;;  %v1205_v50 = vperm.slane %v2378_v19, 6 }
 0x3e1   : > { %v1101_v52 = vsel %vm440_vm3, %v1099_v51, 0.0 }
 0x3e2   : > { %1102 = vadd.xlane.f32.xlu0 %v1101_v52 }
 0x3ec   : > { %1153 = vperm.xlu1 %1753, %v2252_v35  }
 0x3f4   : > { %1756 = vset.pattern.permute.xlu1 %v1945_v13  ;;  %v1950_v13 = vmov 58  }
 0x3f5   : > { %1183 = vperm.xlu1 %1756, %v2252_v35  }
 0x3f6   : > { %1142 = vperm.xlu0 %1752, %v2255_v39  }
 0x3fd   : > { %1758 = vset.pattern.permute.xlu1 %v1946_v26  ;;  %v1113_v26 = vpop.permute.xlu2 %1112 }
 0x3fe   : > { %1760 = vset.pattern.permute.xlu0 %v1948_v6  ;;  %1198 = vperm.xlu1 %1758, %v2252_v35   ;;  %v1117_v57 = vsub.f32 %v1113_v26, %v1115_v44 }
 0x3ff   : > { %1213 = vperm.xlu0 %1760, %v2252_v35  }
 0x400   : > { %v1119_v11 = vand.u32 2147483647, %v1117_v57 }
 0x402   : > { %v1121_v38 = vsub.f32 0.0, %v1119_v11 }
 0x405   : > { %v1124_v34 = vpop.permute.xlu2 %1123 }
 0x406   : > { %1761 = vset.pattern.permute.xlu1 %v1948_v6  ;;  %v1131_v7 = vsub.f32 %v1124_v34, %v1130_v1 }
 0x407   : > { %1762 = vset.pattern.permute.xlu0 %v1949_v55  ;;  %1217 = vperm.xlu1 %1761, %v2255_v39  }
 0x408   : > { %1240 = vperm.xlu0 %1762, %v2252_v35   ;;  %v1133_v5 = vand.u32 2147483647, %v1131_v7 }
 0x40a   : > { %v1135_v18 = vsub.f32 %v1120_v15, %v1133_v5 }
 0x40d   : > { %v1128_v58 = vpop.permute.xlu2 %1127 }
 0x40e   : > { %v1132_v10 = vsub.f32 %v1128_v58, %v1130_v1 }
 0x40f   : > { %1765 = vset.pattern.permute.xlu1 %v1950_v13 }
 0x410   : > { %1244 = vperm.xlu0 %1762, %v2255_v39   ;;  %v1134_v14 = vand.u32 2147483647, %v1132_v10 }
 0x412   : > { %v1136_v40 = vsub.f32 %v1121_v38, %v1134_v14 }
 0x415   : > { %v1139_v59 = vpop.permute.xlu2 %1138 }
 0x418   : > { %1763 = vset.pattern.permute.xlu0 %v1947_v53 }
 0x419   : > { %1255 = vperm.xlu0 %1763, %v2252_v35  }
 0x41d   : > { %v1158_v61 = vpop.permute.xlu2 %1157 }
 0x41e   : > { %v1162_v31 = vsub.f32 %v1158_v61, %v1160_v9 }
 0x420   : > { %v1164_v45 = vand.u32 2147483647, %v1162_v31 }
 0x421   : > { %1766 = vset.pattern.permute.xlu0 %v1950_v13 }
 0x422   : > { %1274 = vperm.xlu0 %1766, %v2255_v39  }
 0x425   : > { %v1169_v62 = vpop.permute.xlu2 %1168 }
 0x426   : > { %v1176_v42 = vsub.f32 %v1169_v62, %v1175_v30 }
 0x428   : > { %v1178_v20 = vand.u32 2147483647, %v1176_v42 }
 0x42a   : > { %1768 = vset.pattern.permute.xlu0 %v1951_v56 }
 0x42b   : > { %1289 = vperm.xlu0 %1768, %v2255_v39  }
 0x42d   : > { %v1173_v4 = vpop.permute.xlu2 %1172 }
 0x42e   : > { %v1177_v47 = vsub.f32 %v1173_v4, %v1175_v30  ;;  %v1954_v30 = vmov 60  }
 0x430   : > { %v1179_v24 = vand.u32 2147483647, %v1177_v47 }
 0x433   : > { %1773 = vset.pattern.permute.xlu0 %v1952_v46 }
 0x434   : > { %1330 = vperm.xlu0 %1773, %v2252_v35  }
 0x435   : > { %v1188_v23 = vpop.permute.xlu2 %1187 }
 0x436   : > { %v1192_v26 = vsub.f32 %v1188_v23, %v1190_v22 }
 0x438   : > { %v1194_v44 = vand.u32 2147483647, %v1192_v26 }
 0x43d   : > { %v1203_v58 = vpop.permute.xlu2 %1202 }
 0x43e   : > { %v1207_v1 = vsub.f32 %v1203_v58, %v1205_v50 }
 0x440   : > { %v1209_v4 = vand.u32 2147483647, %v1207_v1 }
 0x446   : > { %v1106_v28 = vpop.xlane.xlu1 %1105 }
 0x447   : > { %v2370_v60 = vsel %vm1383_vm9, %v2338_v43, %v1106_v28  ;;  %v1145_v43 = vperm.slane %v2378_v19, 2 }
 0x455   : > { %v1103_v63 = vpop.xlane.xlu0 %1102 }
 0x456   : > { %v2373_v0 = vsel %vm1383_vm9, %v2335_v41, %v1103_v63  ;;  %v1146_v41 = vsub.f32 %v1139_v59, %v1145_v43 }
 0x458   : > { %v1148_v16 = vand.u32 2147483647, %v1146_v41 }
 0x45a   : > { %v1150_v29 = vsub.f32 %v1135_v18, %v1148_v16  ;;  %v1953_v16 = vmov 63  }
 0x45b   : > { %1777 = vset.pattern.permute.xlu0 %v1953_v16 }
 0x45e   : > { %v1154_v3 = vpop.permute.xlu1 %1153 }
 0x45f   : > { %v1161_v12 = vsub.f32 %v1154_v3, %v1160_v9 }
 0x461   : > { %v1163_v25 = vand.u32 2147483647, %v1161_v12 }
 0x463   : > { %v1165_v27 = vsub.f32 %v1150_v29, %v1163_v25 }
 0x465   : > { %v1180_v6 = vsub.f32 %v1165_v27, %v1178_v20 }
 0x467   : > { %v1184_v49 = vpop.permute.xlu1 %1183 }
 0x468   : > { %v1143_v17 = vpop.permute.xlu0 %1142  ;;  %v1191_v36 = vsub.f32 %v1184_v49, %v1190_v22  ;;  %v1955_v49 = vmov 61  }
 0x469   : > { %v1147_v21 = vsub.f32 %v1143_v17, %v1145_v43 }
 0x46a   : > { %v1193_v51 = vand.u32 2147483647, %v1191_v36 }
 0x46b   : > { %v1149_v33 = vand.u32 2147483647, %v1147_v21 }
 0x46c   : > { %v1195_v59 = vsub.f32 %v1180_v6, %v1193_v51 }
 0x46d   : > { %v1151_v32 = vsub.f32 %v1136_v40, %v1149_v33  ;;  %v2415_v40 = vld [vmem:[%s2473_s2 + $0x38] sm:$0xff] }
 0x46e   : > { %v1262_v31 = vperm.slane %v2415_v40, 1  ;;  %v1307_v58 = vperm.slane %v2415_v40, 4 }
 0x46f   : > { %v1166_v52 = vsub.f32 %v1151_v32, %v1164_v45  ;;  %v1277_v32 = vperm.slane %v2415_v40, 2 }
 0x470   : > { %v1199_v53 = vpop.permute.xlu1 %1198 }
 0x471   : > { %v1206_v55 = vsub.f32 %v1199_v53, %v1205_v50  ;;  %v1214_v13 = vpop.permute.xlu0 %1213  ;;  %v1181_v61 = vsub.f32 %v1166_v52, %v1179_v24  ;;  %v1292_v53 = vperm.slane %v2415_v40, 3 }
 0x472   : > { %v1221_v34 = vsub.f32 %v1214_v13, %v1220_v48 }
 0x473   : > { %v1208_v28 = vand.u32 2147483647, %v1206_v55  ;;  %v1196_v37 = vsub.f32 %v1181_v61, %v1194_v44 }
 0x474   : > { %v1223_v62 = vand.u32 2147483647, %v1221_v34 }
 0x475   : > { %v1210_v63 = vsub.f32 %v1195_v59, %v1208_v28  ;;  %v1211_v7 = vsub.f32 %v1196_v37, %v1209_v4  ;;  %v1337_v4 = vperm.slane %v2415_v40, 6 }
 0x477   : > { %v1225_v3 = vsub.f32 %v1210_v63, %v1223_v62 }
 0x479   : > { %v1227_v19 = vmul.f32 1.442695, %v1225_v3  ;;  %v1218_v43 = vpop.permute.xlu1 %1217 }
 0x47a   : > { %v1222_v57 = vsub.f32 %v1218_v43, %v1220_v48  ;;  %v1241_v38 = vpop.permute.xlu0 %1240 }
 0x47b   : > { %1802 = vpow2.f32 %v1227_v19  ;;  %v1322_v19 = vperm.slane %v2415_v40, 5 }
 0x47c   : > { %v1224_v10 = vand.u32 2147483647, %v1222_v57 }
 0x47e   : > { %v1226_v8 = vsub.f32 %v1211_v7, %v1224_v10  ;;  %v1352_v7 = vperm.slane %v2415_v40, 7 }
 0x480   : > { %v1229_v41 = vmul.f32 1.442695, %v1226_v8 }
 0x481   : > { %v1803_v9 = vpop.eup %1802 }
 0x482   : > { %1804 = vpow2.f32 %v1229_v41  ;;  %v1231_v11 = vsel %vm2147_vm4, 0.0, %v1803_v9  ;;  %v1245_v25 = vpop.permute.xlu0 %1244 }
 0x483   : > { %v1233_v5 = vsel %vm440_vm3, %v1231_v11, 0.0 }
 0x484   : > { %1234 = vadd.xlane.f32.xlu2 %v1233_v5 }
 0x488   : > { %v1805_v12 = vpop.eup %1804 }
 0x489   : > { %v1232_v14 = vsel %vm2136_vm2, 0.0, %v1805_v12 }
 0x48a   : > { %v1236_v15 = vsel %vm440_vm3, %v1232_v14, 0.0 }
 0x48b   : > { %1237 = vadd.xlane.f32.xlu1 %v1236_v15  ;;  %v1256_v21 = vpop.permute.xlu0 %1255 }
 0x48c   : > { %v1263_v27 = vsub.f32 %v1256_v21, %v1262_v31 }
 0x48e   : > { %v1265_v50 = vand.u32 2147483647, %v1263_v27 }
 0x49c   : > { %1259 = vperm.xlu2 %1764, %v2255_v39  }
 0x4a4   : > { %1270 = vperm.xlu1 %1765, %v2252_v35   ;;  %1767 = vset.pattern.permute.xlu2 %v1951_v56 }
 0x4a5   : > { %1285 = vperm.xlu2 %1767, %v2252_v35  }
 0x4ac   : > { %1770 = vset.pattern.permute.xlu1 %v1954_v30 }
 0x4ad   : > { %1304 = vperm.xlu1 %1770, %v2255_v39   ;;  %1769 = vset.pattern.permute.xlu2 %v1954_v30 }
 0x4ae   : > { %1300 = vperm.xlu2 %1769, %v2252_v35  }
 0x4b5   : > { %1772 = vset.pattern.permute.xlu1 %v1955_v49 }
 0x4b6   : > { %1319 = vperm.xlu1 %1772, %v2255_v39   ;;  %1771 = vset.pattern.permute.xlu2 %v1955_v49 }
 0x4b7   : > { %1315 = vperm.xlu2 %1771, %v2252_v35  }
 0x4be   : > { %1775 = vset.pattern.permute.xlu1 %v1953_v16 }
 0x4bf   : > { %1345 = vperm.xlu1 %1775, %v2252_v35   ;;  %1774 = vset.pattern.permute.xlu2 %v1952_v46 }
 0x4c0   : > { %1334 = vperm.xlu2 %1774, %v2255_v39  }
 0x4c8   : > { %1776 = vset.pattern.permute.xlu2 %v1953_v16 }
 0x4c9   : > { %1349 = vperm.xlu2 %1776, %v2255_v39   ;;  %v1247_v39 = vperm.slane %v2415_v40, 0 }
 0x4cb   : > { %v1249_v42 = vsub.f32 %v1245_v25, %v1247_v39 }
 0x4cd   : > { %v1251_v45 = vand.u32 2147483647, %v1249_v42 }
 0x4cf   : > { %v1253_v51 = vsub.f32 0.0, %v1251_v45 }
 0x4f7   : > { %v1235_v56 = vpop.xlane.xlu2 %1234 }
 0x4f8   : > { %v2407_v17 = vsel %vm1386_vm10, %v2373_v0, %v1235_v56  ;;  %v1275_v0 = vpop.permute.xlu0 %1274 }
 0x4f9   : > { %v1279_v52 = vsub.f32 %v1275_v0, %v1277_v32 }
 0x4fb   : > { %v1281_v61 = vand.u32 2147483647, %v1279_v52 }
 0x4fe   : > { %v1238_v18 = vpop.xlane.xlu1 %1237 }
 0x4ff   : > { %v2410_v22 = vsel %vm1386_vm10, %v2370_v60, %v1238_v18  ;;  %v1260_v23 = vpop.permute.xlu2 %1259  ;;  %v1248_v60 = vsub.f32 %v1241_v38, %v1247_v39 }
 0x500   : > { %v1264_v33 = vsub.f32 %v1260_v23, %v1262_v31  ;;  %v1290_v24 = vpop.permute.xlu0 %1289 }
 0x501   : > { %v1250_v47 = vand.u32 2147483647, %v1248_v60  ;;  %v1294_v62 = vsub.f32 %v1290_v24, %v1292_v53 }
 0x502   : > { %v1266_v20 = vand.u32 2147483647, %v1264_v33 }
 0x503   : > { %v1252_v13 = vsub.f32 0.0, %v1250_v47  ;;  %v1296_v43 = vand.u32 2147483647, %v1294_v62 }
 0x504   : > { %v1268_v34 = vsub.f32 %v1253_v51, %v1266_v20 }
 0x505   : > { %v1267_v59 = vsub.f32 %v1252_v13, %v1265_v50 }
 0x506   : > { %v1283_v1 = vsub.f32 %v1268_v34, %v1281_v61 }
 0x507   : > { %v1286_v35 = vpop.permute.xlu2 %1285 }
 0x508   : > { %v1293_v28 = vsub.f32 %v1286_v35, %v1292_v53  ;;  %v1298_v9 = vsub.f32 %v1283_v1, %v1296_v43  ;;  %v1331_v15 = vpop.permute.xlu0 %1330 }
 0x509   : > { %v1338_v23 = vsub.f32 %v1331_v15, %v1337_v4 }
 0x50a   : > { %v1295_v3 = vand.u32 2147483647, %v1293_v28 }
 0x50b   : > { %v1340_v31 = vand.u32 2147483647, %v1338_v23 }
 0x50f   : > { %v1301_v46 = vpop.permute.xlu2 %1300 }
 0x510   : > { %v1308_v37 = vsub.f32 %v1301_v46, %v1307_v58 }
 0x512   : > { %v1310_v12 = vand.u32 2147483647, %v1308_v37 }
 0x516   : > { %v1271_v29 = vpop.permute.xlu1 %1270 }
 0x517   : > { %v1316_v36 = vpop.permute.xlu2 %1315  ;;  %v1278_v48 = vsub.f32 %v1271_v29, %v1277_v32 }
 0x518   : > { %v1323_v14 = vsub.f32 %v1316_v36, %v1322_v19 }
 0x519   : > { %v1280_v26 = vand.u32 2147483647, %v1278_v48 }
 0x51a   : > { %v1325_v25 = vand.u32 2147483647, %v1323_v14 }
 0x51b   : > { %v1282_v44 = vsub.f32 %v1267_v59, %v1280_v26 }
 0x51d   : > { %v1297_v10 = vsub.f32 %v1282_v44, %v1295_v3 }
 0x51f   : > { %v1305_v6 = vpop.permute.xlu1 %1304  ;;  %v1335_v55 = vpop.permute.xlu2 %1334  ;;  %v1312_v56 = vsub.f32 %v1297_v10, %v1310_v12 }
 0x520   : > { %v1309_v63 = vsub.f32 %v1305_v6, %v1307_v58  ;;  %v1339_v11 = vsub.f32 %v1335_v55, %v1337_v4 }
 0x521   : > { %v1327_v46 = vsub.f32 %v1312_v56, %v1325_v25 }
 0x522   : > { %v1311_v57 = vand.u32 2147483647, %v1309_v63  ;;  %v1341_v38 = vand.u32 2147483647, %v1339_v11 }
 0x523   : > { %v1342_v42 = vsub.f32 %v1327_v46, %v1340_v31 }
 0x524   : > { %v1313_v16 = vsub.f32 %v1298_v9, %v1311_v57 }
 0x527   : > { %v1350_v8 = vpop.permute.xlu2 %1349 }
 0x528   : > { %v1320_v41 = vpop.permute.xlu1 %1319  ;;  %v1354_v30 = vsub.f32 %v1350_v8, %v1352_v7 }
 0x529   : > { %v1324_v5 = vsub.f32 %v1320_v41, %v1322_v19 }
 0x52a   : > { %v1356_v35 = vand.u32 2147483647, %v1354_v30 }
 0x52b   : > { %v1326_v49 = vand.u32 2147483647, %v1324_v5 }
 0x52d   : > { %v1328_v18 = vsub.f32 %v1313_v16, %v1326_v49 }
 0x52f   : > { %v1343_v21 = vsub.f32 %v1328_v18, %v1341_v38 }
 0x531   : > { %v1358_v40 = vsub.f32 %v1343_v21, %v1356_v35  ;;  %v1346_v39 = vpop.permute.xlu1 %1345 }
 0x532   : > { %v1353_v0 = vsub.f32 %v1346_v39, %v1352_v7 }
 0x533   : > { %v1361_v29 = vmul.f32 1.442695, %v1358_v40 }
 0x534   : > { %v1355_v36 = vand.u32 2147483647, %v1353_v0 }
 0x535   : > { %1806 = vpow2.f32 %v1361_v29 }
 0x536   : > { %v1357_v60 = vsub.f32 %v1342_v42, %v1355_v36 }
 0x538   : > { %v1359_v33 = vmul.f32 1.442695, %v1357_v60 }
 0x53a   : > { %1808 = vpow2.f32 %v1359_v33 }
 0x53b   : > { %v1807_v27 = vpop.eup %1806 }
 0x53c   : > { %v1364_v32 = vsel %vm2136_vm2, 0.0, %v1807_v27 }
 0x53d   : > { %v1368_v45 = vsel %vm440_vm3, %v1364_v32, 0.0 }
 0x53e   : > { %1369 = vadd.xlane.f32.xlu0 %v1368_v45 }
 0x540   : > { %v1809_v47 = vpop.eup %1808 }
 0x541   : > { %v1363_v48 = vsel %vm2147_vm4, 0.0, %v1809_v47 }
 0x542   : > { %v1365_v20 = vsel %vm440_vm3, %v1363_v48, 0.0 }
 0x543   : > { %1366 = vadd.xlane.f32.xlu1 %v1365_v20 }
 0x5b1   : > { %v1370_v50 = vpop.xlane.xlu0 %1369 }
 0x5b2   : > { %v1391_v54 = vsel %vm1389_vm11, %v2410_v22, %v1370_v50 }
 0x5b3   : > { %v1394_v51 = vsel %vm1392_vm12, %v1391_v54, 0.0 }
 0x5b4   : > { %1407 = vst [vmem:[%s229_s23 + $0x8] sm:$0xff] %v1394_v51 }
 0x5b6   : > { %v1367_v2 = vpop.xlane.xlu1 %1366 }
 0x5b7   : > { %v1390_v52 = vsel %vm1389_vm11, %v2407_v17, %v1367_v2 }
 0x5b8   : > { %v1393_v53 = vsel %vm1392_vm12, %v1390_v52, 0.0 }
 0x5b9   : > { %1406 = vst [vmem:[%s229_s23] sm:$0xff] %v1393_v53 }
 0x5ba   : > { %1839 = shalt.err (!%p1836_p5)
}
 0x5bb   : > { %s1956_s9 = smov 128   ;;  %s1957_s10 = smov 8  }
 0x5bc   : > { %1545 = dma.vmem_to_hbm [thread:$0]  (%p2023_p4), %s1422_s25, 256, %s1424_s28, %s1409_s18, %s1956_s9, %s1956_s9, %s1957_s10  }
 0x5bd PF: > { %p1551_p6 = scmp.ge.s32.totalorder %s1890_s20, 2  ;;  %s1438_s11 = sand.u32 1, %s1870_s15  }
 0x5be   : > { %s1439_s12 = scalar_lea.sflag [#allocation5], %s1438_s11 }
 0x5bf   : > { %p1548_p7 = pnand %p1551_p6, %p2030_p8 }
 0x5c1   : > { %p1549_p9 = pneg %p1548_p7 }
 0x5c3   : > { %1865 = dma.done.wait (%p1549_p9), %s1439_s12, 256  }
 0x5c4   : > { %1867 = vsyncadd (%p1549_p9), %s1439_s12, 4294967040  ;;  %s17_s20 = sadd.s32 1, %s1890_s20   ;;  %s2482_s15 = smov %s1874_s16 }
 0x5c5   : > { %p14_p10 = scmp.ge.s32.totalorder %s17_s20, 4   ;;  %s2483_s16 = smov %s1878_s17 }
 0x5c6   : > { %s2484_s17 = smov %s2036_s27  ;;  %s2485_s18 = smov %s1886_s19 }
 0x5c7   : > { %s2486_s19 = smov %s2488_s22  ;;  %16 = sbr.rel (!%p14_p10) target bundleno = 4 (0x4), region = 85 }
 0x5cc   :  { %1445 = vsyncpa [#allocation5], 1 }
 0x5cd   :  { %1447 = vsyncpa [#allocation5 + $0x1], 1 }

// kernel: tpu_custom_call.1
= control target key start
LH: loop header
LB: loop body
LE: loop exit
PB: predicated region body
PF: predicated region fallthrough
CT: control target
= control target key end

     0   :  { %9 = vsyncpa [#allocation5], 0  ;;  %s2471_s0 = inlined_call_operand.vmem [shape: f32[32,16], index: 0, kind: input, shape index: {}]   ;;  %s2472_s1 = inlined_call_operand.vmem [shape: f32[16,64], index: 1, kind: input, shape index: {}]   ;;  %s2473_s2 = inlined_call_operand.vmem [shape: f32[64,32], index: 2, kind: input, shape index: {}]   ;;  %s2474_s3 = inlined_call_operand.vmem [shape: f32[8,32], index: 3, kind: input, shape index: {}]   ;;  %s2475_s4 = inlined_call_operand.hbm [shape: f32[32,128], index: 4, kind: output, shape index: {}]  }
   0x1   :  { %11 = vsyncpa [#allocation5 + $0x1], 0  ;;  %s1983_s15 = smov 0   ;;  %s1985_s16 = smov 0  }
   0x2   :  { %s1987_s17 = smov 0   ;;  %s1989_s18 = smov 0  }
   0x3   :  { %s1991_s19 = smov 0   ;;  %s1993_s20 = smov 0  }
   0x4 LB: > { %s1524_s3 = sadd.s32 4294967295, %s1890_s20   ;;  %s1525_s21 = sadd.s32 4294967294, %s1890_s20   ;;  %s1890_s20 = sphi %s1993_s20, %s17_s20   ;;  %s1886_s19 = sphi %s1991_s19, %s2486_s19   ;;  %s1882_s18 = sphi %s1989_s18, %s2485_s18   ;;  %s1878_s17 = sphi %s1987_s17, %s2484_s17   ;;  %s1874_s16 = sphi %s1985_s16, %s2483_s16   ;;  %s1870_s15 = sphi %s1983_s15, %s2482_s15  }
   0x5   : > { %s29_s22 = sadd.s32 1, %s1886_s19  ;;  %s135_s23 = sadd.s32 1, %s1878_s17 }
   0x6   : > { %p31_p0 = scmp.ge.s32.totalorder %s29_s22, 2  ;;  %p145_p1 = scmp.ne.s32.totalorder %s1878_s17, %s1874_s16 }
   0x7   : > { %p146_p2 = scmp.eq.s32.totalorder %s1524_s3, 1  ;;  %p151_p3 = scmp.ne.s32.totalorder %s1874_s16, %s1870_s15 }
   0x8   : > { %s2488_s22 = smov (%p31_p0, %s29_s22), 0  ;;  %p152_p5 = scmp.eq.s32.totalorder %s1525_s21, 1 }
   0x9   : > { %p2023_p4 = por %p146_p2, %p145_p1  ;;  %s132_s25 = ssub.s32 %s1886_s19, %s2488_s22 }
   0xa   : > { %p1530_p6 = scmp.ge.s32.totalorder %s1890_s20, 1  ;;  %p133_p7 = scmp.eq.s32.totalorder %s132_s25, 0 }
   0xb   : > { %p2030_p8 = por %p152_p5, %p151_p3  ;;  %p196_p9 = scmp.lt.s32.totalorder %s1890_s20, 3 }
   0xc   : > { %s2036_s27 = scalar_select %p133_p7, %s1878_s17, %s135_s23  }
   0xd   : > { %p197_p10 = pnand %p1530_p6, %p196_p9 }
   0xe   : > { %s1532_s6 = sshll.u32 (!%p197_p10), %s1882_s18, 1  ;;  %s1536_s13 = sshll.u32 (!%p197_p10), %s1882_s18, 4 }
   0xf   : > { %200 = sbr.rel (%p197_p10) target bundleno = 1469 (0x5bd), region = 36  ;;  %p231_p11 = scmp.lt.s32.totalorder (!%p197_p10), %s1532_s6, 3 }
  0x10   : > { %s227_s11 = sand.u32 (!%p197_p10), 1, %s1874_s16   ;;  %s1420_s21 = scalar_lea.hbm (!%p197_p10), %s2475_s4, %s1536_s13 }
  0x11   : > { %s1531_s12 = sshll.u32 (!%p197_p10), %s227_s11, 4  ;;  %s1423_s28 = sshll.u32 (!%p197_p10), %s1420_s21, 4  ;;  %s1424_s28 = int_to_ptr.hbm [resolvable:$true] %s1423_s28 }
  0x12   : > { %s229_s23 = scalar_lea.vmem (!%p197_p10), [#allocation4], %s1531_s12  ;;  %s1409_s18 = scalar_lea.sflag (!%p197_p10), [#allocation5], %s227_s11 }
  0x13   : > { %s1421_s25 = sshll.u32 (!%p197_p10), %s229_s23, 4  ;;  %s1826_s29 = sshra.s32 (!%p197_p10), %s1424_s28, 4  ;;  %s1422_s25 = int_to_ptr.vmem [resolvable:$true] %s1421_s25  ;;  %s1827_s29 = int_to_ptr.hbm [resolvable:$true] %s1826_s29 }
  0x14   : > { %v252_v0 = vld [vmem:[%s2472_s1 + $0x8] sm:$0xff]  ;;  %v251_v1 = vld [vmem:[%s2472_s1] sm:$0xff]  ;;  %s2490_s6 = smov (!%p231_p11, %s1532_s6), 3  ;;  %vm253_vm0 = vcmask 130048   ;;  %v1892_v4 = vmov 2   ;;  %v1893_v5 = vmov 1   ;;  %p1833_p1 = scmp.lt.s32.totalorder %s1827_s29, %s2475_s4 }
  0x15   : > { %274 = vmatpush.msra.mxu0 %v252_v0  ;;  %1543 = vmatpush.msra.mxu1 %v252_v0  ;;  %s1533_s7 = sshll.u32 %s2490_s6, 3  ;;  %v1894_v6 = vmov 0   ;;  %vm283_vm1 = vcmask 523264   ;;  %v1895_v11 = vmov 4   ;;  %v1896_v12 = vmov 3   ;;  %v2109_v40 = vld [vmem:[%s2473_s2] sm:$0xff] }
  0x16   : > { %s234_s10 = scalar_lea.vmem %s2471_s0, %s1533_s7  ;;  %1668 = vset.pattern.permute.xlu2 %v1892_v4  ;;  %1667 = vset.pattern.permute.xlu1 %v1893_v5  ;;  %v1897_v13 = vmov 5   ;;  %v1898_v14 = vmov 6   ;;  %v1899_v15 = vmov 11   ;;  %v1900_v16 = vmov 7   ;;  %s1828_s30 = scalar_lea.hbm %s1827_s29, 16 }
  0x17   : > { %275 = vmatpush.msra.mxu0 %v251_v1  ;;  %1544 = vmatpush.msra.mxu1 %v251_v1  ;;  %v249_v2 = vld [vmem:[%s234_s10] sm:$0xff]  ;;  %v250_v3 = vld [vmem:[%s234_s10 + $0x8] sm:$0xff]  ;;  %v1901_v17 = vmov 15   ;;  %v1902_v18 = vmov 8   ;;  %v1903_v19 = vmov 16   ;;  %v1904_v20 = vmov 13   ;;  %p1829_p12 = scmp.ne.s32.totalorder %s1827_s29, %s1828_s30 }
  0x18   : > { %1534 = vmatmul.msk.f32.vlgmr.msra.gmra.mxu0 %vm253_vm0, %v249_v2  ;;  %1535 = vmatmul.msk.f32.vlgmr.msra.gmra.mxu1 %vm253_vm0, %v250_v3  ;;  %v1905_v21 = vmov 9   ;;  %v1906_v22 = vmov 17   ;;  %v1907_v23 = vmov 14   ;;  %v1908_v24 = vmov 18   ;;  %s1832_s6 = scalar_lea.hbm %s2475_s4, 32 }
  0x19   : > { %1666 = vset.pattern.permute.xlu0 %v1894_v6  ;;  %v1909_v25 = vmov 10   ;;  %v1910_v26 = vmov 20   ;;  %v1911_v28 = vmov 19   ;;  %v1912_v30 = vmov 22   ;;  %p1830_p13 = pnand %p1829_p12, %p2023_p4  ;;  %p1834_p2 = scmp.lt.s32.totalorder %s1832_s6, %s1828_s30 }
  0x1a   : > { %v1913_v31 = vmov 12   ;;  %v1914_v33 = vmov 24   ;;  %v1915_v34 = vmov 21   ;;  %v1916_v38 = vmov 23  }
  0x1b   : > { %v322_v42 = vperm.slane %v2109_v40, 0  ;;  %v1917_v43 = vmov 25   ;;  %v337_v46 = vperm.slane %v2109_v40, 1  ;;  %v367_v49 = vperm.slane %v2109_v40, 3  ;;  %p1831_p0 = pneg %p1830_p13  ;;  %p1835_p3 = por %p1834_p2, %p1833_p1 }
  0x1c   : > { %v352_v52 = vperm.slane %v2109_v40, 2  ;;  %v382_v62 = vperm.slane %v2109_v40, 4  ;;  %v412_v63 = vperm.slane %v2109_v40, 6  ;;  %v397_v2 = vperm.slane %v2109_v40, 5 }
  0x1d   : > { %v427_v5 = vperm.slane %v2109_v40, 7  ;;  %vm440_vm3 = vcmask 261120   ;;  %vm1371_vm5 = vcmask 7168   ;;  %vm1374_vm6 = vcmask 15360   ;;  %p1836_p5 = pnand %p1835_p3, %p1831_p0 }
  0x1e   : > { %vm1377_vm7 = vcmask 23552   ;;  %vm1380_vm8 = vcmask 31744   ;;  %vm1383_vm9 = vcmask 39936   ;;  %vm1386_vm10 = vcmask 48128  }
  0x1f   : > { %vm1389_vm11 = vcmask 56320   ;;  %vm1392_vm12 = vcmask 64512  }
  0x95   : > { %v277_v7 = vpop.f32.mrf.mxu0  ;;  %v280_v8 = vpop.f32.mrf.mxu1 }
  0x96   : > { %284 = vst.msk [vmem:[#allocation2] sm:$0xff] %vm283_vm1, %v277_v7 }
  0x97   : > { %285 = vst.msk [vmem:[#allocation2 + $0x8] sm:$0xff] %vm283_vm1, %v280_v8 }
  0x9d   : > { %v2048_v9 = vld [vmem:[#allocation2] sm:$0xff] }
  0x9e   : > { %345 = vperm.xlu2 %1668, %v2048_v9   ;;  %330 = vperm.xlu1 %1667, %v2048_v9   ;;  %v2053_v10 = vld [vmem:[#allocation2 + $0x8] sm:$0xff] }
  0x9f   : > { %314 = vperm.xlu0 %1666, %v2048_v9  }
  0xa6   : > { %349 = vperm.xlu2 %1668, %v2053_v10   ;;  %334 = vperm.xlu1 %1667, %v2053_v10  }
  0xa7   : > { %319 = vperm.xlu0 %1666, %v2053_v10  }
  0xae   : > { %1671 = vset.pattern.permute.xlu2 %v1895_v11  ;;  %1670 = vset.pattern.permute.xlu1 %v1896_v12 }
  0xaf   : > { %1669 = vset.pattern.permute.xlu0 %v1896_v12  ;;  %375 = vperm.xlu2 %1671, %v2048_v9  }
  0xb0   : > { %364 = vperm.xlu1 %1670, %v2053_v10   ;;  %360 = vperm.xlu0 %1669, %v2048_v9  }
  0xb7   : > { %1673 = vset.pattern.permute.xlu2 %v1897_v13 }
  0xb8   : > { %1672 = vset.pattern.permute.xlu1 %v1895_v11  ;;  %1674 = vset.pattern.permute.xlu0 %v1897_v13 }
  0xb9   : > { %390 = vperm.xlu2 %1673, %v2048_v9   ;;  %379 = vperm.xlu1 %1672, %v2053_v10  }
  0xba   : > { %394 = vperm.xlu0 %1674, %v2053_v10  }
  0xc1   : > { %1676 = vset.pattern.permute.xlu2 %v1898_v14  ;;  %1675 = vset.pattern.permute.xlu1 %v1898_v14 }
  0xc2   : > { %1682 = vset.pattern.permute.xlu0 %v1899_v15  ;;  %409 = vperm.xlu2 %1676, %v2053_v10  }
  0xc3   : > { %405 = vperm.xlu1 %1675, %v2048_v9   ;;  %493 = vperm.xlu0 %1682, %v2048_v9  }
  0xca   : > { %1678 = vset.pattern.permute.xlu2 %v1900_v16 }
  0xcb   : > { %1677 = vset.pattern.permute.xlu1 %v1900_v16  ;;  %1690 = vset.pattern.permute.xlu0 %v1901_v17 }
  0xcc   : > { %424 = vperm.xlu2 %1678, %v2053_v10   ;;  %420 = vperm.xlu1 %1677, %v2048_v9  }
  0xcd   : > { %557 = vperm.xlu0 %1690, %v2053_v10  }
  0xd4   : > { %1679 = vset.pattern.permute.xlu2 %v1902_v18  ;;  %1683 = vset.pattern.permute.xlu1 %v1899_v15  ;;  %v298_v15 = vlaneseq }
  0xd5   : > { %1691 = vset.pattern.permute.xlu0 %v1903_v19  ;;  %448 = vperm.xlu2 %1679, %v2048_v9  }
  0xd6   : > { %497 = vperm.xlu1 %1683, %v2053_v10   ;;  %580 = vperm.xlu0 %1691, %v2048_v9  }
  0xdd   : > { %452 = vperm.xlu2 %1679, %v2053_v10  }
  0xde   : > { %1686 = vset.pattern.permute.xlu1 %v1904_v20  ;;  %584 = vperm.xlu0 %1691, %v2053_v10  }
  0xdf   : > { %527 = vperm.xlu1 %1686, %v2053_v10  }
  0xe5   : > { %1680 = vset.pattern.permute.xlu2 %v1905_v21 }
  0xe6   : > { %1692 = vset.pattern.permute.xlu0 %v1906_v22  ;;  %463 = vperm.xlu2 %1680, %v2048_v9  }
  0xe7   : > { %1688 = vset.pattern.permute.xlu1 %v1907_v23  ;;  %595 = vperm.xlu0 %1692, %v2048_v9  }
  0xe8   : > { %542 = vperm.xlu1 %1688, %v2053_v10  }
  0xee   : > { %467 = vperm.xlu2 %1680, %v2053_v10  }
  0xef   : > { %1695 = vset.pattern.permute.xlu0 %v1908_v24 }
  0xf0   : > { %1693 = vset.pattern.permute.xlu1 %v1906_v22  ;;  %614 = vperm.xlu0 %1695, %v2053_v10  }
  0xf1   : > { %599 = vperm.xlu1 %1693, %v2053_v10  }
  0xf6   : > { %1681 = vset.pattern.permute.xlu2 %v1909_v25 }
  0xf7   : > { %478 = vperm.xlu2 %1681, %v2048_v9  }
  0xf8   : > { %1698 = vset.pattern.permute.xlu0 %v1910_v26  ;;  %v2085_v27 = vpop.permute.xlu2 %345 }
  0xf9   : > { %1696 = vset.pattern.permute.xlu1 %v1911_v28  ;;  %640 = vperm.xlu0 %1698, %v2048_v9   ;;  %v353_v16 = vsub.f32 %v2085_v27, %v352_v52 }
  0xfa   : > { %625 = vperm.xlu1 %1696, %v2048_v9  }
  0xff   : > { %482 = vperm.xlu2 %1681, %v2053_v10  }
 0x100   : > { %v350_v29 = vpop.permute.xlu2 %349 }
 0x101   : > { %1703 = vset.pattern.permute.xlu0 %v1912_v30  ;;  %v354_v55 = vsub.f32 %v350_v29, %v352_v52  ;;  %v304_v29 = vshrl.u32 %v298_v15, 7 }
 0x102   : > { %1699 = vset.pattern.permute.xlu1 %v1910_v26  ;;  %674 = vperm.xlu0 %1703, %v2053_v10  }
 0x103   : > { %644 = vperm.xlu1 %1699, %v2053_v10   ;;  %v356_v61 = vand.u32 2147483647, %v354_v55 }
 0x107   : > { %1684 = vset.pattern.permute.xlu2 %v1913_v31  ;;  %v355_v31 = vand.u32 2147483647, %v353_v16 }
 0x108   : > { %508 = vperm.xlu2 %1684, %v2048_v9  }
 0x109   : > { %v2095_v32 = vpop.permute.xlu2 %375 }
 0x10a   : > { %1706 = vset.pattern.permute.xlu0 %v1914_v33  ;;  %v383_v27 = vsub.f32 %v2095_v32, %v382_v62 }
 0x10b   : > { %1701 = vset.pattern.permute.xlu1 %v1915_v34  ;;  %712 = vperm.xlu0 %1706, %v2048_v9  }
 0x10c   : > { %659 = vperm.xlu1 %1701, %v2053_v10  }
 0x110   : > { %512 = vperm.xlu2 %1684, %v2053_v10   ;;  %v331_v35 = vpop.permute.xlu1 %330 }
 0x111   : > { %v315_v36 = vpop.permute.xlu0 %314  ;;  %v338_v1 = vsub.f32 %v331_v35, %v337_v46 }
 0x112   : > { %v323_v54 = vsub.f32 %v315_v36, %v322_v42 }
 0x113   : > { %716 = vperm.xlu0 %1706, %v2053_v10   ;;  %v2102_v37 = vpop.permute.xlu2 %390 }
 0x114   : > { %1704 = vset.pattern.permute.xlu1 %v1916_v38  ;;  %v325_v60 = vand.u32 2147483647, %v323_v54 }
 0x115   : > { %685 = vperm.xlu1 %1704, %v2048_v9  }
 0x116   : > { %v327_v8 = vsub.f32 0.0, %v325_v60 }
 0x118   : > { %1685 = vset.pattern.permute.xlu2 %v1904_v20  ;;  %v335_v39 = vpop.permute.xlu1 %334 }
 0x119   : > { %523 = vperm.xlu2 %1685, %v2048_v9   ;;  %v320_v41 = vpop.permute.xlu0 %319  ;;  %v339_v48 = vsub.f32 %v335_v39, %v337_v46 }
 0x11a   : > { %v324_v44 = vsub.f32 %v320_v41, %v322_v42  ;;  %v305_v42 = vadd.s32 8, %v304_v29 }
 0x11b   : > { %1707 = vset.pattern.permute.xlu0 %v1917_v43  ;;  %v341_v56 = vand.u32 2147483647, %v339_v48  ;;  %v398_v48 = vsub.f32 %v2102_v37, %v397_v2 }
 0x11c   : > { %727 = vperm.xlu0 %1707, %v2048_v9   ;;  %v410_v45 = vpop.permute.xlu2 %409  ;;  %v326_v47 = vand.u32 2147483647, %v324_v44 }
 0x11d   : > { %1708 = vset.pattern.permute.xlu1 %v1917_v43  ;;  %v414_v12 = vsub.f32 %v410_v45, %v412_v63  ;;  %v307_v45 = vstv %s1536_s13  ;;  %v400_v32 = vand.u32 2147483647, %v398_v48 }
 0x11e   : > { %v328_v53 = vsub.f32 0.0, %v326_v47  ;;  %v385_v47 = vand.u32 2147483647, %v383_v27 }
 0x11f   : > { %v416_v25 = vand.u32 2147483647, %v414_v12 }
 0x120   : > { %v343_v59 = vsub.f32 %v328_v53, %v341_v56 }
 0x121   : > { %1687 = vset.pattern.permute.xlu2 %v1907_v23 }
 0x122   : > { %538 = vperm.xlu2 %1687, %v2048_v9   ;;  %v365_v50 = vpop.permute.xlu1 %364  ;;  %v361_v51 = vpop.permute.xlu0 %360  ;;  %v358_v4 = vsub.f32 %v343_v59, %v356_v61 }
 0x123   : > { %v369_v57 = vsub.f32 %v365_v50, %v367_v49  ;;  %v368_v18 = vsub.f32 %v361_v51, %v367_v49  ;;  %v299_v49 = vand.u32 127, %v298_v15  ;;  %v309_v50 = vadd.s32 %v307_v45, %v305_v42 }
 0x125   : > { %v371_v0 = vand.u32 2147483647, %v369_v57  ;;  %v370_v33 = vand.u32 2147483647, %v368_v18  ;;  %vm2136_vm2 = vcmp.eq.s32.totalorder %v299_v49, %v309_v50 }
 0x126   : > { %v425_v58 = vpop.permute.xlu2 %424 }
 0x127   : > { %v373_v13 = vsub.f32 %v358_v4, %v371_v0  ;;  %v429_v20 = vsub.f32 %v425_v58, %v427_v5  ;;  %v308_v0 = vadd.s32 %v307_v45, %v304_v29 }
 0x129   : > { %v431_v35 = vand.u32 2147483647, %v429_v20  ;;  %vm2147_vm4 = vcmp.eq.s32.totalorder %v299_v49, %v308_v0 }
 0x12a   : > { %1689 = vset.pattern.permute.xlu2 %v1901_v17  ;;  %v340_v17 = vand.u32 2147483647, %v338_v1 }
 0x12b   : > { %553 = vperm.xlu2 %1689, %v2048_v9   ;;  %v380_v3 = vpop.permute.xlu1 %379 }
 0x12c   : > { %v384_v6 = vsub.f32 %v380_v3, %v382_v62  ;;  %v395_v7 = vpop.permute.xlu0 %394  ;;  %v342_v23 = vsub.f32 %v327_v8, %v340_v17  ;;  %v1918_v62 = vmov 26  }
 0x12d   : > { %v399_v11 = vsub.f32 %v395_v7, %v397_v2  ;;  %1709 = vset.pattern.permute.xlu0 %v1918_v62  ;;  %v2160_v7 = vld [vmem:[%s2473_s2 + $0x8] sm:$0xff] }
 0x12e   : > { %v386_v14 = vand.u32 2147483647, %v384_v6  ;;  %v357_v39 = vsub.f32 %v342_v23, %v355_v31  ;;  %v455_v8 = vperm.slane %v2160_v7, 0  ;;  %v470_v12 = vperm.slane %v2160_v7, 1 }
 0x12f   : > { %v2125_v19 = vpop.permute.xlu2 %448  ;;  %v401_v22 = vand.u32 2147483647, %v399_v11  ;;  %v530_v29 = vperm.slane %v2160_v7, 5 }
 0x130   : > { %v388_v21 = vsub.f32 %v373_v13, %v386_v14  ;;  %v372_v43 = vsub.f32 %v357_v39, %v370_v33  ;;  %v485_v14 = vperm.slane %v2160_v7, 2  ;;  %v545_v33 = vperm.slane %v2160_v7, 6 }
 0x131   : > { %v560_v39 = vperm.slane %v2160_v7, 7 }
 0x132   : > { %v403_v26 = vsub.f32 %v388_v21, %v401_v22  ;;  %v387_v51 = vsub.f32 %v372_v43, %v385_v47  ;;  %v500_v21 = vperm.slane %v2160_v7, 3 }
 0x133   : > { %1694 = vset.pattern.permute.xlu2 %v1908_v24 }
 0x134   : > { %v418_v36 = vsub.f32 %v403_v26, %v416_v25  ;;  %610 = vperm.xlu2 %1694, %v2048_v9   ;;  %v402_v55 = vsub.f32 %v387_v51, %v400_v32  ;;  %v456_v32 = vsub.f32 %v2125_v19, %v455_v8 }
 0x135   : > { %v406_v40 = vpop.permute.xlu1 %405  ;;  %v494_v17 = vpop.permute.xlu0 %493 }
 0x136   : > { %v433_v41 = vsub.f32 %v418_v36, %v431_v35  ;;  %v413_v24 = vsub.f32 %v406_v40, %v412_v63  ;;  %v515_v35 = vperm.slane %v2160_v7, 4  ;;  %v501_v19 = vsub.f32 %v494_v17, %v500_v21 }
 0x137   : > { %v453_v44 = vpop.permute.xlu2 %452 }
 0x138   : > { %v436_v46 = vmul.f32 1.442695, %v433_v41  ;;  %v415_v52 = vand.u32 2147483647, %v413_v24  ;;  %v457_v11 = vsub.f32 %v453_v44, %v455_v8  ;;  %v1919_v44 = vmov 27  }
 0x13a   : > { %1778 = vpow2.f32 %v436_v46  ;;  %v417_v58 = vsub.f32 %v402_v55, %v415_v52  ;;  %v459_v16 = vand.u32 2147483647, %v457_v11 }
 0x13c   : > { %1697 = vset.pattern.permute.xlu2 %v1911_v28  ;;  %v461_v22 = vsub.f32 0.0, %v459_v16 }
 0x13d   : > { %629 = vperm.xlu2 %1697, %v2053_v10  }
 0x13e   : > { %v421_v53 = vpop.permute.xlu1 %420 }
 0x13f   : > { %v428_v56 = vsub.f32 %v421_v53, %v427_v5  ;;  %v558_v43 = vpop.permute.xlu0 %557 }
 0x140   : > { %v1779_v37 = vpop.eup %1778  ;;  %v2140_v57 = vpop.permute.xlu2 %463  ;;  %v562_v48 = vsub.f32 %v558_v43, %v560_v39 }
 0x141   : > { %v430_v59 = vand.u32 2147483647, %v428_v56  ;;  %v439_v28 = vsel %vm2136_vm2, 0.0, %v1779_v37  ;;  %v471_v56 = vsub.f32 %v2140_v57, %v470_v12  ;;  %v1920_v37 = vmov 29  }
 0x142   : > { %v444_v60 = vsel %vm440_vm3, %v439_v28, 0.0  ;;  %v564_v52 = vand.u32 2147483647, %v562_v48 }
 0x143   : > { %v432_v61 = vsub.f32 %v417_v58, %v430_v59  ;;  %445 = vadd.xlane.f32.xlu1 %v444_v60  ;;  %v458_v59 = vand.u32 2147483647, %v456_v32 }
 0x145   : > { %v434_v63 = vmul.f32 1.442695, %v432_v61  ;;  %1700 = vset.pattern.permute.xlu2 %v1915_v34  ;;  %v473_v61 = vand.u32 2147483647, %v471_v56 }
 0x146   : > { %655 = vperm.xlu2 %1700, %v2048_v9  }
 0x147   : > { %1780 = vpow2.f32 %v434_v63  ;;  %v460_v63 = vsub.f32 0.0, %v458_v59 }
 0x148   : > { %v468_v1 = vpop.permute.xlu2 %467  ;;  %v498_v6 = vpop.permute.xlu1 %497 }
 0x149   : > { %v472_v13 = vsub.f32 %v468_v1, %v470_v12  ;;  %v502_v25 = vsub.f32 %v498_v6, %v500_v21  ;;  %v475_v1 = vsub.f32 %v460_v63, %v473_v61  ;;  %v1921_v6 = vmov 31  }
 0x14b   : > { %v474_v20 = vand.u32 2147483647, %v472_v13  ;;  %v504_v40 = vand.u32 2147483647, %v502_v25 }
 0x14d   : > { %v1781_v3 = vpop.eup %1780  ;;  %v476_v26 = vsub.f32 %v461_v22, %v474_v20  ;;  %v1922_v22 = vmov 32  }
 0x14e   : > { %1702 = vset.pattern.permute.xlu2 %v1912_v30  ;;  %v438_v4 = vsel %vm2147_vm4, 0.0, %v1781_v3 }
 0x14f   : > { %670 = vperm.xlu2 %1702, %v2048_v9   ;;  %v441_v5 = vsel %vm440_vm3, %v438_v4, 0.0 }
 0x150   : > { %442 = vadd.xlane.f32.xlu0 %v441_v5 }
 0x151   : > { %v479_v34 = vpop.permute.xlu2 %478  ;;  %v528_v15 = vpop.permute.xlu1 %527 }
 0x152   : > { %v532_v41 = vsub.f32 %v528_v15, %v530_v29  ;;  %v486_v28 = vsub.f32 %v479_v34, %v485_v14  ;;  %v503_v34 = vand.u32 2147483647, %v501_v19 }
 0x154   : > { %v534_v24 = vand.u32 2147483647, %v532_v41  ;;  %v488_v0 = vand.u32 2147483647, %v486_v28 }
 0x156   : > { %v490_v5 = vsub.f32 %v475_v1, %v488_v0 }
 0x157   : > { %1705 = vset.pattern.permute.xlu2 %v1916_v38 }
 0x158   : > { %689 = vperm.xlu2 %1705, %v2053_v10  }
 0x159   : > { %v483_v30 = vpop.permute.xlu2 %482 }
 0x15a   : > { %v487_v38 = vsub.f32 %v483_v30, %v485_v14  ;;  %v543_v36 = vpop.permute.xlu1 %542  ;;  %v505_v14 = vsub.f32 %v490_v5, %v503_v34  ;;  %v1924_v5 = vmov 34  }
 0x15b   : > { %v547_v45 = vsub.f32 %v543_v36, %v545_v33  ;;  %v2187_v36 = vld [vmem:[%s2473_s2 + $0x10] sm:$0xff] }
 0x15c   : > { %v489_v23 = vand.u32 2147483647, %v487_v38  ;;  %v602_v41 = vperm.slane %v2187_v36, 1 }
 0x15d   : > { %v549_v50 = vand.u32 2147483647, %v547_v45 }
 0x15e   : > { %v491_v31 = vsub.f32 %v476_v26, %v489_v23 }
 0x160   : > { %1710 = vset.pattern.permute.xlu2 %v1918_v62  ;;  %v506_v46 = vsub.f32 %v491_v31, %v504_v40  ;;  %v581_v62 = vpop.permute.xlu0 %580 }
 0x162   : > { %v509_v18 = vpop.permute.xlu2 %508 }
 0x163   : > { %v516_v3 = vsub.f32 %v509_v18, %v515_v35  ;;  %v600_v30 = vpop.permute.xlu1 %599 }
 0x164   : > { %742 = vperm.xlu0 %1709, %v2048_v9  }
 0x165   : > { %v518_v8 = vand.u32 2147483647, %v516_v3 }
 0x167   : > { %v520_v38 = vsub.f32 %v505_v14, %v518_v8  ;;  %v692_v14 = vperm.slane %v2187_v36, 7 }
 0x168   : > { %v585_v16 = vpop.permute.xlu0 %584 }
 0x16a   : > { %v513_v27 = vpop.permute.xlu2 %512 }
 0x16b   : > { %v517_v42 = vsub.f32 %v513_v27, %v515_v35  ;;  %v587_v27 = vperm.slane %v2187_v36, 0 }
 0x16c   : > { %1711 = vset.pattern.permute.xlu0 %v1919_v44  ;;  %v626_v26 = vpop.permute.xlu1 %625 }
 0x16d   : > { %v519_v47 = vand.u32 2147483647, %v517_v42  ;;  %757 = vperm.xlu0 %1711, %v2048_v9   ;;  %v588_v43 = vsub.f32 %v581_v62, %v587_v27  ;;  %v647_v62 = vperm.slane %v2187_v36, 4 }
 0x16f   : > { %v521_v49 = vsub.f32 %v506_v46, %v519_v47 }
 0x171   : > { %v536_v51 = vsub.f32 %v521_v49, %v534_v24  ;;  %v617_v24 = vperm.slane %v2187_v36, 2  ;;  %v1923_v49 = vmov 33  }
 0x173   : > { %v551_v53 = vsub.f32 %v536_v51, %v549_v50  ;;  %v524_v55 = vpop.permute.xlu2 %523  ;;  %v589_v50 = vsub.f32 %v585_v16, %v587_v27  ;;  %v590_v51 = vand.u32 2147483647, %v588_v43 }
 0x174   : > { %v531_v57 = vsub.f32 %v524_v55, %v530_v29  ;;  %v632_v55 = vperm.slane %v2187_v36, 3 }
 0x175   : > { %1715 = vset.pattern.permute.xlu0 %v1920_v37  ;;  %v566_v58 = vsub.f32 %v551_v53, %v564_v52  ;;  %v604_v52 = vsub.f32 %v600_v30, %v602_v41  ;;  %v591_v56 = vand.u32 2147483647, %v589_v50  ;;  %v592_v59 = vsub.f32 0.0, %v590_v51 }
 0x176   : > { %787 = vperm.xlu0 %1715, %v2048_v9   ;;  %v533_v15 = vand.u32 2147483647, %v531_v57  ;;  %v633_v63 = vsub.f32 %v626_v26, %v632_v55  ;;  %v662_v57 = vperm.slane %v2187_v36, 5 }
 0x177   : > { %v569_v60 = vmul.f32 1.442695, %v566_v58  ;;  %v593_v19 = vsub.f32 0.0, %v591_v56 }
 0x178   : > { %v535_v20 = vsub.f32 %v520_v38, %v533_v15  ;;  %v635_v8 = vand.u32 2147483647, %v633_v63  ;;  %v1927_v63 = vmov 28  }
 0x179   : > { %1782 = vpow2.f32 %v569_v60  ;;  %v606_v60 = vand.u32 2147483647, %v604_v52 }
 0x17b   : > { %v608_v30 = vsub.f32 %v593_v19, %v606_v60  ;;  %v1928_v19 = vmov 30  }
 0x17c   : > { %v539_v4 = vpop.permute.xlu2 %538 }
 0x17d   : > { %v546_v11 = vsub.f32 %v539_v4, %v545_v33  ;;  %v596_v33 = vpop.permute.xlu0 %595 }
 0x17e   : > { %1720 = vset.pattern.permute.xlu0 %v1921_v6  ;;  %v603_v48 = vsub.f32 %v596_v33, %v602_v41 }
 0x17f   : > { %v1783_v7 = vpop.eup %1782  ;;  %821 = vperm.xlu0 %1720, %v2053_v10   ;;  %v548_v17 = vand.u32 2147483647, %v546_v11 }
 0x180   : > { %v572_v12 = vsel %vm2136_vm2, 0.0, %v1783_v7  ;;  %v605_v53 = vand.u32 2147483647, %v603_v48 }
 0x181   : > { %v576_v13 = vsel %vm440_vm3, %v572_v12, 0.0  ;;  %v550_v23 = vsub.f32 %v535_v20, %v548_v17  ;;  %v677_v20 = vperm.slane %v2187_v36, 6 }
 0x182   : > { %577 = vadd.xlane.f32.xlu2 %v576_v13  ;;  %v607_v61 = vsub.f32 %v592_v59, %v605_v53 }
 0x185   : > { %v554_v18 = vpop.permute.xlu2 %553  ;;  %v615_v46 = vpop.permute.xlu0 %614 }
 0x186   : > { %v561_v21 = vsub.f32 %v554_v18, %v560_v39  ;;  %v645_v39 = vpop.permute.xlu1 %644  ;;  %v619_v1 = vsub.f32 %v615_v46, %v617_v24 }
 0x187   : > { %1721 = vset.pattern.permute.xlu0 %v1922_v22  ;;  %v649_v16 = vsub.f32 %v645_v39, %v647_v62 }
 0x188   : > { %v563_v25 = vand.u32 2147483647, %v561_v21  ;;  %844 = vperm.xlu0 %1721, %v2048_v9   ;;  %v621_v12 = vand.u32 2147483647, %v619_v1 }
 0x189   : > { %v651_v33 = vand.u32 2147483647, %v649_v16 }
 0x18a   : > { %v565_v29 = vsub.f32 %v550_v23, %v563_v25  ;;  %v623_v17 = vsub.f32 %v608_v30, %v621_v12 }
 0x18c   : > { %v567_v31 = vmul.f32 1.442695, %v565_v29 }
 0x18d   : > { %v641_v3 = vpop.permute.xlu0 %640 }
 0x18e   : > { %1784 = vpow2.f32 %v567_v31  ;;  %v611_v35 = vpop.permute.xlu2 %610  ;;  %v660_v58 = vpop.permute.xlu1 %659  ;;  %v648_v34 = vsub.f32 %v641_v3, %v647_v62  ;;  %v1925_v31 = vmov 35  }
 0x18f   : > { %v618_v32 = vsub.f32 %v611_v35, %v617_v24  ;;  %v664_v35 = vsub.f32 %v660_v58, %v662_v57 }
 0x190   : > { %848 = vperm.xlu0 %1721, %v2053_v10   ;;  %v650_v18 = vand.u32 2147483647, %v648_v34 }
 0x191   : > { %v620_v28 = vand.u32 2147483647, %v618_v32  ;;  %v1926_v32 = vmov 38  }
 0x193   : > { %v622_v7 = vsub.f32 %v607_v61, %v620_v28 }
 0x194   : > { %v1785_v40 = vpop.eup %1784 }
 0x195   : > { %v571_v42 = vsel %vm2147_vm4, 0.0, %v1785_v40  ;;  %v637_v15 = vsub.f32 %v622_v7, %v635_v8  ;;  %v675_v27 = vpop.permute.xlu0 %674 }
 0x196   : > { %v573_v45 = vsel %vm440_vm3, %v571_v42, 0.0  ;;  %v686_v38 = vpop.permute.xlu1 %685  ;;  %v679_v36 = vsub.f32 %v675_v27, %v677_v20 }
 0x197   : > { %v630_v47 = vpop.permute.xlu2 %629  ;;  %574 = vadd.xlane.f32.xlu1 %v573_v45  ;;  %v693_v25 = vsub.f32 %v686_v38, %v692_v14  ;;  %v652_v26 = vsub.f32 %v637_v15, %v650_v18  ;;  %v666_v45 = vand.u32 2147483647, %v664_v35 }
 0x198   : > { %1722 = vset.pattern.permute.xlu0 %v1923_v49  ;;  %v634_v4 = vsub.f32 %v630_v47, %v632_v55  ;;  %v681_v50 = vand.u32 2147483647, %v679_v36 }
 0x199   : > { %859 = vperm.xlu0 %1722, %v2048_v9   ;;  %v695_v42 = vand.u32 2147483647, %v693_v25 }
 0x19a   : > { %v636_v13 = vand.u32 2147483647, %v634_v4 }
 0x19c   : > { %v638_v22 = vsub.f32 %v623_v17, %v636_v13 }
 0x19e   : > { %v653_v41 = vsub.f32 %v638_v22, %v651_v33 }
 0x1a0   : > { %v656_v0 = vpop.permute.xlu2 %655  ;;  %v668_v47 = vsub.f32 %v653_v41, %v666_v45 }
 0x1a1   : > { %1725 = vset.pattern.permute.xlu0 %v1924_v5  ;;  %v663_v11 = vsub.f32 %v656_v0, %v662_v57  ;;  %v713_v0 = vpop.permute.xlu0 %712 }
 0x1a2   : > { %878 = vperm.xlu0 %1725, %v2053_v10   ;;  %v683_v52 = vsub.f32 %v668_v47, %v681_v50 }
 0x1a3   : > { %v665_v21 = vand.u32 2147483647, %v663_v11 }
 0x1a5   : > { %v667_v39 = vsub.f32 %v652_v26, %v665_v21 }
 0x1a9   : > { %v671_v23 = vpop.permute.xlu2 %670 }
 0x1aa   : > { %v678_v29 = vsub.f32 %v671_v23, %v677_v20  ;;  %1727 = vset.pattern.permute.xlu0 %v1925_v31 }
 0x1ab   : > { %893 = vperm.xlu0 %1727, %v2053_v10  }
 0x1ac   : > { %v680_v40 = vand.u32 2147483647, %v678_v29 }
 0x1ae   : > { %v682_v43 = vsub.f32 %v667_v39, %v680_v40 }
 0x1b0   : > { %v697_v46 = vsub.f32 %v682_v43, %v695_v42 }
 0x1b2   : > { %v699_v48 = vmul.f32 1.442695, %v697_v46  ;;  %v690_v24 = vpop.permute.xlu2 %689 }
 0x1b3   : > { %v694_v51 = vsub.f32 %v690_v24, %v692_v14  ;;  %1732 = vset.pattern.permute.xlu0 %v1926_v32 }
 0x1b4   : > { %1786 = vpow2.f32 %v699_v48  ;;  %934 = vperm.xlu0 %1732, %v2048_v9  }
 0x1b5   : > { %v696_v53 = vand.u32 2147483647, %v694_v51 }
 0x1b6   : > { %v446_v3 = vpop.xlane.xlu1 %445 }
 0x1b7   : > { %v698_v55 = vsub.f32 %v683_v52, %v696_v53 }
 0x1b9   : > { %v701_v56 = vmul.f32 1.442695, %v698_v55 }
 0x1ba   : > { %v1787_v58 = vpop.eup %1786 }
 0x1bb   : > { %1788 = vpow2.f32 %v701_v56  ;;  %v703_v59 = vsel %vm2147_vm4, 0.0, %v1787_v58 }
 0x1bc   : > { %v705_v28 = vsel %vm440_vm3, %v703_v59, 0.0 }
 0x1bd   : > { %706 = vadd.xlane.f32.xlu1 %v705_v28 }
 0x1c1   : > { %v1789_v60 = vpop.eup %1788 }
 0x1c2   : > { %v704_v61 = vsel %vm2136_vm2, 0.0, %v1789_v60 }
 0x1c3   : > { %v708_v62 = vsel %vm440_vm3, %v704_v61, 0.0 }
 0x1c4   : > { %709 = vadd.xlane.f32.xlu2 %v708_v62 }
 0x1d6   : > { %731 = vperm.xlu1 %1708, %v2053_v10  }
 0x1dc   : > { %746 = vperm.xlu2 %1710, %v2053_v10  }
 0x1de   : > { %1712 = vset.pattern.permute.xlu1 %v1919_v44  ;;  %v717_v44 = vpop.permute.xlu0 %716 }
 0x1df   : > { %761 = vperm.xlu1 %1712, %v2053_v10  }
 0x1e4   : > { %1713 = vset.pattern.permute.xlu2 %v1927_v63 }
 0x1e5   : > { %772 = vperm.xlu2 %1713, %v2048_v9  }
 0x1e6   : > { %v728_v1 = vpop.permute.xlu0 %727 }
 0x1e7   : > { %1714 = vset.pattern.permute.xlu1 %v1927_v63 }
 0x1e8   : > { %776 = vperm.xlu1 %1714, %v2053_v10  }
 0x1ed   : > { %1716 = vset.pattern.permute.xlu2 %v1920_v37 }
 0x1ee   : > { %791 = vperm.xlu2 %1716, %v2053_v10   ;;  %v443_v37 = vpop.xlane.xlu0 %442 }
 0x1f0   : > { %1717 = vset.pattern.permute.xlu1 %v1928_v19 }
 0x1f1   : > { %802 = vperm.xlu1 %1717, %v2048_v9  }
 0x1f5   : > { %v578_v7 = vpop.xlane.xlu2 %577 }
 0x1f6   : > { %1718 = vset.pattern.permute.xlu2 %v1928_v19 }
 0x1f7   : > { %806 = vperm.xlu2 %1718, %v2053_v10   ;;  %v1373_v10 = vsel %vm1371_vm5, %v446_v3, %v578_v7 }
 0x1f9   : > { %1719 = vset.pattern.permute.xlu1 %v1921_v6 }
 0x1fa   : > { %817 = vperm.xlu1 %1719, %v2048_v9   ;;  %v743_v9 = vpop.permute.xlu0 %742 }
 0x1ff   : > { %1723 = vset.pattern.permute.xlu2 %v1923_v49 }
 0x202   : > { %1724 = vset.pattern.permute.xlu1 %v1924_v5  ;;  %v2236_v5 = vld [vmem:[%s2473_s2 + $0x18] sm:$0xff]  ;;  %v758_v12 = vpop.permute.xlu0 %757 }
 0x203   : > { %v719_v14 = vperm.slane %v2236_v5, 0  ;;  %v734_v16 = vperm.slane %v2236_v5, 1  ;;  %v749_v22 = vperm.slane %v2236_v5, 2  ;;  %v764_v23 = vperm.slane %v2236_v5, 3 }
 0x204   : > { %v794_v39 = vperm.slane %v2236_v5, 5  ;;  %v779_v41 = vperm.slane %v2236_v5, 4  ;;  %v809_v43 = vperm.slane %v2236_v5, 6  ;;  %v824_v47 = vperm.slane %v2236_v5, 7 }
 0x205   : > { %v721_v15 = vsub.f32 %v717_v44, %v719_v14  ;;  %v720_v27 = vsub.f32 %v713_v0, %v719_v14  ;;  %v735_v36 = vsub.f32 %v728_v1, %v734_v16  ;;  %v750_v53 = vsub.f32 %v743_v9, %v749_v22 }
 0x206   : > { %v765_v28 = vsub.f32 %v758_v12, %v764_v23 }
 0x207   : > { %v723_v18 = vand.u32 2147483647, %v721_v15  ;;  %v722_v51 = vand.u32 2147483647, %v720_v27  ;;  %v737_v59 = vand.u32 2147483647, %v735_v36 }
 0x208   : > { %v752_v0 = vand.u32 2147483647, %v750_v53  ;;  %v1929_v27 = vmov 36   ;;  %v1935_v36 = vmov 41   ;;  %v2283_v53 = vld [vmem:[%s2473_s2 + $0x20] sm:$0xff] }
 0x209   : > { %v725_v26 = vsub.f32 0.0, %v723_v18  ;;  %v724_v63 = vsub.f32 0.0, %v722_v51 }
 0x20a   : > { %v575_v4 = vpop.xlane.xlu1 %574  ;;  %v788_v21 = vpop.permute.xlu0 %787 }
 0x20b   : > { %v1372_v57 = vsel %vm1371_vm5, %v443_v37, %v575_v4  ;;  %v739_v3 = vsub.f32 %v724_v63, %v737_v59  ;;  %v767_v37 = vand.u32 2147483647, %v765_v28 }
 0x212   : > { %v822_v52 = vpop.permute.xlu0 %821 }
 0x213   : > { %v826_v60 = vsub.f32 %v822_v52, %v824_v47 }
 0x215   : > { %v828_v4 = vand.u32 2147483647, %v826_v60 }
 0x230   : > { %v707_v30 = vpop.xlane.xlu1 %706 }
 0x231   : > { %v2229_v34 = vsel %vm1374_vm6, %v1372_v57, %v707_v30  ;;  %v754_v30 = vsub.f32 %v739_v3, %v752_v0  ;;  %v896_v0 = vperm.slane %v2283_v53, 3 }
 0x233   : > { %v769_v9 = vsub.f32 %v754_v30, %v767_v37  ;;  %v911_v37 = vperm.slane %v2283_v53, 4 }
 0x237   : > { %v710_v8 = vpop.xlane.xlu2 %709 }
 0x238   : > { %v2231_v6 = vsel %vm1374_vm6, %v1373_v10, %v710_v8 }
 0x23f   : > { %v747_v11 = vpop.permute.xlu2 %746 }
 0x240   : > { %v751_v29 = vsub.f32 %v747_v11, %v749_v22  ;;  %v795_v11 = vsub.f32 %v788_v21, %v794_v39 }
 0x242   : > { %v753_v40 = vand.u32 2147483647, %v751_v29  ;;  %v797_v14 = vand.u32 2147483647, %v795_v11 }
 0x247   : > { %v773_v49 = vpop.permute.xlu2 %772 }
 0x248   : > { %v732_v13 = vpop.permute.xlu1 %731  ;;  %v780_v19 = vsub.f32 %v773_v49, %v779_v41 }
 0x249   : > { %v736_v38 = vsub.f32 %v732_v13, %v734_v16 }
 0x24a   : > { %v782_v10 = vand.u32 2147483647, %v780_v19 }
 0x24b   : > { %v738_v25 = vand.u32 2147483647, %v736_v38 }
 0x24c   : > { %v784_v13 = vsub.f32 %v769_v9, %v782_v10 }
 0x24d   : > { %v740_v35 = vsub.f32 %v725_v26, %v738_v25 }
 0x24e   : > { %v799_v49 = vsub.f32 %v784_v13, %v797_v14  ;;  %v1937_v13 = vmov 45   ;;  %v941_v14 = vperm.slane %v2283_v53, 6 }
 0x24f   : > { %v792_v17 = vpop.permute.xlu2 %791  ;;  %v755_v24 = vsub.f32 %v740_v35, %v753_v40  ;;  %v2252_v35 = vld [vmem:[#allocation2] sm:$0xff]  ;;  %v1930_v40 = vmov 37  }
 0x250   : > { %v796_v48 = vsub.f32 %v792_v17, %v794_v39  ;;  %v2255_v39 = vld [vmem:[#allocation2 + $0x8] sm:$0xff] }
 0x251   : > { %v762_v20 = vpop.permute.xlu1 %761 }
 0x252   : > { %v766_v33 = vsub.f32 %v762_v20, %v764_v23  ;;  %v798_v61 = vand.u32 2147483647, %v796_v48 }
 0x254   : > { %v768_v42 = vand.u32 2147483647, %v766_v33 }
 0x256   : > { %v770_v55 = vsub.f32 %v755_v24, %v768_v42  ;;  %v1933_v42 = vmov 40  }
 0x257   : > { %v807_v45 = vpop.permute.xlu2 %806 }
 0x258   : > { %v811_v56 = vsub.f32 %v807_v45, %v809_v43 }
 0x25a   : > { %v777_v46 = vpop.permute.xlu1 %776  ;;  %v813_v44 = vand.u32 2147483647, %v811_v56  ;;  %v851_v56 = vperm.slane %v2283_v53, 0 }
 0x25b   : > { %v781_v50 = vsub.f32 %v777_v46, %v779_v41  ;;  %v1931_v41 = vmov 39  }
 0x25d   : > { %v783_v58 = vand.u32 2147483647, %v781_v50 }
 0x25f   : > { %v785_v62 = vsub.f32 %v770_v55, %v783_v58  ;;  %v1936_v55 = vmov 44   ;;  %v866_v58 = vperm.slane %v2283_v53, 1 }
 0x261   : > { %v800_v1 = vsub.f32 %v785_v62, %v798_v61  ;;  %v881_v61 = vperm.slane %v2283_v53, 2 }
 0x263   : > { %v815_v57 = vsub.f32 %v800_v1, %v813_v44  ;;  %v803_v7 = vpop.permute.xlu1 %802 }
 0x264   : > { %v810_v5 = vsub.f32 %v803_v7, %v809_v43  ;;  %v1934_v43 = vmov 43  }
 0x265   : > { %v830_v8 = vsub.f32 %v815_v57, %v828_v4  ;;  %1741 = vset.pattern.permute.xlu0 %v1934_v43 }
 0x266   : > { %v812_v15 = vand.u32 2147483647, %v810_v5 }
 0x267   : > { %v833_v12 = vmul.f32 1.442695, %v830_v8 }
 0x268   : > { %v814_v18 = vsub.f32 %v799_v49, %v812_v15 }
 0x269   : > { %1790 = vpow2.f32 %v833_v12  ;;  %v926_v12 = vperm.slane %v2283_v53, 5 }
 0x26c   : > { %v818_v16 = vpop.permute.xlu1 %817 }
 0x26d   : > { %v825_v38 = vsub.f32 %v818_v16, %v824_v47 }
 0x26f   : > { %v1791_v17 = vpop.eup %1790  ;;  %v827_v20 = vand.u32 2147483647, %v825_v38 }
 0x270   : > { %v836_v22 = vsel %vm2136_vm2, 0.0, %v1791_v17 }
 0x271   : > { %v829_v23 = vsub.f32 %v814_v18, %v827_v20  ;;  %v840_v25 = vsel %vm440_vm3, %v836_v22, 0.0 }
 0x272   : > { %841 = vadd.xlane.f32.xlu1 %v840_v25 }
 0x273   : > { %v831_v21 = vmul.f32 1.442695, %v829_v23 }
 0x275   : > { %1792 = vpow2.f32 %v831_v21 }
 0x27b   : > { %v1793_v26 = vpop.eup %1792 }
 0x27c   : > { %v835_v29 = vsel %vm2147_vm4, 0.0, %v1793_v26 }
 0x27d   : > { %v837_v33 = vsel %vm440_vm3, %v835_v29, 0.0  ;;  %v956_v29 = vperm.slane %v2283_v53, 7 }
 0x27e   : > { %838 = vadd.xlane.f32.xlu2 %v837_v33 }
 0x28b   : > { %874 = vperm.xlu1 %1724, %v2252_v35  }
 0x293   : > { %1729 = vset.pattern.permute.xlu1 %v1929_v27 }
 0x294   : > { %908 = vperm.xlu1 %1729, %v2255_v39  }
 0x296   : > { %863 = vperm.xlu2 %1723, %v2255_v39  }
 0x29c   : > { %1731 = vset.pattern.permute.xlu1 %v1930_v40 }
 0x29d   : > { %923 = vperm.xlu1 %1731, %v2255_v39  }
 0x29e   : > { %1726 = vset.pattern.permute.xlu2 %v1925_v31  ;;  %v1932_v31 = vmov 42  }
 0x29f   : > { %889 = vperm.xlu2 %1726, %v2252_v35  }
 0x2a5   : > { %1734 = vset.pattern.permute.xlu1 %v1931_v41 }
 0x2a6   : > { %949 = vperm.xlu1 %1734, %v2252_v35  }
 0x2a7   : > { %1728 = vset.pattern.permute.xlu2 %v1929_v27 }
 0x2a8   : > { %904 = vperm.xlu2 %1728, %v2252_v35  }
 0x2ae   : > { %1739 = vset.pattern.permute.xlu1 %v1932_v31 }
 0x2b0   : > { %1730 = vset.pattern.permute.xlu2 %v1930_v40 }
 0x2b1   : > { %919 = vperm.xlu2 %1730, %v2252_v35  }
 0x2b9   : > { %1733 = vset.pattern.permute.xlu2 %v1926_v32  ;;  %v845_v32 = vpop.permute.xlu0 %844 }
 0x2ba   : > { %938 = vperm.xlu2 %1733, %v2255_v39   ;;  %v852_v59 = vsub.f32 %v845_v32, %v851_v56  ;;  %v1938_v32 = vmov 46  }
 0x2bc   : > { %v854_v63 = vand.u32 2147483647, %v852_v59 }
 0x2be   : > { %v856_v57 = vsub.f32 0.0, %v854_v63  ;;  %v1939_v63 = vmov 47  }
 0x2c1   : > { %v849_v47 = vpop.permute.xlu0 %848 }
 0x2c2   : > { %1735 = vset.pattern.permute.xlu2 %v1931_v41  ;;  %v853_v4 = vsub.f32 %v849_v47, %v851_v56 }
 0x2c3   : > { %953 = vperm.xlu2 %1735, %v2255_v39  }
 0x2c4   : > { %v855_v5 = vand.u32 2147483647, %v853_v4 }
 0x2c6   : > { %v857_v22 = vsub.f32 0.0, %v855_v5 }
 0x2c9   : > { %v860_v50 = vpop.permute.xlu0 %859 }
 0x2ca   : > { %v867_v60 = vsub.f32 %v860_v50, %v866_v58 }
 0x2cb   : > { %1736 = vset.pattern.permute.xlu2 %v1933_v42 }
 0x2cc   : > { %976 = vperm.xlu2 %1736, %v2252_v35   ;;  %v869_v1 = vand.u32 2147483647, %v867_v60 }
 0x2ce   : > { %v871_v8 = vsub.f32 %v856_v57, %v869_v1 }
 0x2d4   : > { %980 = vperm.xlu2 %1736, %v2255_v39  }
 0x2dc   : > { %1737 = vset.pattern.permute.xlu2 %v1935_v36 }
 0x2dd   : > { %991 = vperm.xlu2 %1737, %v2252_v35  }
 0x2e5   : > { %995 = vperm.xlu2 %1737, %v2255_v39   ;;  %v842_v45 = vpop.xlane.xlu1 %841 }
 0x2e6   : > { %v2273_v46 = vsel %vm1377_vm7, %v2231_v6, %v842_v45  ;;  %v879_v6 = vpop.permute.xlu0 %878 }
 0x2e7   : > { %v883_v23 = vsub.f32 %v879_v6, %v881_v61 }
 0x2e9   : > { %v885_v40 = vand.u32 2147483647, %v883_v23  ;;  %v1943_v23 = vmov 51  }
 0x2ed   : > { %1738 = vset.pattern.permute.xlu2 %v1932_v31 }
 0x2ee   : > { %1006 = vperm.xlu2 %1738, %v2252_v35   ;;  %v894_v62 = vpop.permute.xlu0 %893 }
 0x2ef   : > { %v898_v41 = vsub.f32 %v894_v62, %v896_v0 }
 0x2f1   : > { %v839_v48 = vpop.xlane.xlu2 %838 }
 0x2f2   : > { %v2277_v24 = vsel %vm1377_vm7, %v2229_v34, %v839_v48 }
 0x2f6   : > { %1740 = vset.pattern.permute.xlu2 %v1934_v43  ;;  %v935_v38 = vpop.permute.xlu0 %934 }
 0x2f7   : > { %1021 = vperm.xlu2 %1740, %v2252_v35   ;;  %v942_v21 = vsub.f32 %v935_v38, %v941_v14 }
 0x2f9   : > { %v864_v51 = vpop.permute.xlu2 %863  ;;  %v944_v43 = vand.u32 2147483647, %v942_v21 }
 0x2fa   : > { %v868_v10 = vsub.f32 %v864_v51, %v866_v58 }
 0x2fc   : > { %v870_v17 = vand.u32 2147483647, %v868_v10 }
 0x2fd   : > { %v875_v52 = vpop.permute.xlu1 %874 }
 0x2fe   : > { %v882_v19 = vsub.f32 %v875_v52, %v881_v61  ;;  %v872_v33 = vsub.f32 %v857_v22, %v870_v17  ;;  %v900_v52 = vand.u32 2147483647, %v898_v41  ;;  %v1942_v22 = vmov 50  }
 0x2ff   : > { %1742 = vset.pattern.permute.xlu2 %v1936_v55 }
 0x300   : > { %1036 = vperm.xlu2 %1742, %v2252_v35   ;;  %v884_v7 = vand.u32 2147483647, %v882_v19  ;;  %v887_v47 = vsub.f32 %v872_v33, %v885_v40 }
 0x301   : > { %v890_v34 = vpop.permute.xlu2 %889 }
 0x302   : > { %v897_v3 = vsub.f32 %v890_v34, %v896_v0  ;;  %v886_v15 = vsub.f32 %v871_v8, %v884_v7  ;;  %v902_v56 = vsub.f32 %v887_v47, %v900_v52  ;;  %v1940_v7 = vmov 48  }
 0x304   : > { %v899_v9 = vand.u32 2147483647, %v897_v3 }
 0x306   : > { %v909_v28 = vpop.permute.xlu1 %908  ;;  %v901_v20 = vsub.f32 %v886_v15, %v899_v9 }
 0x307   : > { %v913_v31 = vsub.f32 %v909_v28, %v911_v37 }
 0x308   : > { %1040 = vperm.xlu2 %1742, %v2255_v39  }
 0x309   : > { %v905_v44 = vpop.permute.xlu2 %904  ;;  %v915_v53 = vand.u32 2147483647, %v913_v31 }
 0x30a   : > { %v912_v30 = vsub.f32 %v905_v44, %v911_v37 }
 0x30b   : > { %v917_v59 = vsub.f32 %v902_v56, %v915_v53 }
 0x30c   : > { %v914_v16 = vand.u32 2147483647, %v912_v30  ;;  %v2307_v30 = vld [vmem:[%s2473_s2 + $0x28] sm:$0xff] }
 0x30d   : > { %v983_v8 = vperm.slane %v2307_v30, 0  ;;  %v1058_v56 = vperm.slane %v2307_v30, 5 }
 0x30e   : > { %v916_v26 = vsub.f32 %v901_v20, %v914_v16 }
 0x30f   : > { %v924_v11 = vpop.permute.xlu1 %923 }
 0x310   : > { %1744 = vset.pattern.permute.xlu2 %v1937_v13  ;;  %v928_v48 = vsub.f32 %v924_v11, %v926_v12 }
 0x311   : > { %1055 = vperm.xlu2 %1744, %v2255_v39   ;;  %v920_v49 = vpop.permute.xlu2 %919 }
 0x312   : > { %v927_v18 = vsub.f32 %v920_v49, %v926_v12  ;;  %v930_v34 = vand.u32 2147483647, %v928_v48 }
 0x314   : > { %v929_v25 = vand.u32 2147483647, %v927_v18  ;;  %v932_v61 = vsub.f32 %v917_v59, %v930_v34  ;;  %v1941_v18 = vmov 49  }
 0x316   : > { %v931_v27 = vsub.f32 %v916_v26, %v929_v25  ;;  %v1944_v25 = vmov 52   ;;  %v1946_v26 = vmov 54  }
 0x318   : > { %v950_v42 = vpop.permute.xlu1 %949  ;;  %v946_v50 = vsub.f32 %v931_v27, %v944_v43 }
 0x319   : > { %v957_v36 = vsub.f32 %v950_v42, %v956_v29  ;;  %1746 = vset.pattern.permute.xlu2 %v1938_v32  ;;  %v939_v45 = vpop.permute.xlu2 %938 }
 0x31a   : > { %1070 = vperm.xlu2 %1746, %v2255_v39   ;;  %v943_v6 = vsub.f32 %v939_v45, %v941_v14  ;;  %v998_v14 = vperm.slane %v2307_v30, 1 }
 0x31b   : > { %v959_v51 = vand.u32 2147483647, %v957_v36 }
 0x31c   : > { %v945_v28 = vand.u32 2147483647, %v943_v6  ;;  %v1028_v6 = vperm.slane %v2307_v30, 3 }
 0x31d   : > { %v961_v55 = vsub.f32 %v946_v50, %v959_v51  ;;  %v1013_v50 = vperm.slane %v2307_v30, 2 }
 0x31e   : > { %v947_v0 = vsub.f32 %v932_v61, %v945_v28  ;;  %v1073_v28 = vperm.slane %v2307_v30, 6 }
 0x31f   : > { %v963_v58 = vmul.f32 1.442695, %v961_v55 }
 0x321   : > { %1794 = vpow2.f32 %v963_v58  ;;  %v954_v60 = vpop.permute.xlu2 %953 }
 0x322   : > { %v958_v62 = vsub.f32 %v954_v60, %v956_v29  ;;  %1748 = vset.pattern.permute.xlu2 %v1939_v63 }
 0x323   : > { %1085 = vperm.xlu2 %1748, %v2255_v39  }
 0x324   : > { %v960_v19 = vand.u32 2147483647, %v958_v62  ;;  %v1088_v62 = vperm.slane %v2307_v30, 7 }
 0x326   : > { %v962_v44 = vsub.f32 %v947_v0, %v960_v19 }
 0x327   : > { %v1795_v1 = vpop.eup %1794 }
 0x328   : > { %v965_v3 = vmul.f32 1.442695, %v962_v44  ;;  %v967_v37 = vsel %vm2147_vm4, 0.0, %v1795_v1 }
 0x329   : > { %v977_v4 = vpop.permute.xlu2 %976  ;;  %v969_v57 = vsel %vm440_vm3, %v967_v37, 0.0 }
 0x32a   : > { %1796 = vpow2.f32 %v965_v3  ;;  %970 = vadd.xlane.f32.xlu1 %v969_v57  ;;  %v984_v12 = vsub.f32 %v977_v4, %v983_v8 }
 0x32b   : > { %1749 = vset.pattern.permute.xlu2 %v1940_v7 }
 0x32c   : > { %1108 = vperm.xlu2 %1749, %v2252_v35   ;;  %v986_v15 = vand.u32 2147483647, %v984_v12 }
 0x32e   : > { %v988_v38 = vsub.f32 0.0, %v986_v15 }
 0x330   : > { %v1797_v10 = vpop.eup %1796 }
 0x331   : > { %v981_v9 = vpop.permute.xlu2 %980  ;;  %v968_v11 = vsel %vm2136_vm2, 0.0, %v1797_v10 }
 0x332   : > { %v972_v5 = vsel %vm440_vm3, %v968_v11, 0.0 }
 0x333   : > { %973 = vadd.xlane.f32.xlu0 %v972_v5 }
 0x334   : > { %1112 = vperm.xlu2 %1749, %v2255_v39  }
 0x339   : > { %v992_v16 = vpop.permute.xlu2 %991 }
 0x33a   : > { %v999_v49 = vsub.f32 %v992_v16, %v998_v14 }
 0x33c   : > { %v1001_v17 = vand.u32 2147483647, %v999_v49  ;;  %1750 = vset.pattern.permute.xlu2 %v1941_v18 }
 0x33d   : > { %1123 = vperm.xlu2 %1750, %v2252_v35  }
 0x33e   : > { %v2316_v20 = vsub.f32 %v988_v38, %v1001_v17 }
 0x341   : > { %v996_v21 = vpop.permute.xlu2 %995 }
 0x342   : > { %v1000_v45 = vsub.f32 %v996_v21, %v998_v14 }
 0x343   : > { %1010 = vperm.xlu1 %1739, %v2255_v39  }
 0x344   : > { %v1002_v52 = vand.u32 2147483647, %v1000_v45 }
 0x345   : > { %1127 = vperm.xlu2 %1750, %v2255_v39  }
 0x347   : > { %1025 = vperm.xlu0 %1741, %v2255_v39  }
 0x349   : > { %v1007_v29 = vpop.permute.xlu2 %1006 }
 0x34b   : > { %1743 = vset.pattern.permute.xlu1 %v1937_v13  ;;  %v1945_v13 = vmov 53  }
 0x34c   : > { %1051 = vperm.xlu1 %1743, %v2252_v35  }
 0x34d   : > { %1751 = vset.pattern.permute.xlu2 %v1942_v22 }
 0x34e   : > { %1138 = vperm.xlu2 %1751, %v2252_v35  }
 0x34f   : > { %1752 = vset.pattern.permute.xlu0 %v1942_v22 }
 0x351   : > { %v1022_v33 = vpop.permute.xlu2 %1021 }
 0x352   : > { %v1029_v12 = vsub.f32 %v1022_v33, %v1028_v6 }
 0x354   : > { %1745 = vset.pattern.permute.xlu1 %v1938_v32  ;;  %v985_v32 = vsub.f32 %v981_v9, %v983_v8  ;;  %v1014_v9 = vsub.f32 %v1007_v29, %v1013_v50  ;;  %v1031_v38 = vand.u32 2147483647, %v1029_v12 }
 0x355   : > { %1066 = vperm.xlu1 %1745, %v2252_v35  }
 0x356   : > { %1754 = vset.pattern.permute.xlu2 %v1943_v23  ;;  %v987_v48 = vand.u32 2147483647, %v985_v32  ;;  %v1016_v15 = vand.u32 2147483647, %v1014_v9 }
 0x357   : > { %1157 = vperm.xlu2 %1754, %v2255_v39  }
 0x358   : > { %v989_v55 = vsub.f32 0.0, %v987_v48  ;;  %v1018_v18 = vsub.f32 %v2316_v20, %v1016_v15 }
 0x35a   : > { %v1037_v27 = vpop.permute.xlu2 %1036  ;;  %v1004_v58 = vsub.f32 %v989_v55, %v1002_v52  ;;  %v1949_v55 = vmov 56  }
 0x35d   : > { %1747 = vset.pattern.permute.xlu1 %v1939_v63 }
 0x35e   : > { %1081 = vperm.xlu1 %1747, %v2252_v35  }
 0x35f   : > { %1755 = vset.pattern.permute.xlu2 %v1944_v25  ;;  %v1033_v25 = vsub.f32 %v1018_v18, %v1031_v38 }
 0x360   : > { %1168 = vperm.xlu2 %1755, %v2252_v35  }
 0x362   : > { %v1041_v31 = vpop.permute.xlu2 %1040 }
 0x366   : > { %1753 = vset.pattern.permute.xlu1 %v1943_v23 }
 0x368   : > { %1172 = vperm.xlu2 %1755, %v2255_v39  }
 0x36b   : > { %v1056_v36 = vpop.permute.xlu2 %1055 }
 0x36c   : > { %v1060_v61 = vsub.f32 %v1056_v36, %v1058_v56 }
 0x36e   : > { %v1062_v4 = vand.u32 2147483647, %v1060_v61 }
 0x370   : > { %1757 = vset.pattern.permute.xlu2 %v1945_v13 }
 0x371   : > { %1187 = vperm.xlu2 %1757, %v2255_v39  }
 0x374   : > { %v1071_v47 = vpop.permute.xlu2 %1070 }
 0x375   : > { %v1075_v1 = vsub.f32 %v1071_v47, %v1073_v28 }
 0x377   : > { %v1077_v10 = vand.u32 2147483647, %v1075_v1 }
 0x379   : > { %1759 = vset.pattern.permute.xlu2 %v1946_v26 }
 0x37a   : > { %1202 = vperm.xlu2 %1759, %v2255_v39  }
 0x37d   : > { %v1086_v19 = vpop.permute.xlu2 %1085 }
 0x37e   : > { %v1090_v57 = vsub.f32 %v1086_v19, %v1088_v62  ;;  %v2378_v19 = vld [vmem:[%s2473_s2 + $0x30] sm:$0xff] }
 0x37f   : > { %v1130_v1 = vperm.slane %v2378_v19, 1  ;;  %v1160_v9 = vperm.slane %v2378_v19, 3 }
 0x380   : > { %v1092_v11 = vand.u32 2147483647, %v1090_v57 }
 0x39d   : > { %v971_v40 = vpop.xlane.xlu1 %970 }
 0x39e   : > { %v2335_v41 = vsel %vm1380_vm8, %v2277_v24, %v971_v40  ;;  %v1043_v24 = vperm.slane %v2307_v30, 4 }
 0x3a0   : > { %v1045_v59 = vsub.f32 %v1041_v31, %v1043_v24  ;;  %v1044_v16 = vsub.f32 %v1037_v27, %v1043_v24  ;;  %v1109_v24 = vpop.permute.xlu2 %1108 }
 0x3a2   : > { %v1047_v44 = vand.u32 2147483647, %v1045_v59  ;;  %v1046_v22 = vand.u32 2147483647, %v1044_v16 }
 0x3a4   : > { %v1048_v40 = vsub.f32 %v1033_v25, %v1046_v22  ;;  %v1190_v22 = vperm.slane %v2378_v19, 5 }
 0x3a6   : > { %v974_v42 = vpop.xlane.xlu0 %973 }
 0x3a7   : > { %v2338_v43 = vsel %vm1380_vm8, %v2273_v46, %v974_v42 }
 0x3b5   : > { %v1011_v51 = vpop.permute.xlu1 %1010 }
 0x3b6   : > { %v1015_v53 = vsub.f32 %v1011_v51, %v1013_v50 }
 0x3b8   : > { %v1017_v34 = vand.u32 2147483647, %v1015_v53  ;;  %v1947_v53 = vmov 57  }
 0x3b9   : > { %v1026_v46 = vpop.permute.xlu0 %1025  ;;  %1764 = vset.pattern.permute.xlu2 %v1947_v53 }
 0x3ba   : > { %v1030_v60 = vsub.f32 %v1026_v46, %v1028_v6  ;;  %v1019_v63 = vsub.f32 %v1004_v58, %v1017_v34  ;;  %v1948_v6 = vmov 55   ;;  %v1952_v46 = vmov 62  }
 0x3bc   : > { %v1032_v0 = vand.u32 2147483647, %v1030_v60 }
 0x3be   : > { %v1034_v3 = vsub.f32 %v1019_v63, %v1032_v0  ;;  %v1052_v37 = vpop.permute.xlu1 %1051 }
 0x3bf   : > { %v1059_v17 = vsub.f32 %v1052_v37, %v1058_v56  ;;  %v1951_v56 = vmov 59  }
 0x3c0   : > { %v1049_v7 = vsub.f32 %v1034_v3, %v1047_v44  ;;  %v1115_v44 = vperm.slane %v2378_v19, 0 }
 0x3c1   : > { %v1061_v21 = vand.u32 2147483647, %v1059_v17 }
 0x3c2   : > { %v1064_v8 = vsub.f32 %v1049_v7, %v1062_v4  ;;  %v1116_v37 = vsub.f32 %v1109_v24, %v1115_v44 }
 0x3c3   : > { %v1063_v36 = vsub.f32 %v1048_v40, %v1061_v21 }
 0x3c4   : > { %v1079_v5 = vsub.f32 %v1064_v8, %v1077_v10  ;;  %v1118_v8 = vand.u32 2147483647, %v1116_v37 }
 0x3c6   : > { %v1094_v14 = vsub.f32 %v1079_v5, %v1092_v11  ;;  %v1120_v15 = vsub.f32 0.0, %v1118_v8 }
 0x3c7   : > { %v1067_v30 = vpop.permute.xlu1 %1066 }
 0x3c8   : > { %v1097_v49 = vmul.f32 1.442695, %v1094_v14  ;;  %v1074_v23 = vsub.f32 %v1067_v30, %v1073_v28  ;;  %v1175_v30 = vperm.slane %v2378_v19, 4 }
 0x3ca   : > { %1798 = vpow2.f32 %v1097_v49  ;;  %v1076_v31 = vand.u32 2147483647, %v1074_v23 }
 0x3cc   : > { %v1078_v45 = vsub.f32 %v1063_v36, %v1076_v31 }
 0x3d0   : > { %v1799_v29 = vpop.eup %1798  ;;  %v1082_v42 = vpop.permute.xlu1 %1081 }
 0x3d1   : > { %v1089_v33 = vsub.f32 %v1082_v42, %v1088_v62  ;;  %v1100_v27 = vsel %vm2136_vm2, 0.0, %v1799_v29 }
 0x3d2   : > { %v1104_v32 = vsel %vm440_vm3, %v1100_v27, 0.0 }
 0x3d3   : > { %v1091_v47 = vand.u32 2147483647, %v1089_v33  ;;  %1105 = vadd.xlane.f32.xlu1 %v1104_v32 }
 0x3d5   : > { %v1093_v48 = vsub.f32 %v1078_v45, %v1091_v47 }
 0x3d7   : > { %v1095_v20 = vmul.f32 1.442695, %v1093_v48  ;;  %v1220_v48 = vperm.slane %v2378_v19, 7 }
 0x3d9   : > { %1800 = vpow2.f32 %v1095_v20 }
 0x3df   : > { %v1801_v50 = vpop.eup %1800 }
 0x3e0   : > { %v1099_v51 = vsel %vm2147_vm4, 0.0, %v1801_v50  ;;  %v1205_v50 = vperm.slane %v2378_v19, 6 }
 0x3e1   : > { %v1101_v52 = vsel %vm440_vm3, %v1099_v51, 0.0 }
 0x3e2   : > { %1102 = vadd.xlane.f32.xlu0 %v1101_v52 }
 0x3ec   : > { %1153 = vperm.xlu1 %1753, %v2252_v35  }
 0x3f4   : > { %1756 = vset.pattern.permute.xlu1 %v1945_v13  ;;  %v1950_v13 = vmov 58  }
 0x3f5   : > { %1183 = vperm.xlu1 %1756, %v2252_v35  }
 0x3f6   : > { %1142 = vperm.xlu0 %1752, %v2255_v39  }
 0x3fd   : > { %1758 = vset.pattern.permute.xlu1 %v1946_v26  ;;  %v1113_v26 = vpop.permute.xlu2 %1112 }
 0x3fe   : > { %1760 = vset.pattern.permute.xlu0 %v1948_v6  ;;  %1198 = vperm.xlu1 %1758, %v2252_v35   ;;  %v1117_v57 = vsub.f32 %v1113_v26, %v1115_v44 }
 0x3ff   : > { %1213 = vperm.xlu0 %1760, %v2252_v35  }
 0x400   : > { %v1119_v11 = vand.u32 2147483647, %v1117_v57 }
 0x402   : > { %v1121_v38 = vsub.f32 0.0, %v1119_v11 }
 0x405   : > { %v1124_v34 = vpop.permute.xlu2 %1123 }
 0x406   : > { %1761 = vset.pattern.permute.xlu1 %v1948_v6  ;;  %v1131_v7 = vsub.f32 %v1124_v34, %v1130_v1 }
 0x407   : > { %1762 = vset.pattern.permute.xlu0 %v1949_v55  ;;  %1217 = vperm.xlu1 %1761, %v2255_v39  }
 0x408   : > { %1240 = vperm.xlu0 %1762, %v2252_v35   ;;  %v1133_v5 = vand.u32 2147483647, %v1131_v7 }
 0x40a   : > { %v1135_v18 = vsub.f32 %v1120_v15, %v1133_v5 }
 0x40d   : > { %v1128_v58 = vpop.permute.xlu2 %1127 }
 0x40e   : > { %v1132_v10 = vsub.f32 %v1128_v58, %v1130_v1 }
 0x40f   : > { %1765 = vset.pattern.permute.xlu1 %v1950_v13 }
 0x410   : > { %1244 = vperm.xlu0 %1762, %v2255_v39   ;;  %v1134_v14 = vand.u32 2147483647, %v1132_v10 }
 0x412   : > { %v1136_v40 = vsub.f32 %v1121_v38, %v1134_v14 }
 0x415   : > { %v1139_v59 = vpop.permute.xlu2 %1138 }
 0x418   : > { %1763 = vset.pattern.permute.xlu0 %v1947_v53 }
 0x419   : > { %1255 = vperm.xlu0 %1763, %v2252_v35  }
 0x41d   : > { %v1158_v61 = vpop.permute.xlu2 %1157 }
 0x41e   : > { %v1162_v31 = vsub.f32 %v1158_v61, %v1160_v9 }
 0x420   : > { %v1164_v45 = vand.u32 2147483647, %v1162_v31 }
 0x421   : > { %1766 = vset.pattern.permute.xlu0 %v1950_v13 }
 0x422   : > { %1274 = vperm.xlu0 %1766, %v2255_v39  }
 0x425   : > { %v1169_v62 = vpop.permute.xlu2 %1168 }
 0x426   : > { %v1176_v42 = vsub.f32 %v1169_v62, %v1175_v30 }
 0x428   : > { %v1178_v20 = vand.u32 2147483647, %v1176_v42 }
 0x42a   : > { %1768 = vset.pattern.permute.xlu0 %v1951_v56 }
 0x42b   : > { %1289 = vperm.xlu0 %1768, %v2255_v39  }
 0x42d   : > { %v1173_v4 = vpop.permute.xlu2 %1172 }
 0x42e   : > { %v1177_v47 = vsub.f32 %v1173_v4, %v1175_v30  ;;  %v1954_v30 = vmov 60  }
 0x430   : > { %v1179_v24 = vand.u32 2147483647, %v1177_v47 }
 0x433   : > { %1773 = vset.pattern.permute.xlu0 %v1952_v46 }
 0x434   : > { %1330 = vperm.xlu0 %1773, %v2252_v35  }
 0x435   : > { %v1188_v23 = vpop.permute.xlu2 %1187 }
 0x436   : > { %v1192_v26 = vsub.f32 %v1188_v23, %v1190_v22 }
 0x438   : > { %v1194_v44 = vand.u32 2147483647, %v1192_v26 }
 0x43d   : > { %v1203_v58 = vpop.permute.xlu2 %1202 }
 0x43e   : > { %v1207_v1 = vsub.f32 %v1203_v58, %v1205_v50 }
 0x440   : > { %v1209_v4 = vand.u32 2147483647, %v1207_v1 }
 0x446   : > { %v1106_v28 = vpop.xlane.xlu1 %1105 }
 0x447   : > { %v2370_v60 = vsel %vm1383_vm9, %v2338_v43, %v1106_v28  ;;  %v1145_v43 = vperm.slane %v2378_v19, 2 }
 0x455   : > { %v1103_v63 = vpop.xlane.xlu0 %1102 }
 0x456   : > { %v2373_v0 = vsel %vm1383_vm9, %v2335_v41, %v1103_v63  ;;  %v1146_v41 = vsub.f32 %v1139_v59, %v1145_v43 }
 0x458   : > { %v1148_v16 = vand.u32 2147483647, %v1146_v41 }
 0x45a   : > { %v1150_v29 = vsub.f32 %v1135_v18, %v1148_v16  ;;  %v1953_v16 = vmov 63  }
 0x45b   : > { %1777 = vset.pattern.permute.xlu0 %v1953_v16 }
 0x45e   : > { %v1154_v3 = vpop.permute.xlu1 %1153 }
 0x45f   : > { %v1161_v12 = vsub.f32 %v1154_v3, %v1160_v9 }
 0x461   : > { %v1163_v25 = vand.u32 2147483647, %v1161_v12 }
 0x463   : > { %v1165_v27 = vsub.f32 %v1150_v29, %v1163_v25 }
 0x465   : > { %v1180_v6 = vsub.f32 %v1165_v27, %v1178_v20 }
 0x467   : > { %v1184_v49 = vpop.permute.xlu1 %1183 }
 0x468   : > { %v1143_v17 = vpop.permute.xlu0 %1142  ;;  %v1191_v36 = vsub.f32 %v1184_v49, %v1190_v22  ;;  %v1955_v49 = vmov 61  }
 0x469   : > { %v1147_v21 = vsub.f32 %v1143_v17, %v1145_v43 }
 0x46a   : > { %v1193_v51 = vand.u32 2147483647, %v1191_v36 }
 0x46b   : > { %v1149_v33 = vand.u32 2147483647, %v1147_v21 }
 0x46c   : > { %v1195_v59 = vsub.f32 %v1180_v6, %v1193_v51 }
 0x46d   : > { %v1151_v32 = vsub.f32 %v1136_v40, %v1149_v33  ;;  %v2415_v40 = vld [vmem:[%s2473_s2 + $0x38] sm:$0xff] }
 0x46e   : > { %v1262_v31 = vperm.slane %v2415_v40, 1  ;;  %v1307_v58 = vperm.slane %v2415_v40, 4 }
 0x46f   : > { %v1166_v52 = vsub.f32 %v1151_v32, %v1164_v45  ;;  %v1277_v32 = vperm.slane %v2415_v40, 2 }
 0x470   : > { %v1199_v53 = vpop.permute.xlu1 %1198 }
 0x471   : > { %v1206_v55 = vsub.f32 %v1199_v53, %v1205_v50  ;;  %v1214_v13 = vpop.permute.xlu0 %1213  ;;  %v1181_v61 = vsub.f32 %v1166_v52, %v1179_v24  ;;  %v1292_v53 = vperm.slane %v2415_v40, 3 }
 0x472   : > { %v1221_v34 = vsub.f32 %v1214_v13, %v1220_v48 }
 0x473   : > { %v1208_v28 = vand.u32 2147483647, %v1206_v55  ;;  %v1196_v37 = vsub.f32 %v1181_v61, %v1194_v44 }
 0x474   : > { %v1223_v62 = vand.u32 2147483647, %v1221_v34 }
 0x475   : > { %v1210_v63 = vsub.f32 %v1195_v59, %v1208_v28  ;;  %v1211_v7 = vsub.f32 %v1196_v37, %v1209_v4  ;;  %v1337_v4 = vperm.slane %v2415_v40, 6 }
 0x477   : > { %v1225_v3 = vsub.f32 %v1210_v63, %v1223_v62 }
 0x479   : > { %v1227_v19 = vmul.f32 1.442695, %v1225_v3  ;;  %v1218_v43 = vpop.permute.xlu1 %1217 }
 0x47a   : > { %v1222_v57 = vsub.f32 %v1218_v43, %v1220_v48  ;;  %v1241_v38 = vpop.permute.xlu0 %1240 }
 0x47b   : > { %1802 = vpow2.f32 %v1227_v19  ;;  %v1322_v19 = vperm.slane %v2415_v40, 5 }
 0x47c   : > { %v1224_v10 = vand.u32 2147483647, %v1222_v57 }
 0x47e   : > { %v1226_v8 = vsub.f32 %v1211_v7, %v1224_v10  ;;  %v1352_v7 = vperm.slane %v2415_v40, 7 }
 0x480   : > { %v1229_v41 = vmul.f32 1.442695, %v1226_v8 }
 0x481   : > { %v1803_v9 = vpop.eup %1802 }
 0x482   : > { %1804 = vpow2.f32 %v1229_v41  ;;  %v1231_v11 = vsel %vm2147_vm4, 0.0, %v1803_v9  ;;  %v1245_v25 = vpop.permute.xlu0 %1244 }
 0x483   : > { %v1233_v5 = vsel %vm440_vm3, %v1231_v11, 0.0 }
 0x484   : > { %1234 = vadd.xlane.f32.xlu2 %v1233_v5 }
 0x488   : > { %v1805_v12 = vpop.eup %1804 }
 0x489   : > { %v1232_v14 = vsel %vm2136_vm2, 0.0, %v1805_v12 }
 0x48a   : > { %v1236_v15 = vsel %vm440_vm3, %v1232_v14, 0.0 }
 0x48b   : > { %1237 = vadd.xlane.f32.xlu1 %v1236_v15  ;;  %v1256_v21 = vpop.permute.xlu0 %1255 }
 0x48c   : > { %v1263_v27 = vsub.f32 %v1256_v21, %v1262_v31 }
 0x48e   : > { %v1265_v50 = vand.u32 2147483647, %v1263_v27 }
 0x49c   : > { %1259 = vperm.xlu2 %1764, %v2255_v39  }
 0x4a4   : > { %1270 = vperm.xlu1 %1765, %v2252_v35   ;;  %1767 = vset.pattern.permute.xlu2 %v1951_v56 }
 0x4a5   : > { %1285 = vperm.xlu2 %1767, %v2252_v35  }
 0x4ac   : > { %1770 = vset.pattern.permute.xlu1 %v1954_v30 }
 0x4ad   : > { %1304 = vperm.xlu1 %1770, %v2255_v39   ;;  %1769 = vset.pattern.permute.xlu2 %v1954_v30 }
 0x4ae   : > { %1300 = vperm.xlu2 %1769, %v2252_v35  }
 0x4b5   : > { %1772 = vset.pattern.permute.xlu1 %v1955_v49 }
 0x4b6   : > { %1319 = vperm.xlu1 %1772, %v2255_v39   ;;  %1771 = vset.pattern.permute.xlu2 %v1955_v49 }
 0x4b7   : > { %1315 = vperm.xlu2 %1771, %v2252_v35  }
 0x4be   : > { %1775 = vset.pattern.permute.xlu1 %v1953_v16 }
 0x4bf   : > { %1345 = vperm.xlu1 %1775, %v2252_v35   ;;  %1774 = vset.pattern.permute.xlu2 %v1952_v46 }
 0x4c0   : > { %1334 = vperm.xlu2 %1774, %v2255_v39  }
 0x4c8   : > { %1776 = vset.pattern.permute.xlu2 %v1953_v16 }
 0x4c9   : > { %1349 = vperm.xlu2 %1776, %v2255_v39   ;;  %v1247_v39 = vperm.slane %v2415_v40, 0 }
 0x4cb   : > { %v1249_v42 = vsub.f32 %v1245_v25, %v1247_v39 }
 0x4cd   : > { %v1251_v45 = vand.u32 2147483647, %v1249_v42 }
 0x4cf   : > { %v1253_v51 = vsub.f32 0.0, %v1251_v45 }
 0x4f7   : > { %v1235_v56 = vpop.xlane.xlu2 %1234 }
 0x4f8   : > { %v2407_v17 = vsel %vm1386_vm10, %v2373_v0, %v1235_v56  ;;  %v1275_v0 = vpop.permute.xlu0 %1274 }
 0x4f9   : > { %v1279_v52 = vsub.f32 %v1275_v0, %v1277_v32 }
 0x4fb   : > { %v1281_v61 = vand.u32 2147483647, %v1279_v52 }
 0x4fe   : > { %v1238_v18 = vpop.xlane.xlu1 %1237 }
 0x4ff   : > { %v2410_v22 = vsel %vm1386_vm10, %v2370_v60, %v1238_v18  ;;  %v1260_v23 = vpop.permute.xlu2 %1259  ;;  %v1248_v60 = vsub.f32 %v1241_v38, %v1247_v39 }
 0x500   : > { %v1264_v33 = vsub.f32 %v1260_v23, %v1262_v31  ;;  %v1290_v24 = vpop.permute.xlu0 %1289 }
 0x501   : > { %v1250_v47 = vand.u32 2147483647, %v1248_v60  ;;  %v1294_v62 = vsub.f32 %v1290_v24, %v1292_v53 }
 0x502   : > { %v1266_v20 = vand.u32 2147483647, %v1264_v33 }
 0x503   : > { %v1252_v13 = vsub.f32 0.0, %v1250_v47  ;;  %v1296_v43 = vand.u32 2147483647, %v1294_v62 }
 0x504   : > { %v1268_v34 = vsub.f32 %v1253_v51, %v1266_v20 }
 0x505   : > { %v1267_v59 = vsub.f32 %v1252_v13, %v1265_v50 }
 0x506   : > { %v1283_v1 = vsub.f32 %v1268_v34, %v1281_v61 }
 0x507   : > { %v1286_v35 = vpop.permute.xlu2 %1285 }
 0x508   : > { %v1293_v28 = vsub.f32 %v1286_v35, %v1292_v53  ;;  %v1298_v9 = vsub.f32 %v1283_v1, %v1296_v43  ;;  %v1331_v15 = vpop.permute.xlu0 %1330 }
 0x509   : > { %v1338_v23 = vsub.f32 %v1331_v15, %v1337_v4 }
 0x50a   : > { %v1295_v3 = vand.u32 2147483647, %v1293_v28 }
 0x50b   : > { %v1340_v31 = vand.u32 2147483647, %v1338_v23 }
 0x50f   : > { %v1301_v46 = vpop.permute.xlu2 %1300 }
 0x510   : > { %v1308_v37 = vsub.f32 %v1301_v46, %v1307_v58 }
 0x512   : > { %v1310_v12 = vand.u32 2147483647, %v1308_v37 }
 0x516   : > { %v1271_v29 = vpop.permute.xlu1 %1270 }
 0x517   : > { %v1316_v36 = vpop.permute.xlu2 %1315  ;;  %v1278_v48 = vsub.f32 %v1271_v29, %v1277_v32 }
 0x518   : > { %v1323_v14 = vsub.f32 %v1316_v36, %v1322_v19 }
 0x519   : > { %v1280_v26 = vand.u32 2147483647, %v1278_v48 }
 0x51a   : > { %v1325_v25 = vand.u32 2147483647, %v1323_v14 }
 0x51b   : > { %v1282_v44 = vsub.f32 %v1267_v59, %v1280_v26 }
 0x51d   : > { %v1297_v10 = vsub.f32 %v1282_v44, %v1295_v3 }
 0x51f   : > { %v1305_v6 = vpop.permute.xlu1 %1304  ;;  %v1335_v55 = vpop.permute.xlu2 %1334  ;;  %v1312_v56 = vsub.f32 %v1297_v10, %v1310_v12 }
 0x520   : > { %v1309_v63 = vsub.f32 %v1305_v6, %v1307_v58  ;;  %v1339_v11 = vsub.f32 %v1335_v55, %v1337_v4 }
 0x521   : > { %v1327_v46 = vsub.f32 %v1312_v56, %v1325_v25 }
 0x522   : > { %v1311_v57 = vand.u32 2147483647, %v1309_v63  ;;  %v1341_v38 = vand.u32 2147483647, %v1339_v11 }
 0x523   : > { %v1342_v42 = vsub.f32 %v1327_v46, %v1340_v31 }
 0x524   : > { %v1313_v16 = vsub.f32 %v1298_v9, %v1311_v57 }
 0x527   : > { %v1350_v8 = vpop.permute.xlu2 %1349 }
 0x528   : > { %v1320_v41 = vpop.permute.xlu1 %1319  ;;  %v1354_v30 = vsub.f32 %v1350_v8, %v1352_v7 }
 0x529   : > { %v1324_v5 = vsub.f32 %v1320_v41, %v1322_v19 }
 0x52a   : > { %v1356_v35 = vand.u32 2147483647, %v1354_v30 }
 0x52b   : > { %v1326_v49 = vand.u32 2147483647, %v1324_v5 }
 0x52d   : > { %v1328_v18 = vsub.f32 %v1313_v16, %v1326_v49 }
 0x52f   : > { %v1343_v21 = vsub.f32 %v1328_v18, %v1341_v38 }
 0x531   : > { %v1358_v40 = vsub.f32 %v1343_v21, %v1356_v35  ;;  %v1346_v39 = vpop.permute.xlu1 %1345 }
 0x532   : > { %v1353_v0 = vsub.f32 %v1346_v39, %v1352_v7 }
 0x533   : > { %v1361_v29 = vmul.f32 1.442695, %v1358_v40 }
 0x534   : > { %v1355_v36 = vand.u32 2147483647, %v1353_v0 }
 0x535   : > { %1806 = vpow2.f32 %v1361_v29 }
 0x536   : > { %v1357_v60 = vsub.f32 %v1342_v42, %v1355_v36 }
 0x538   : > { %v1359_v33 = vmul.f32 1.442695, %v1357_v60 }
 0x53a   : > { %1808 = vpow2.f32 %v1359_v33 }
 0x53b   : > { %v1807_v27 = vpop.eup %1806 }
 0x53c   : > { %v1364_v32 = vsel %vm2136_vm2, 0.0, %v1807_v27 }
 0x53d   : > { %v1368_v45 = vsel %vm440_vm3, %v1364_v32, 0.0 }
 0x53e   : > { %1369 = vadd.xlane.f32.xlu0 %v1368_v45 }
 0x540   : > { %v1809_v47 = vpop.eup %1808 }
 0x541   : > { %v1363_v48 = vsel %vm2147_vm4, 0.0, %v1809_v47 }
 0x542   : > { %v1365_v20 = vsel %vm440_vm3, %v1363_v48, 0.0 }
 0x543   : > { %1366 = vadd.xlane.f32.xlu1 %v1365_v20 }
 0x5b1   : > { %v1370_v50 = vpop.xlane.xlu0 %1369 }
 0x5b2   : > { %v1391_v54 = vsel %vm1389_vm11, %v2410_v22, %v1370_v50 }
 0x5b3   : > { %v1394_v51 = vsel %vm1392_vm12, %v1391_v54, 0.0 }
 0x5b4   : > { %1407 = vst [vmem:[%s229_s23 + $0x8] sm:$0xff] %v1394_v51 }
 0x5b6   : > { %v1367_v2 = vpop.xlane.xlu1 %1366 }
 0x5b7   : > { %v1390_v52 = vsel %vm1389_vm11, %v2407_v17, %v1367_v2 }
 0x5b8   : > { %v1393_v53 = vsel %vm1392_vm12, %v1390_v52, 0.0 }
 0x5b9   : > { %1406 = vst [vmem:[%s229_s23] sm:$0xff] %v1393_v53 }
 0x5ba   : > { %1839 = shalt.err (!%p1836_p5)
}
 0x5bb   : > { %s1956_s9 = smov 128   ;;  %s1957_s10 = smov 8  }
 0x5bc   : > { %1545 = dma.vmem_to_hbm [thread:$0]  (%p2023_p4), %s1422_s25, 256, %s1424_s28, %s1409_s18, %s1956_s9, %s1956_s9, %s1957_s10  }
 0x5bd PF: > { %p1551_p6 = scmp.ge.s32.totalorder %s1890_s20, 2  ;;  %s1438_s11 = sand.u32 1, %s1870_s15  }
 0x5be   : > { %s1439_s12 = scalar_lea.sflag [#allocation5], %s1438_s11 }
 0x5bf   : > { %p1548_p7 = pnand %p1551_p6, %p2030_p8 }
 0x5c1   : > { %p1549_p9 = pneg %p1548_p7 }
 0x5c3   : > { %1865 = dma.done.wait (%p1549_p9), %s1439_s12, 256  }
 0x5c4   : > { %1867 = vsyncadd (%p1549_p9), %s1439_s12, 4294967040  ;;  %s17_s20 = sadd.s32 1, %s1890_s20   ;;  %s2482_s15 = smov %s1874_s16 }
 0x5c5   : > { %p14_p10 = scmp.ge.s32.totalorder %s17_s20, 4   ;;  %s2483_s16 = smov %s1878_s17 }
 0x5c6   : > { %s2484_s17 = smov %s2036_s27  ;;  %s2485_s18 = smov %s1886_s19 }
 0x5c7   : > { %s2486_s19 = smov %s2488_s22  ;;  %16 = sbr.rel (!%p14_p10) target bundleno = 4 (0x4), region = 85 }
 0x5cc   :  { %1445 = vsyncpa [#allocation5], 1 }
 0x5cd   :  { %1447 = vsyncpa [#allocation5 + $0x1], 1 }

</bundles_post_ra>
